<compile_context>
chip_gen: v7x
topology: tpu7x:2x2x1
jax: 0.10.0
libtpu: 0.0.40
codegen_flags: <defaults>
</compile_context>

<pallas_src>
import jax
import jax.numpy as jnp
from jax.experimental import pallas as pl
from jax.experimental.pallas import tpu as pltpu


# ----------------------------------------------------------------------------
# Pallas kernel: fused concat + DoubleConv (conv3x3+ReLU, conv3x3+ReLU), NHWC
# ----------------------------------------------------------------------------
def make_up_double_conv_kernel(H, W, C2, C1, Cmid, Cout):
    Ctot = C2 + C1

    def kernel(x2_ref, x1_ref, w1_ref, b1_ref, w2_ref, b2_ref, o_ref,
               pad1_ref, slab1_ref, pad2_ref, slab2_ref):
        # x2_ref:   (1, H, W, C2)  f32   skip connection
        # x1_ref:   (1, H, W, C1)  f32   upsampled + padded decoder features
        # w1_ref:   (9*Ctot, Cmid) bf16  im2col-reshaped HWIO conv1 weights
        # b1_ref:   (1, Cmid)      f32
        # w2_ref:   (9*Cmid, Cout) bf16  im2col-reshaped HWIO conv2 weights
        # b2_ref:   (1, Cout)      f32
        # o_ref:    (1, H*W, Cout) f32
        # pad1_ref: VMEM (H+2, W+2, Ctot) f32   zero-padded conv1 input
        # slab1_ref:VMEM (H, W, 9*Ctot)   bf16  im2col slab for conv1
        # pad2_ref: VMEM (H+2, W+2, Cmid) f32   zero-padded conv2 input
        # slab2_ref:VMEM (H, W, 9*Cmid)   bf16  im2col slab for conv2
        f32 = jnp.float32
        bf16 = jnp.bfloat16

        # ---- stage inputs into the zero-padded conv1 buffer ------------------
        # Only the 1-pixel border needs zeroing (interior is fully overwritten
        # every grid step).  Border zeroing is done every step (cheap, and safe
        # when the "parallel" batch axis is sharded across TensorCores).
        zrow1 = jnp.zeros((1, W + 2, Ctot), f32)
        zcol1 = jnp.zeros((H + 2, 1, Ctot), f32)
        pad1_ref[0:1, :, :] = zrow1
        pad1_ref[H + 1:H + 2, :, :] = zrow1
        pad1_ref[:, 0:1, :] = zcol1
        pad1_ref[:, W + 1:W + 2, :] = zcol1
        # fused channel concat: x2 channels first, then (upsampled) x1 channels
        pad1_ref[1:H + 1, 1:W + 1, 0:C2] = x2_ref[0]
        pad1_ref[1:H + 1, 1:W + 1, C2:Ctot] = x1_ref[0]

        # ---- conv1: one im2col matmul, K = 9*Ctot, bf16 on the MXU -----------
        for dy in range(3):
            for dx in range(3):
                t = dy * 3 + dx
                slab1_ref[:, :, t * Ctot:(t + 1) * Ctot] = (
                    pad1_ref[dy:dy + H, dx:dx + W, :].astype(bf16))
        lhs1 = slab1_ref[...].reshape(H * W, 9 * Ctot)          # tile-aligned collapse
        h1 = jnp.dot(lhs1, w1_ref[...], preferred_element_type=f32)
        h1 = jnp.maximum(h1 + b1_ref[...], 0.0)                  # (H*W, Cmid) f32

        # ---- stage h1 into the zero-padded conv2 buffer ----------------------
        zrow2 = jnp.zeros((1, W + 2, Cmid), f32)
        zcol2 = jnp.zeros((H + 2, 1, Cmid), f32)
        pad2_ref[0:1, :, :] = zrow2
        pad2_ref[H + 1:H + 2, :, :] = zrow2
        pad2_ref[:, 0:1, :] = zcol2
        pad2_ref[:, W + 1:W + 2, :] = zcol2
        pad2_ref[1:H + 1, 1:W + 1, :] = h1.reshape(H, W, Cmid)

        # ---- conv2: one im2col matmul, K = 9*Cmid -----------------------------
        for dy in range(3):
            for dx in range(3):
                t = dy * 3 + dx
                slab2_ref[:, :, t * Cmid:(t + 1) * Cmid] = (
                    pad2_ref[dy:dy + H, dx:dx + W, :].astype(bf16))
        lhs2 = slab2_ref[...].reshape(H * W, 9 * Cmid)
        h2 = jnp.dot(lhs2, w2_ref[...], preferred_element_type=f32)
        o_ref[0] = jnp.maximum(h2 + b2_ref[...], 0.0)            # (H*W, Cout) f32

    return kernel


def up_double_conv_pallas(x2_nhwc, x1_nhwc, w1_hwio, b1, w2_hwio, b2):
    """x2_nhwc: (N,H,W,C2), x1_nhwc: (N,H,W,C1) f32; weights HWIO; biases (C,).
    Returns NHWC f32 output of the DoubleConv over concat([x2, x1], channel)."""
    N, H, W, C2 = x2_nhwc.shape
    C1 = x1_nhwc.shape[-1]
    Ctot = C2 + C1
    Cmid = w1_hwio.shape[-1]
    Cout = w2_hwio.shape[-1]
    assert w1_hwio.shape == (3, 3, Ctot, Cmid)
    assert w2_hwio.shape == (3, 3, Cmid, Cout)

    # im2col weight layout: row index = (dy*3 + dx)*Cin + cin  ==  HWIO reshape.
    w1m = w1_hwio.reshape(9 * Ctot, Cmid).astype(jnp.bfloat16)
    w2m = w2_hwio.reshape(9 * Cmid, Cout).astype(jnp.bfloat16)
    b1r = b1.reshape(1, Cmid).astype(jnp.float32)
    b2r = b2.reshape(1, Cout).astype(jnp.float32)

    kernel = make_up_double_conv_kernel(H, W, C2, C1, Cmid, Cout)
    out = pl.pallas_call(
        kernel,
        out_shape=jax.ShapeDtypeStruct((N, H * W, Cout), jnp.float32),
        grid_spec=pltpu.PrefetchScalarGridSpec(
            num_scalar_prefetch=0,
            grid=(N,),
            in_specs=[
                pl.BlockSpec((1, H, W, C2), lambda n: (n, 0, 0, 0)),
                pl.BlockSpec((1, H, W, C1), lambda n: (n, 0, 0, 0)),
                pl.BlockSpec((9 * Ctot, Cmid), lambda n: (0, 0)),
                pl.BlockSpec((1, Cmid), lambda n: (0, 0)),
                pl.BlockSpec((9 * Cmid, Cout), lambda n: (0, 0)),
                pl.BlockSpec((1, Cout), lambda n: (0, 0)),
            ],
            out_specs=pl.BlockSpec((1, H * W, Cout), lambda n: (n, 0, 0)),
            scratch_shapes=[
                pltpu.VMEM((H + 2, W + 2, Ctot), jnp.float32),   # padded conv1 input
                pltpu.VMEM((H, W, 9 * Ctot), jnp.bfloat16),      # im2col slab conv1
                pltpu.VMEM((H + 2, W + 2, Cmid), jnp.float32),   # padded conv2 input
                pltpu.VMEM((H, W, 9 * Cmid), jnp.bfloat16),      # im2col slab conv2
            ],
        ),
        compiler_params=pltpu.CompilerParams(
            dimension_semantics=("parallel",),
            vmem_limit_bytes=48 * 1024 * 1024,
        ),
    )(x2_nhwc.astype(jnp.float32), x1_nhwc.astype(jnp.float32),
      w1m, b1r, w2m, b2r)
    return out.reshape(N, H, W, Cout)


# ----------------------------------------------------------------------------
# Glue: bilinear 2x upsample (align_corners=True) + pad (plain JAX, cheap)
# ----------------------------------------------------------------------------
def bilinear_upsample_2x_align_corners(x_nhwc):
    """PyTorch nn.Upsample(scale_factor=2, mode='bilinear', align_corners=True)."""
    N, H, W, C = x_nhwc.shape
    Ho, Wo = 2 * H, 2 * W

    def coords(size_in, size_out):
        if size_out == 1 or size_in == 1:
            return jnp.zeros((size_out,), jnp.float32)
        return jnp.arange(size_out, dtype=jnp.float32) * (size_in - 1) / (size_out - 1)

    ys = coords(H, Ho)
    xs = coords(W, Wo)
    y0 = jnp.floor(ys).astype(jnp.int32)
    y1 = jnp.minimum(y0 + 1, H - 1)
    xi0 = jnp.floor(xs).astype(jnp.int32)
    xi1 = jnp.minimum(xi0 + 1, W - 1)
    wy = (ys - y0.astype(jnp.float32))[None, :, None, None]
    wx = (xs - xi0.astype(jnp.float32))[None, None, :, None]

    a = x_nhwc[:, y0][:, :, xi0]
    b = x_nhwc[:, y0][:, :, xi1]
    c = x_nhwc[:, y1][:, :, xi0]
    d = x_nhwc[:, y1][:, :, xi1]
    top = a * (1.0 - wx) + b * wx
    bot = c * (1.0 - wx) + d * wx
    return top * (1.0 - wy) + bot * wy


def _prepare_inputs(x1_nchw, x2_nchw):
    """Returns (x2_nhwc, x1_upsampled_padded_nhwc); concat happens in-kernel."""
    x1 = jnp.transpose(x1_nchw, (0, 2, 3, 1))  # NHWC
    x2 = jnp.transpose(x2_nchw, (0, 2, 3, 1))
    x1u = bilinear_upsample_2x_align_corners(x1)
    diffY = x2.shape[1] - x1u.shape[1]
    diffX = x2.shape[2] - x1u.shape[2]
    x1p = jnp.pad(x1u, ((0, 0),
                        (diffY // 2, diffY - diffY // 2),
                        (diffX // 2, diffX - diffX // 2),
                        (0, 0)))
    return x2, x1p


def up_forward(x1_nchw, x2_nchw, params):
    """Pallas-backed Up.forward. Inputs/outputs NCHW, weights PyTorch OIHW.
    (In an all-NHWC model the two transposes below would disappear.)"""
    w1, b1, w2, b2 = params
    x2n, x1p = _prepare_inputs(x1_nchw, x2_nchw)
    w1_hwio = jnp.transpose(w1, (2, 3, 1, 0))
    w2_hwio = jnp.transpose(w2, (2, 3, 1, 0))
    y = up_double_conv_pallas(x2n, x1p, w1_hwio, b1, w2_hwio, b2)
    return jnp.transpose(y, (0, 3, 1, 2))  # back to NCHW


# ----------------------------------------------------------------------------
# Pure-JAX f32 reference (for correctness check)
# ----------------------------------------------------------------------------
def up_reference(x1_nchw, x2_nchw, params):
    w1, b1, w2, b2 = params
    x2n, x1p = _prepare_inputs(x1_nchw, x2_nchw)
    x = jnp.concatenate([x2n, x1p], axis=-1)

    def conv_relu(x_nhwc, w_oihw, b):
        w_hwio = jnp.transpose(w_oihw, (2, 3, 1, 0))
        y = jax.lax.conv_general_dilated(
            x_nhwc, w_hwio, window_strides=(1, 1), padding="SAME",
            dimension_numbers=("NHWC", "HWIO", "NHWC"))
        return jnp.maximum(y + b[None, None, None, :], 0.0)

    y = conv_relu(conv_relu(x, w1, b1), w2, b2)
    return jnp.transpose(y, (0, 3, 1, 2))


# ----------------------------------------------------------------------------
if __name__ == "__main__":
    key = jax.random.PRNGKey(0)
    kx1, kx2, kw1, kb1, kw2, kb2 = jax.random.split(key, 6)

    N = 2
    in_channels, out_channels = 8, 4        # Up(in_channels=8, out_channels=4)
    c1 = in_channels // 2                   # channels of x1 (decoder path)
    c2 = in_channels - c1                   # channels of x2 (skip connection)
    H2 = W2 = 16

    # x1 at half spatial resolution, x2 at full resolution (classic UNet Up)
    x1 = jax.random.normal(kx1, (N, c1, H2 // 2, W2 // 2), jnp.float32)
    x2 = jax.random.normal(kx2, (N, c2, H2, W2), jnp.float32)

    # Deterministic parameter init (PyTorch OIHW conv weight layout).
    w1 = jax.random.normal(kw1, (out_channels, in_channels, 3, 3), jnp.float32) * 0.1
    b1 = jax.random.normal(kb1, (out_channels,), jnp.float32) * 0.1
    w2 = jax.random.normal(kw2, (out_channels, out_channels, 3, 3), jnp.float32) * 0.1
    b2 = jax.random.normal(kb2, (out_channels,), jnp.float32) * 0.1
    params = (w1, b1, w2, b2)

    y = up_forward(x1, x2, params)
    y = jax.block_until_ready(y)

    y_ref = up_reference(x1, x2, params)
    assert y.shape == (N, out_channels, H2, W2), y.shape
    assert y.dtype == jnp.float32
    max_err = float(jnp.max(jnp.abs(y - y_ref)))
    # bf16 MXU matmuls (f32 accumulation) vs f32 reference -> loosened tolerance.
    assert max_err < 6e-2, f"mismatch vs reference: {max_err}"

    print("KERNEL_OK")
</pallas_src>

<mosaic_0001>
module attributes {stable_mosaic.version = 11 : i64} {
  func.func @kernel(%arg0: i32, %arg1: memref<1x16x16x4xf32, #tpu.memory_space<vmem>>, %arg2: memref<1x16x16x4xf32, #tpu.memory_space<vmem>>, %arg3: memref<72x4xbf16, #tpu.memory_space<vmem>>, %arg4: memref<1x4xf32, #tpu.memory_space<vmem>>, %arg5: memref<36x4xbf16, #tpu.memory_space<vmem>>, %arg6: memref<1x4xf32, #tpu.memory_space<vmem>>, %arg7: memref<1x256x4xf32, #tpu.memory_space<vmem>>, %arg8: memref<18x18x8xf32, #tpu.memory_space<vmem>>, %arg9: memref<16x16x72xbf16, #tpu.memory_space<vmem>>, %arg10: memref<18x18x4xf32, #tpu.memory_space<vmem>>, %arg11: memref<16x16x36xbf16, #tpu.memory_space<vmem>>) attributes {dimension_semantics = [#tpu.dimension_semantics<parallel>], iteration_bounds = array<i64: 2>, scalar_prefetch = 0 : i64, scratch_operands = 4 : i64, tpu.core_type = #tpu.core_type<tc>, window_params = [{transform_indices = @transform_0, window_bounds = array<i64: 1, 16, 16, 4>}, {transform_indices = @transform_1, window_bounds = array<i64: 1, 16, 16, 4>}, {pipeline_mode = #tpu.pipeline_mode<synchronous>, transform_indices = @transform_2, window_bounds = array<i64: 72, 4>}, {pipeline_mode = #tpu.pipeline_mode<synchronous>, transform_indices = @transform_3, window_bounds = array<i64: 1, 4>}, {pipeline_mode = #tpu.pipeline_mode<synchronous>, transform_indices = @transform_4, window_bounds = array<i64: 36, 4>}, {pipeline_mode = #tpu.pipeline_mode<synchronous>, transform_indices = @transform_5, window_bounds = array<i64: 1, 4>}, {transform_indices = @transform_6, window_bounds = array<i64: 1, 256, 4>}]} {
    %cst = arith.constant 0.000000e+00 : f32
    %0 = vector.broadcast %cst : f32 to vector<1x18x8xf32>
    %cst_0 = arith.constant 0.000000e+00 : f32
    %1 = vector.broadcast %cst_0 : f32 to vector<18x1x8xf32>
    %c0 = arith.constant 0 : index
    %c0_1 = arith.constant 0 : index
    %c0_2 = arith.constant 0 : index
    %2 = vector.load %arg8[%c0, %c0_1, %c0_2] : memref<18x18x8xf32, #tpu.memory_space<vmem>>, vector<1x18x8xf32>
    tpu.vector_store %arg8[%c0, %c0_1, %c0_2], %0 {strides = array<i32>} : memref<18x18x8xf32, #tpu.memory_space<vmem>>, vector<1x18x8xf32>,
    %c17 = arith.constant 17 : index
    %c0_3 = arith.constant 0 : index
    %c0_4 = arith.constant 0 : index
    %3 = vector.load %arg8[%c17, %c0_3, %c0_4] : memref<18x18x8xf32, #tpu.memory_space<vmem>>, vector<1x18x8xf32>
    tpu.vector_store %arg8[%c17, %c0_3, %c0_4], %0 {strides = array<i32>} : memref<18x18x8xf32, #tpu.memory_space<vmem>>, vector<1x18x8xf32>,
    %c0_5 = arith.constant 0 : index
    %c0_6 = arith.constant 0 : index
    %c0_7 = arith.constant 0 : index
    %4 = vector.load %arg8[%c0_5, %c0_6, %c0_7] : memref<18x18x8xf32, #tpu.memory_space<vmem>>, vector<18x1x8xf32>
    tpu.vector_store %arg8[%c0_5, %c0_6, %c0_7], %1 {strides = array<i32>} : memref<18x18x8xf32, #tpu.memory_space<vmem>>, vector<18x1x8xf32>,
    %c0_8 = arith.constant 0 : index
    %c17_9 = arith.constant 17 : index
    %c0_10 = arith.constant 0 : index
    %5 = vector.load %arg8[%c0_8, %c17_9, %c0_10] : memref<18x18x8xf32, #tpu.memory_space<vmem>>, vector<18x1x8xf32>
    tpu.vector_store %arg8[%c0_8, %c17_9, %c0_10], %1 {strides = array<i32>} : memref<18x18x8xf32, #tpu.memory_space<vmem>>, vector<18x1x8xf32>,
    %c0_11 = arith.constant 0 : index
    %c0_12 = arith.constant 0 : index
    %c0_13 = arith.constant 0 : index
    %c0_14 = arith.constant 0 : index
    %6 = vector.load %arg1[%c0_11, %c0_12, %c0_13, %c0_14] : memref<1x16x16x4xf32, #tpu.memory_space<vmem>>, vector<1x16x16x4xf32>
    %7 = vector.shape_cast %6 : vector<1x16x16x4xf32> to vector<16x16x4xf32>
    %c1 = arith.constant 1 : index
    %c1_15 = arith.constant 1 : index
    %c0_16 = arith.constant 0 : index
    %8 = vector.load %arg8[%c1, %c1_15, %c0_16] : memref<18x18x8xf32, #tpu.memory_space<vmem>>, vector<16x16x4xf32>
    tpu.vector_store %arg8[%c1, %c1_15, %c0_16], %7 {strides = array<i32>} : memref<18x18x8xf32, #tpu.memory_space<vmem>>, vector<16x16x4xf32>,
    %c0_17 = arith.constant 0 : index
    %c0_18 = arith.constant 0 : index
    %c0_19 = arith.constant 0 : index
    %c0_20 = arith.constant 0 : index
    %9 = vector.load %arg2[%c0_17, %c0_18, %c0_19, %c0_20] : memref<1x16x16x4xf32, #tpu.memory_space<vmem>>, vector<1x16x16x4xf32>
    %10 = vector.shape_cast %9 : vector<1x16x16x4xf32> to vector<16x16x4xf32>
    %c1_21 = arith.constant 1 : index
    %c1_22 = arith.constant 1 : index
    %c4 = arith.constant 4 : index
    %11 = vector.load %arg8[%c1_21, %c1_22, %c4] : memref<18x18x8xf32, #tpu.memory_space<vmem>>, vector<16x16x4xf32>
    tpu.vector_store %arg8[%c1_21, %c1_22, %c4], %10 {strides = array<i32>} : memref<18x18x8xf32, #tpu.memory_space<vmem>>, vector<16x16x4xf32>,
    %c0_23 = arith.constant 0 : index
    %c0_24 = arith.constant 0 : index
    %c0_25 = arith.constant 0 : index
    %12 = vector.load %arg8[%c0_23, %c0_24, %c0_25] : memref<18x18x8xf32, #tpu.memory_space<vmem>>, vector<16x16x8xf32>
    %13 = arith.truncf %12 : vector<16x16x8xf32> to vector<16x16x8xbf16>
    %c0_26 = arith.constant 0 : index
    %c0_27 = arith.constant 0 : index
    %c0_28 = arith.constant 0 : index
    %14 = vector.load %arg9[%c0_26, %c0_27, %c0_28] : memref<16x16x72xbf16, #tpu.memory_space<vmem>>, vector<16x16x8xbf16>
    tpu.vector_store %arg9[%c0_26, %c0_27, %c0_28], %13 {strides = array<i32>} : memref<16x16x72xbf16, #tpu.memory_space<vmem>>, vector<16x16x8xbf16>,
    %c0_29 = arith.constant 0 : index
    %c1_30 = arith.constant 1 : index
    %c0_31 = arith.constant 0 : index
    %15 = vector.load %arg8[%c0_29, %c1_30, %c0_31] : memref<18x18x8xf32, #tpu.memory_space<vmem>>, vector<16x16x8xf32>
    %16 = arith.truncf %15 : vector<16x16x8xf32> to vector<16x16x8xbf16>
    %c0_32 = arith.constant 0 : index
    %c0_33 = arith.constant 0 : index
    %c8 = arith.constant 8 : index
    %17 = vector.load %arg9[%c0_32, %c0_33, %c8] : memref<16x16x72xbf16, #tpu.memory_space<vmem>>, vector<16x16x8xbf16>
    tpu.vector_store %arg9[%c0_32, %c0_33, %c8], %16 {strides = array<i32>} : memref<16x16x72xbf16, #tpu.memory_space<vmem>>, vector<16x16x8xbf16>,
    %c0_34 = arith.constant 0 : index
    %c2 = arith.constant 2 : index
    %c0_35 = arith.constant 0 : index
    %18 = vector.load %arg8[%c0_34, %c2, %c0_35] : memref<18x18x8xf32, #tpu.memory_space<vmem>>, vector<16x16x8xf32>
    %19 = arith.truncf %18 : vector<16x16x8xf32> to vector<16x16x8xbf16>
    %c0_36 = arith.constant 0 : index
    %c0_37 = arith.constant 0 : index
    %c16 = arith.constant 16 : index
    %20 = vector.load %arg9[%c0_36, %c0_37, %c16] : memref<16x16x72xbf16, #tpu.memory_space<vmem>>, vector<16x16x8xbf16>
    tpu.vector_store %arg9[%c0_36, %c0_37, %c16], %19 {strides = array<i32>} : memref<16x16x72xbf16, #tpu.memory_space<vmem>>, vector<16x16x8xbf16>,
    %c1_38 = arith.constant 1 : index
    %c0_39 = arith.constant 0 : index
    %c0_40 = arith.constant 0 : index
    %21 = vector.load %arg8[%c1_38, %c0_39, %c0_40] : memref<18x18x8xf32, #tpu.memory_space<vmem>>, vector<16x16x8xf32>
    %22 = arith.truncf %21 : vector<16x16x8xf32> to vector<16x16x8xbf16>
    %c0_41 = arith.constant 0 : index
    %c0_42 = arith.constant 0 : index
    %c24 = arith.constant 24 : index
    %23 = vector.load %arg9[%c0_41, %c0_42, %c24] : memref<16x16x72xbf16, #tpu.memory_space<vmem>>, vector<16x16x8xbf16>
    tpu.vector_store %arg9[%c0_41, %c0_42, %c24], %22 {strides = array<i32>} : memref<16x16x72xbf16, #tpu.memory_space<vmem>>, vector<16x16x8xbf16>,
    %c1_43 = arith.constant 1 : index
    %c1_44 = arith.constant 1 : index
    %c0_45 = arith.constant 0 : index
    %24 = vector.load %arg8[%c1_43, %c1_44, %c0_45] : memref<18x18x8xf32, #tpu.memory_space<vmem>>, vector<16x16x8xf32>
    %25 = arith.truncf %24 : vector<16x16x8xf32> to vector<16x16x8xbf16>
    %c0_46 = arith.constant 0 : index
    %c0_47 = arith.constant 0 : index
    %c32 = arith.constant 32 : index
    %26 = vector.load %arg9[%c0_46, %c0_47, %c32] : memref<16x16x72xbf16, #tpu.memory_space<vmem>>, vector<16x16x8xbf16>
    tpu.vector_store %arg9[%c0_46, %c0_47, %c32], %25 {strides = array<i32>} : memref<16x16x72xbf16, #tpu.memory_space<vmem>>, vector<16x16x8xbf16>,
    %c1_48 = arith.constant 1 : index
    %c2_49 = arith.constant 2 : index
    %c0_50 = arith.constant 0 : index
    %27 = vector.load %arg8[%c1_48, %c2_49, %c0_50] : memref<18x18x8xf32, #tpu.memory_space<vmem>>, vector<16x16x8xf32>
    %28 = arith.truncf %27 : vector<16x16x8xf32> to vector<16x16x8xbf16>
    %c0_51 = arith.constant 0 : index
    %c0_52 = arith.constant 0 : index
    %c40 = arith.constant 40 : index
    %29 = vector.load %arg9[%c0_51, %c0_52, %c40] : memref<16x16x72xbf16, #tpu.memory_space<vmem>>, vector<16x16x8xbf16>
    tpu.vector_store %arg9[%c0_51, %c0_52, %c40], %28 {strides = array<i32>} : memref<16x16x72xbf16, #tpu.memory_space<vmem>>, vector<16x16x8xbf16>,
    %c2_53 = arith.constant 2 : index
    %c0_54 = arith.constant 0 : index
    %c0_55 = arith.constant 0 : index
    %30 = vector.load %arg8[%c2_53, %c0_54, %c0_55] : memref<18x18x8xf32, #tpu.memory_space<vmem>>, vector<16x16x8xf32>
    %31 = arith.truncf %30 : vector<16x16x8xf32> to vector<16x16x8xbf16>
    %c0_56 = arith.constant 0 : index
    %c0_57 = arith.constant 0 : index
    %c48 = arith.constant 48 : index
    %32 = vector.load %arg9[%c0_56, %c0_57, %c48] : memref<16x16x72xbf16, #tpu.memory_space<vmem>>, vector<16x16x8xbf16>
    tpu.vector_store %arg9[%c0_56, %c0_57, %c48], %31 {strides = array<i32>} : memref<16x16x72xbf16, #tpu.memory_space<vmem>>, vector<16x16x8xbf16>,
    %c2_58 = arith.constant 2 : index
    %c1_59 = arith.constant 1 : index
    %c0_60 = arith.constant 0 : index
    %33 = vector.load %arg8[%c2_58, %c1_59, %c0_60] : memref<18x18x8xf32, #tpu.memory_space<vmem>>, vector<16x16x8xf32>
    %34 = arith.truncf %33 : vector<16x16x8xf32> to vector<16x16x8xbf16>
    %c0_61 = arith.constant 0 : index
    %c0_62 = arith.constant 0 : index
    %c56 = arith.constant 56 : index
    %35 = vector.load %arg9[%c0_61, %c0_62, %c56] : memref<16x16x72xbf16, #tpu.memory_space<vmem>>, vector<16x16x8xbf16>
    tpu.vector_store %arg9[%c0_61, %c0_62, %c56], %34 {strides = array<i32>} : memref<16x16x72xbf16, #tpu.memory_space<vmem>>, vector<16x16x8xbf16>,
    %c2_63 = arith.constant 2 : index
    %c2_64 = arith.constant 2 : index
    %c0_65 = arith.constant 0 : index
    %36 = vector.load %arg8[%c2_63, %c2_64, %c0_65] : memref<18x18x8xf32, #tpu.memory_space<vmem>>, vector<16x16x8xf32>
    %37 = arith.truncf %36 : vector<16x16x8xf32> to vector<16x16x8xbf16>
    %c0_66 = arith.constant 0 : index
    %c0_67 = arith.constant 0 : index
    %c64 = arith.constant 64 : index
    %38 = vector.load %arg9[%c0_66, %c0_67, %c64] : memref<16x16x72xbf16, #tpu.memory_space<vmem>>, vector<16x16x8xbf16>
    tpu.vector_store %arg9[%c0_66, %c0_67, %c64], %37 {strides = array<i32>} : memref<16x16x72xbf16, #tpu.memory_space<vmem>>, vector<16x16x8xbf16>,
    %c0_68 = arith.constant 0 : index
    %c0_69 = arith.constant 0 : index
    %c0_70 = arith.constant 0 : index
    %39 = vector.load %arg9[%c0_68, %c0_69, %c0_70] : memref<16x16x72xbf16, #tpu.memory_space<vmem>>, vector<16x16x72xbf16>
    %40 = vector.shape_cast %39 : vector<16x16x72xbf16> to vector<256x72xbf16>
    %c0_71 = arith.constant 0 : index
    %c0_72 = arith.constant 0 : index
    %41 = vector.load %arg3[%c0_71, %c0_72] : memref<72x4xbf16, #tpu.memory_space<vmem>>, vector<72x4xbf16>
    %cst_73 = arith.constant dense<0.000000e+00> : vector<256x4xf32>
    %42 = tpu.matmul %40, %41, %cst_73 {dimension_numbers = #tpu.dot_dimension_numbers<[1], [0], [0], [1], [0, 0, 1, 1], [], []>} : vector<256x72xbf16>, vector<72x4xbf16>, vector<256x4xf32> -> vector<256x4xf32>
    %c0_74 = arith.constant 0 : index
    %c0_75 = arith.constant 0 : index
    %43 = vector.load %arg4[%c0_74, %c0_75] : memref<1x4xf32, #tpu.memory_space<vmem>>, vector<1x4xf32>
    %44 = vector.broadcast %43 : vector<1x4xf32> to vector<256x4xf32>
    %45 = arith.addf %42, %44 : vector<256x4xf32>
    %cst_76 = arith.constant 0.000000e+00 : f32
    %46 = vector.broadcast %cst_76 : f32 to vector<256x4xf32>
    %47 = arith.maximumf %45, %46 : vector<256x4xf32>
    %cst_77 = arith.constant 0.000000e+00 : f32
    %48 = vector.broadcast %cst_77 : f32 to vector<1x18x4xf32>
    %cst_78 = arith.constant 0.000000e+00 : f32
    %49 = vector.broadcast %cst_78 : f32 to vector<18x1x4xf32>
    %c0_79 = arith.constant 0 : index
    %c0_80 = arith.constant 0 : index
    %c0_81 = arith.constant 0 : index
    %50 = vector.load %arg10[%c0_79, %c0_80, %c0_81] : memref<18x18x4xf32, #tpu.memory_space<vmem>>, vector<1x18x4xf32>
    tpu.vector_store %arg10[%c0_79, %c0_80, %c0_81], %48 {strides = array<i32>} : memref<18x18x4xf32, #tpu.memory_space<vmem>>, vector<1x18x4xf32>,
    %c17_82 = arith.constant 17 : index
    %c0_83 = arith.constant 0 : index
    %c0_84 = arith.constant 0 : index
    %51 = vector.load %arg10[%c17_82, %c0_83, %c0_84] : memref<18x18x4xf32, #tpu.memory_space<vmem>>, vector<1x18x4xf32>
    tpu.vector_store %arg10[%c17_82, %c0_83, %c0_84], %48 {strides = array<i32>} : memref<18x18x4xf32, #tpu.memory_space<vmem>>, vector<1x18x4xf32>,
    %c0_85 = arith.constant 0 : index
    %c0_86 = arith.constant 0 : index
    %c0_87 = arith.constant 0 : index
    %52 = vector.load %arg10[%c0_85, %c0_86, %c0_87] : memref<18x18x4xf32, #tpu.memory_space<vmem>>, vector<18x1x4xf32>
    tpu.vector_store %arg10[%c0_85, %c0_86, %c0_87], %49 {strides = array<i32>} : memref<18x18x4xf32, #tpu.memory_space<vmem>>, vector<18x1x4xf32>,
    %c0_88 = arith.constant 0 : index
    %c17_89 = arith.constant 17 : index
    %c0_90 = arith.constant 0 : index
    %53 = vector.load %arg10[%c0_88, %c17_89, %c0_90] : memref<18x18x4xf32, #tpu.memory_space<vmem>>, vector<18x1x4xf32>
    tpu.vector_store %arg10[%c0_88, %c17_89, %c0_90], %49 {strides = array<i32>} : memref<18x18x4xf32, #tpu.memory_space<vmem>>, vector<18x1x4xf32>,
    %54 = vector.shape_cast %47 : vector<256x4xf32> to vector<16x16x4xf32>
    %c1_91 = arith.constant 1 : index
    %c1_92 = arith.constant 1 : index
    %c0_93 = arith.constant 0 : index
    %55 = vector.load %arg10[%c1_91, %c1_92, %c0_93] : memref<18x18x4xf32, #tpu.memory_space<vmem>>, vector<16x16x4xf32>
    tpu.vector_store %arg10[%c1_91, %c1_92, %c0_93], %54 {strides = array<i32>} : memref<18x18x4xf32, #tpu.memory_space<vmem>>, vector<16x16x4xf32>,
    %c0_94 = arith.constant 0 : index
    %c0_95 = arith.constant 0 : index
    %c0_96 = arith.constant 0 : index
    %56 = vector.load %arg10[%c0_94, %c0_95, %c0_96] : memref<18x18x4xf32, #tpu.memory_space<vmem>>, vector<16x16x4xf32>
    %57 = arith.truncf %56 : vector<16x16x4xf32> to vector<16x16x4xbf16>
    %c0_97 = arith.constant 0 : index
    %c0_98 = arith.constant 0 : index
    %c0_99 = arith.constant 0 : index
    %58 = vector.load %arg11[%c0_97, %c0_98, %c0_99] : memref<16x16x36xbf16, #tpu.memory_space<vmem>>, vector<16x16x4xbf16>
    tpu.vector_store %arg11[%c0_97, %c0_98, %c0_99], %57 {strides = array<i32>} : memref<16x16x36xbf16, #tpu.memory_space<vmem>>, vector<16x16x4xbf16>,
    %c0_100 = arith.constant 0 : index
    %c1_101 = arith.constant 1 : index
    %c0_102 = arith.constant 0 : index
    %59 = vector.load %arg10[%c0_100, %c1_101, %c0_102] : memref<18x18x4xf32, #tpu.memory_space<vmem>>, vector<16x16x4xf32>
    %60 = arith.truncf %59 : vector<16x16x4xf32> to vector<16x16x4xbf16>
    %c0_103 = arith.constant 0 : index
    %c0_104 = arith.constant 0 : index
    %c4_105 = arith.constant 4 : index
    %61 = vector.load %arg11[%c0_103, %c0_104, %c4_105] : memref<16x16x36xbf16, #tpu.memory_space<vmem>>, vector<16x16x4xbf16>
    tpu.vector_store %arg11[%c0_103, %c0_104, %c4_105], %60 {strides = array<i32>} : memref<16x16x36xbf16, #tpu.memory_space<vmem>>, vector<16x16x4xbf16>,
    %c0_106 = arith.constant 0 : index
    %c2_107 = arith.constant 2 : index
    %c0_108 = arith.constant 0 : index
    %62 = vector.load %arg10[%c0_106, %c2_107, %c0_108] : memref<18x18x4xf32, #tpu.memory_space<vmem>>, vector<16x16x4xf32>
    %63 = arith.truncf %62 : vector<16x16x4xf32> to vector<16x16x4xbf16>
    %c0_109 = arith.constant 0 : index
    %c0_110 = arith.constant 0 : index
    %c8_111 = arith.constant 8 : index
    %64 = vector.load %arg11[%c0_109, %c0_110, %c8_111] : memref<16x16x36xbf16, #tpu.memory_space<vmem>>, vector<16x16x4xbf16>
    tpu.vector_store %arg11[%c0_109, %c0_110, %c8_111], %63 {strides = array<i32>} : memref<16x16x36xbf16, #tpu.memory_space<vmem>>, vector<16x16x4xbf16>,
    %c1_112 = arith.constant 1 : index
    %c0_113 = arith.constant 0 : index
    %c0_114 = arith.constant 0 : index
    %65 = vector.load %arg10[%c1_112, %c0_113, %c0_114] : memref<18x18x4xf32, #tpu.memory_space<vmem>>, vector<16x16x4xf32>
    %66 = arith.truncf %65 : vector<16x16x4xf32> to vector<16x16x4xbf16>
    %c0_115 = arith.constant 0 : index
    %c0_116 = arith.constant 0 : index
    %c12 = arith.constant 12 : index
    %67 = vector.load %arg11[%c0_115, %c0_116, %c12] : memref<16x16x36xbf16, #tpu.memory_space<vmem>>, vector<16x16x4xbf16>
    tpu.vector_store %arg11[%c0_115, %c0_116, %c12], %66 {strides = array<i32>} : memref<16x16x36xbf16, #tpu.memory_space<vmem>>, vector<16x16x4xbf16>,
    %c1_117 = arith.constant 1 : index
    %c1_118 = arith.constant 1 : index
    %c0_119 = arith.constant 0 : index
    %68 = vector.load %arg10[%c1_117, %c1_118, %c0_119] : memref<18x18x4xf32, #tpu.memory_space<vmem>>, vector<16x16x4xf32>
    %69 = arith.truncf %68 : vector<16x16x4xf32> to vector<16x16x4xbf16>
    %c0_120 = arith.constant 0 : index
    %c0_121 = arith.constant 0 : index
    %c16_122 = arith.constant 16 : index
    %70 = vector.load %arg11[%c0_120, %c0_121, %c16_122] : memref<16x16x36xbf16, #tpu.memory_space<vmem>>, vector<16x16x4xbf16>
    tpu.vector_store %arg11[%c0_120, %c0_121, %c16_122], %69 {strides = array<i32>} : memref<16x16x36xbf16, #tpu.memory_space<vmem>>, vector<16x16x4xbf16>,
    %c1_123 = arith.constant 1 : index
    %c2_124 = arith.constant 2 : index
    %c0_125 = arith.constant 0 : index
    %71 = vector.load %arg10[%c1_123, %c2_124, %c0_125] : memref<18x18x4xf32, #tpu.memory_space<vmem>>, vector<16x16x4xf32>
    %72 = arith.truncf %71 : vector<16x16x4xf32> to vector<16x16x4xbf16>
    %c0_126 = arith.constant 0 : index
    %c0_127 = arith.constant 0 : index
    %c20 = arith.constant 20 : index
    %73 = vector.load %arg11[%c0_126, %c0_127, %c20] : memref<16x16x36xbf16, #tpu.memory_space<vmem>>, vector<16x16x4xbf16>
    tpu.vector_store %arg11[%c0_126, %c0_127, %c20], %72 {strides = array<i32>} : memref<16x16x36xbf16, #tpu.memory_space<vmem>>, vector<16x16x4xbf16>,
    %c2_128 = arith.constant 2 : index
    %c0_129 = arith.constant 0 : index
    %c0_130 = arith.constant 0 : index
    %74 = vector.load %arg10[%c2_128, %c0_129, %c0_130] : memref<18x18x4xf32, #tpu.memory_space<vmem>>, vector<16x16x4xf32>
    %75 = arith.truncf %74 : vector<16x16x4xf32> to vector<16x16x4xbf16>
    %c0_131 = arith.constant 0 : index
    %c0_132 = arith.constant 0 : index
    %c24_133 = arith.constant 24 : index
    %76 = vector.load %arg11[%c0_131, %c0_132, %c24_133] : memref<16x16x36xbf16, #tpu.memory_space<vmem>>, vector<16x16x4xbf16>
    tpu.vector_store %arg11[%c0_131, %c0_132, %c24_133], %75 {strides = array<i32>} : memref<16x16x36xbf16, #tpu.memory_space<vmem>>, vector<16x16x4xbf16>,
    %c2_134 = arith.constant 2 : index
    %c1_135 = arith.constant 1 : index
    %c0_136 = arith.constant 0 : index
    %77 = vector.load %arg10[%c2_134, %c1_135, %c0_136] : memref<18x18x4xf32, #tpu.memory_space<vmem>>, vector<16x16x4xf32>
    %78 = arith.truncf %77 : vector<16x16x4xf32> to vector<16x16x4xbf16>
    %c0_137 = arith.constant 0 : index
    %c0_138 = arith.constant 0 : index
    %c28 = arith.constant 28 : index
    %79 = vector.load %arg11[%c0_137, %c0_138, %c28] : memref<16x16x36xbf16, #tpu.memory_space<vmem>>, vector<16x16x4xbf16>
    tpu.vector_store %arg11[%c0_137, %c0_138, %c28], %78 {strides = array<i32>} : memref<16x16x36xbf16, #tpu.memory_space<vmem>>, vector<16x16x4xbf16>,
    %c2_139 = arith.constant 2 : index
    %c2_140 = arith.constant 2 : index
    %c0_141 = arith.constant 0 : index
    %80 = vector.load %arg10[%c2_139, %c2_140, %c0_141] : memref<18x18x4xf32, #tpu.memory_space<vmem>>, vector<16x16x4xf32>
    %81 = arith.truncf %80 : vector<16x16x4xf32> to vector<16x16x4xbf16>
    %c0_142 = arith.constant 0 : index
    %c0_143 = arith.constant 0 : index
    %c32_144 = arith.constant 32 : index
    %82 = vector.load %arg11[%c0_142, %c0_143, %c32_144] : memref<16x16x36xbf16, #tpu.memory_space<vmem>>, vector<16x16x4xbf16>
    tpu.vector_store %arg11[%c0_142, %c0_143, %c32_144], %81 {strides = array<i32>} : memref<16x16x36xbf16, #tpu.memory_space<vmem>>, vector<16x16x4xbf16>,
    %c0_145 = arith.constant 0 : index
    %c0_146 = arith.constant 0 : index
    %c0_147 = arith.constant 0 : index
    %83 = vector.load %arg11[%c0_145, %c0_146, %c0_147] : memref<16x16x36xbf16, #tpu.memory_space<vmem>>, vector<16x16x36xbf16>
    %84 = vector.shape_cast %83 : vector<16x16x36xbf16> to vector<256x36xbf16>
    %c0_148 = arith.constant 0 : index
    %c0_149 = arith.constant 0 : index
    %85 = vector.load %arg5[%c0_148, %c0_149] : memref<36x4xbf16, #tpu.memory_space<vmem>>, vector<36x4xbf16>
    %cst_150 = arith.constant dense<0.000000e+00> : vector<256x4xf32>
    %86 = tpu.matmul %84, %85, %cst_150 {dimension_numbers = #tpu.dot_dimension_numbers<[1], [0], [0], [1], [0, 0, 1, 1], [], []>} : vector<256x36xbf16>, vector<36x4xbf16>, vector<256x4xf32> -> vector<256x4xf32>
    %c0_151 = arith.constant 0 : index
    %c0_152 = arith.constant 0 : index
    %87 = vector.load %arg6[%c0_151, %c0_152] : memref<1x4xf32, #tpu.memory_space<vmem>>, vector<1x4xf32>
    %88 = vector.broadcast %87 : vector<1x4xf32> to vector<256x4xf32>
    %89 = arith.addf %86, %88 : vector<256x4xf32>
    %cst_153 = arith.constant 0.000000e+00 : f32
    %90 = vector.broadcast %cst_153 : f32 to vector<256x4xf32>
    %91 = arith.maximumf %89, %90 : vector<256x4xf32>
    %c0_154 = arith.constant 0 : index
    %c0_155 = arith.constant 0 : index
    %c0_156 = arith.constant 0 : index
    %92 = vector.load %arg7[%c0_154, %c0_155, %c0_156] : memref<1x256x4xf32, #tpu.memory_space<vmem>>, vector<1x256x4xf32>
    %93 = vector.shape_cast %92 : vector<1x256x4xf32> to vector<256x4xf32>
    %94 = vector.shape_cast %91 : vector<256x4xf32> to vector<1x256x4xf32>
    tpu.vector_store %arg7[%c0_154, %c0_155, %c0_156], %94 {strides = array<i32>} : memref<1x256x4xf32, #tpu.memory_space<vmem>>, vector<1x256x4xf32>,
    return
  }
  func.func @transform_0(%arg0: i32) -> (i32, i32, i32, i32) {
    %c0_i32 = arith.constant 0 : i32
    %c0_i32_0 = arith.constant 0 : i32
    %c0_i32_1 = arith.constant 0 : i32
    %c0_i32_2 = arith.constant 0 : i32
    return %arg0, %c0_i32, %c0_i32_0, %c0_i32_1 : i32, i32, i32, i32
  }
  func.func @transform_1(%arg0: i32) -> (i32, i32, i32, i32) {
    %c0_i32 = arith.constant 0 : i32
    %c0_i32_0 = arith.constant 0 : i32
    %c0_i32_1 = arith.constant 0 : i32
    %c0_i32_2 = arith.constant 0 : i32
    return %arg0, %c0_i32, %c0_i32_0, %c0_i32_1 : i32, i32, i32, i32
  }
  func.func @transform_2(%arg0: i32) -> (i32, i32) {
    %c0_i32 = arith.constant 0 : i32
    %c0_i32_0 = arith.constant 0 : i32
    %c0_i32_1 = arith.constant 0 : i32
    return %c0_i32, %c0_i32_0 : i32, i32
  }
  func.func @transform_3(%arg0: i32) -> (i32, i32) {
    %c0_i32 = arith.constant 0 : i32
    %c0_i32_0 = arith.constant 0 : i32
    %c0_i32_1 = arith.constant 0 : i32
    return %c0_i32, %c0_i32_0 : i32, i32
  }
  func.func @transform_4(%arg0: i32) -> (i32, i32) {
    %c0_i32 = arith.constant 0 : i32
    %c0_i32_0 = arith.constant 0 : i32
    %c0_i32_1 = arith.constant 0 : i32
    return %c0_i32, %c0_i32_0 : i32, i32
  }
  func.func @transform_5(%arg0: i32) -> (i32, i32) {
    %c0_i32 = arith.constant 0 : i32
    %c0_i32_0 = arith.constant 0 : i32
    %c0_i32_1 = arith.constant 0 : i32
    return %c0_i32, %c0_i32_0 : i32, i32
  }
  func.func @transform_6(%arg0: i32) -> (i32, i32, i32) {
    %c0_i32 = arith.constant 0 : i32
    %c0_i32_0 = arith.constant 0 : i32
    %c0_i32_1 = arith.constant 0 : i32
    return %arg0, %c0_i32, %c0_i32_0 : i32, i32, i32
  }
}

</mosaic_0001>

<bundles_post_ra>
// kernel: tpu_custom_call.1
= control target key start
LH: loop header
LB: loop body
LE: loop exit
PB: predicated region body
PF: predicated region fallthrough
CT: control target
= control target key end

     0   :  { %s3807_s21 = smov 0   ;;  %s5062_s0 = inlined_call_operand.vmem [shape: f32[2,16,16,4], index: 0, kind: input, shape index: {}]   ;;  %s5063_s1 = inlined_call_operand.vmem [shape: f32[2,16,16,4], index: 1, kind: input, shape index: {}]   ;;  %s5064_s2 = inlined_call_operand.vmem [shape: bf16[72,4], index: 2, kind: input, shape index: {}]   ;;  %s5065_s3 = inlined_call_operand.vmem [shape: f32[1,4], index: 3, kind: input, shape index: {}]   ;;  %s5066_s4 = inlined_call_operand.vmem [shape: bf16[36,4], index: 4, kind: input, shape index: {}]   ;;  %s5067_s5 = inlined_call_operand.vmem [shape: f32[1,4], index: 5, kind: input, shape index: {}]   ;;  %s5068_s6 = inlined_call_operand.vmem [shape: f32[2,256,4], index: 6, kind: output, shape index: {}]  }
   0x1 LB: > { %s3542_s22 = sadd.s32 4294967295, %s3757_s21   ;;  %p3546_p0 = scmp.ge.s32.totalorder %s3757_s21, 1  ;;  %s3757_s21 = sphi %s3807_s21, %s16_s21  }
   0x2   : > { %p222_p1 = scmp.lt.s32.totalorder %s3757_s21, 3 }
   0x4   : > { %p223_p2 = pnand %p3546_p0, %p222_p1 }
   0x5   : > { %p3815_p3 = scmp.lt.s32.totalorder (!%p223_p2), %s3542_s22, 1  ;;  %vm352_vm0 = vcmask (!%p223_p2), 31744   ;;  %vm273_vm1 = vcmask (!%p223_p2), 64512   ;;  %v3759_v0 = vmov (!%p223_p2), 0.0   ;;  %vm276_vm2 = vcmask (!%p223_p2), 58368   ;;  %s3760_s28 = smov (!%p223_p2), 4  }
   0x6   : > { %226 = sbr.rel (%p223_p2) target bundleno = 1131 (0x46b), region = 44  ;;  %274 = vst.msk [vmem:[#allocation2] sm:$0xff] (!%p223_p2), %vm273_vm1, %v3759_v0  ;;  %275 = vst.msk [vmem:[#allocation2 + $0x8] sm:$0xff] (!%p223_p2), %vm273_vm1, %v3759_v0  ;;  %vm282_vm3 = vcmask (!%p223_p2), 57344   ;;  %s3761_s8 = smov (!%p223_p2), 8   ;;  %vm545_vm4 = vcmask (!%p223_p2), 64544  }
   0x7   : > { %279 = vst.msk [vmem:[#allocation2 + $0x198] sm:$0xff] (!%p223_p2), %vm273_vm1, %v3759_v0  ;;  %280 = vst.msk [vmem:[#allocation2 + $0x1a0] sm:$0xff] (!%p223_p2), %vm273_vm1, %v3759_v0  ;;  %s3762_s9 = smov (!%p223_p2), 16   ;;  %s3763_s12 = smov (!%p223_p2), 24   ;;  %vm1783_vm5 = vcmask (!%p223_p2), 1043456   ;;  %vm754_vm6 = vcmask (!%p223_p2), 130112  }
   0x8   : > { %1980 = vst.msk [vmem:[#allocation4] sm:$0xff] (!%p223_p2), %vm352_vm0, %v3759_v0  ;;  %1981 = vst.msk [vmem:[#allocation4 + $0x8] sm:$0xff] (!%p223_p2), %vm352_vm0, %v3759_v0  ;;  %s3764_s15 = smov (!%p223_p2), 32   ;;  %s3765_s18 = smov (!%p223_p2), 40   ;;  %vm883_vm7 = vcmask (!%p223_p2), 195712   ;;  %vm1012_vm8 = vcmask (!%p223_p2), 261312  }
   0x9   : > { %1985 = vst.msk [vmem:[#allocation4 + $0x198] sm:$0xff] (!%p223_p2), %vm352_vm0, %v3759_v0  ;;  %1986 = vst.msk [vmem:[#allocation4 + $0x1a0] sm:$0xff] (!%p223_p2), %vm352_vm0, %v3759_v0  ;;  %s3767_s26 = smov (!%p223_p2), 56   ;;  %vm1141_vm9 = vcmask (!%p223_p2), 326912   ;;  %vm1270_vm10 = vcmask (!%p223_p2), 392512   ;;  %vm1400_vm11 = vcmask (!%p223_p2), 458112  }
   0xa   : > { %277 = vst.msk [vmem:[#allocation2 + $0x10] sm:$0x3] (!%p223_p2), %vm276_vm2, %v3759_v0  ;;  %281 = vst.msk [vmem:[#allocation2 + $0x1a8] sm:$0x3] (!%p223_p2), %vm276_vm2, %v3759_v0  ;;  %vm1529_vm12 = vcmask (!%p223_p2), 523712   ;;  %vm1658_vm13 = vcmask (!%p223_p2), 589312  }
   0xb   : > { %283 = vst.msk [vmem:[#allocation2] sm:$0x1] (!%p223_p2), %vm282_vm3, %v3759_v0  ;;  %284 = vst.msk [vmem:[#allocation2 + $0x18] sm:$0x1] (!%p223_p2), %vm282_vm3, %v3759_v0  ;;  %vm1734_vm14 = vcmask (!%p223_p2), 588800   ;;  %vm1982_vm15 = vcmask (!%p223_p2), 25600  }
   0xc   : > { %285 = vst.msk [vmem:[#allocation2 + $0x30] sm:$0x1] (!%p223_p2), %vm282_vm3, %v3759_v0  ;;  %286 = vst.msk [vmem:[#allocation2 + $0x48] sm:$0x1] (!%p223_p2), %vm282_vm3, %v3759_v0  ;;  %vm2362_vm2 = vcmask (!%p223_p2), 97344   ;;  %s3770_s10 = smov (!%p223_p2), 28  }
   0xd   : > { %s5071_s22 = smov (!%p3815_p3, %s3542_s22), 1  ;;  %287 = vst.msk [vmem:[#allocation2 + $0x60] sm:$0x1] %vm282_vm3, %v3759_v0  ;;  %288 = vst.msk [vmem:[#allocation2 + $0x78] sm:$0x1] %vm282_vm3, %v3759_v0  ;;  %v642_v41 = vld [vmem:[#allocation2 + $0x1] sm:$0xff] }
   0xe   : > { %289 = vst.msk [vmem:[#allocation2 + $0x90] sm:$0x1] %vm282_vm3, %v3759_v0  ;;  %290 = vst.msk [vmem:[#allocation2 + $0xa8] sm:$0x1] %vm282_vm3, %v3759_v0  ;;  %s3914_s24 = sshll.u32 %s5071_s22, 8  ;;  %v771_v46 = vld [vmem:[#allocation2 + $0x2] sm:$0xff] }
   0xf   : > { %291 = vst.msk [vmem:[#allocation2 + $0xc0] sm:$0x1] %vm282_vm3, %v3759_v0  ;;  %292 = vst.msk [vmem:[#allocation2 + $0xd8] sm:$0x1] %vm282_vm3, %v3759_v0  ;;  %s3920_s27 = scalar_lea.vmem %s5063_s1, %s3914_s24  ;;  %s3936_s7 = scalar_lea.vmem %s5062_s0, %s3914_s24 }
  0x10   : > { %293 = vst.msk [vmem:[#allocation2 + $0xf0] sm:$0x1] %vm282_vm3, %v3759_v0  ;;  %294 = vst.msk [vmem:[#allocation2 + $0x108] sm:$0x1] %vm282_vm3, %v3759_v0  ;;  %v385_v1 = vld [vmem:[%s3920_s27] sm:$0xff]  ;;  %v387_v2 = vld [vmem:[%s3920_s27 + $0x10] sm:$0xff] }
  0x11   : > { %295 = vst.msk [vmem:[#allocation2 + $0x120] sm:$0x1] %vm282_vm3, %v3759_v0  ;;  %296 = vst.msk [vmem:[#allocation2 + $0x138] sm:$0x1] %vm282_vm3, %v3759_v0  ;;  %449 = vrot.lane.b32.xlu0 %v385_v1, %s3760_s28  ;;  %453 = vrot.lane.b32.xlu1 %v387_v2, %s3760_s28  ;;  %v386_v3 = vld [vmem:[%s3920_s27 + $0x8] sm:$0xff]  ;;  %v388_v4 = vld [vmem:[%s3920_s27 + $0x18] sm:$0xff] }
  0x12   : > { %297 = vst.msk [vmem:[#allocation2 + $0x150] sm:$0x1] %vm282_vm3, %v3759_v0  ;;  %298 = vst.msk [vmem:[#allocation2 + $0x168] sm:$0x1] %vm282_vm3, %v3759_v0  ;;  %v390_v5 = vld [vmem:[%s3920_s27 + $0x28] sm:$0xff]  ;;  %v389_v6 = vld [vmem:[%s3920_s27 + $0x20] sm:$0xff] }
  0x13   : > { %299 = vst.msk [vmem:[#allocation2 + $0x180] sm:$0x1] %vm282_vm3, %v3759_v0  ;;  %300 = vst.msk [vmem:[#allocation2 + $0x198] sm:$0x1] %vm282_vm3, %v3759_v0  ;;  %v392_v7 = vld [vmem:[%s3920_s27 + $0x38] sm:$0xff]  ;;  %v391_v8 = vld [vmem:[%s3920_s27 + $0x30] sm:$0xff] }
  0x14   : > { %302 = vst.msk [vmem:[#allocation2 + $0x29] sm:$0x1] %vm282_vm3, %v3759_v0  ;;  %303 = vst.msk [vmem:[#allocation2 + $0x41] sm:$0x1] %vm282_vm3, %v3759_v0  ;;  %v319_v9 = vld [vmem:[%s3936_s7] sm:$0xff]  ;;  %v321_v10 = vld [vmem:[%s3936_s7 + $0x10] sm:$0xff] }
  0x15   : > { %304 = vst.msk [vmem:[#allocation2 + $0x59] sm:$0x1] %vm282_vm3, %v3759_v0  ;;  %305 = vst.msk [vmem:[#allocation2 + $0x71] sm:$0x1] %vm282_vm3, %v3759_v0  ;;  %451 = vrot.lane.b32.xlu0 %v386_v3, %s3760_s28  ;;  %455 = vrot.lane.b32.xlu1 %v388_v4, %s3760_s28  ;;  %v394_v11 = vld [vmem:[%s3920_s27 + $0x48] sm:$0xff]  ;;  %v322_v13 = vld [vmem:[%s3936_s7 + $0x18] sm:$0xff] }
  0x16   : > { %306 = vst.msk [vmem:[#allocation2 + $0x89] sm:$0x1] %vm282_vm3, %v3759_v0  ;;  %307 = vst.msk [vmem:[#allocation2 + $0xa1] sm:$0x1] %vm282_vm3, %v3759_v0  ;;  %v320_v12 = vld [vmem:[%s3936_s7 + $0x8] sm:$0xff]  ;;  %v393_v14 = vld [vmem:[%s3920_s27 + $0x40] sm:$0xff] }
  0x17   : > { %308 = vst.msk [vmem:[#allocation2 + $0xb9] sm:$0x1] %vm282_vm3, %v3759_v0  ;;  %309 = vst.msk [vmem:[#allocation2 + $0xd1] sm:$0x1] %vm282_vm3, %v3759_v0  ;;  %v324_v15 = vld [vmem:[%s3936_s7 + $0x28] sm:$0xff]  ;;  %v323_v16 = vld [vmem:[%s3936_s7 + $0x20] sm:$0xff] }
  0x18   : > { %310 = vst.msk [vmem:[#allocation2 + $0xe9] sm:$0x1] %vm282_vm3, %v3759_v0  ;;  %311 = vst.msk [vmem:[#allocation2 + $0x101] sm:$0x1] %vm282_vm3, %v3759_v0  ;;  %v396_v17 = vld [vmem:[%s3920_s27 + $0x58] sm:$0xff]  ;;  %v395_v18 = vld [vmem:[%s3920_s27 + $0x50] sm:$0xff] }
  0x19   : > { %312 = vst.msk [vmem:[#allocation2 + $0x119] sm:$0x1] %vm282_vm3, %v3759_v0  ;;  %313 = vst.msk [vmem:[#allocation2 + $0x131] sm:$0x1] %vm282_vm3, %v3759_v0  ;;  %459 = vrot.lane.b32.xlu1 %v390_v5, %s3760_s28  ;;  %457 = vrot.lane.b32.xlu0 %v389_v6, %s3760_s28  ;;  %v397_v19 = vld [vmem:[%s3920_s27 + $0x60] sm:$0xff]  ;;  %v398_v20 = vld [vmem:[%s3920_s27 + $0x68] sm:$0xff] }
  0x1a   : > { %314 = vst.msk [vmem:[#allocation2 + $0x149] sm:$0x1] %vm282_vm3, %v3759_v0  ;;  %315 = vst.msk [vmem:[#allocation2 + $0x161] sm:$0x1] %vm282_vm3, %v3759_v0  ;;  %v399_v21 = vld [vmem:[%s3920_s27 + $0x70] sm:$0xff]  ;;  %v400_v22 = vld [vmem:[%s3920_s27 + $0x78] sm:$0xff] }
  0x1b   : > { %316 = vst.msk [vmem:[#allocation2 + $0x179] sm:$0x1] %vm282_vm3, %v3759_v0  ;;  %317 = vst.msk [vmem:[#allocation2 + $0x191] sm:$0x1] %vm282_vm3, %v3759_v0  ;;  %v401_v23 = vld [vmem:[%s3920_s27 + $0x80] sm:$0xff]  ;;  %v402_v24 = vld [vmem:[%s3920_s27 + $0x88] sm:$0xff] }
  0x1c   : > { %301 = vst.msk [vmem:[#allocation2 + $0x11] sm:$0x1] %vm282_vm3, %v3759_v0  ;;  %318 = vst.msk [vmem:[#allocation2 + $0x1a9] sm:$0x1] %vm282_vm3, %v3759_v0  ;;  %v326_v25 = vld [vmem:[%s3936_s7 + $0x38] sm:$0xff]  ;;  %v325_v26 = vld [vmem:[%s3936_s7 + $0x30] sm:$0xff] }
  0x1d   : > { %353 = vst.msk [vmem:[#allocation2 + $0x19] sm:$0xff] %vm352_vm0, %v319_v9  ;;  %355 = vst.msk [vmem:[#allocation2 + $0x31] sm:$0xff] %vm352_vm0, %v321_v10  ;;  %463 = vrot.lane.b32.xlu1 %v392_v7, %s3760_s28  ;;  %461 = vrot.lane.b32.xlu0 %v391_v8, %s3760_s28  ;;  %v403_v27 = vld [vmem:[%s3920_s27 + $0x90] sm:$0xff]  ;;  %v404_v28 = vld [vmem:[%s3920_s27 + $0x98] sm:$0xff]  ;;  %s3766_s22 = smov 48   ;;  %s3771_s11 = smov 20  }
  0x1e   : > { %354 = vst.msk [vmem:[#allocation2 + $0x21] sm:$0xff] %vm352_vm0, %v320_v12  ;;  %356 = vst.msk [vmem:[#allocation2 + $0x39] sm:$0xff] %vm352_vm0, %v322_v13  ;;  %v405_v29 = vld [vmem:[%s3920_s27 + $0xa0] sm:$0xff]  ;;  %v406_v30 = vld [vmem:[%s3920_s27 + $0xa8] sm:$0xff]  ;;  %vm3246_vm3 = vcmask 1041408  }
  0x1f   : > { %358 = vst.msk [vmem:[#allocation2 + $0x51] sm:$0xff] %vm352_vm0, %v324_v15  ;;  %357 = vst.msk [vmem:[#allocation2 + $0x49] sm:$0xff] %vm352_vm0, %v323_v16  ;;  %v407_v31 = vld [vmem:[%s3920_s27 + $0xb0] sm:$0xff]  ;;  %v408_v32 = vld [vmem:[%s3920_s27 + $0xb8] sm:$0xff] }
  0x20   : > { %360 = vst.msk [vmem:[#allocation2 + $0x69] sm:$0xff] %vm352_vm0, %v326_v25  ;;  %359 = vst.msk [vmem:[#allocation2 + $0x61] sm:$0xff] %vm352_vm0, %v325_v26  ;;  %v328_v33 = vld [vmem:[%s3936_s7 + $0x48] sm:$0xff]  ;;  %v327_v34 = vld [vmem:[%s3936_s7 + $0x40] sm:$0xff] }
  0x21   : > { %467 = vrot.lane.b32.xlu1 %v394_v11, %s3760_s28  ;;  %465 = vrot.lane.b32.xlu0 %v393_v14, %s3760_s28  ;;  %362 = vst.msk [vmem:[#allocation2 + $0x81] sm:$0xff] %vm352_vm0, %v328_v33  ;;  %361 = vst.msk [vmem:[#allocation2 + $0x79] sm:$0xff] %vm352_vm0, %v327_v34  ;;  %v409_v35 = vld [vmem:[%s3920_s27 + $0xc0] sm:$0xff]  ;;  %v410_v36 = vld [vmem:[%s3920_s27 + $0xc8] sm:$0xff] }
  0x22   : > { %v411_v37 = vld [vmem:[%s3920_s27 + $0xd0] sm:$0xff]  ;;  %v412_v38 = vld [vmem:[%s3920_s27 + $0xd8] sm:$0xff]  ;;  %v413_v39 = vld [vmem:[%s3920_s27 + $0xe0] sm:$0xff]  ;;  %1983 = vst.msk [vmem:[#allocation4 + $0x10] sm:$0x3] %vm1982_vm15, %v3759_v0 }
  0x23   : > { %v414_v40 = vld [vmem:[%s3920_s27 + $0xe8] sm:$0xff]  ;;  %v415_v42 = vld [vmem:[%s3920_s27 + $0xf0] sm:$0xff]  ;;  %v416_v44 = vld [vmem:[%s3920_s27 + $0xf8] sm:$0xff]  ;;  %s3768_s27 = smov 64   ;;  %1987 = vst.msk [vmem:[#allocation4 + $0x1a8] sm:$0x3] %vm1982_vm15, %v3759_v0 }
  0x24   : > { %v643_v43 = vld [vmem:[#allocation2 + $0x9] sm:$0xff]  ;;  %v330_v48 = vld [vmem:[%s3936_s7 + $0x58] sm:$0xff]  ;;  %v331_v51 = vld [vmem:[%s3936_s7 + $0x60] sm:$0xff] }
  0x25   : > { %471 = vrot.lane.b32.xlu1 %v396_v17, %s3760_s28  ;;  %469 = vrot.lane.b32.xlu0 %v395_v18, %s3760_s28  ;;  %v674_v45 = vpack.c.bf16 %v643_v43, %v642_v41  ;;  %v772_v47 = vld [vmem:[#allocation2 + $0xa] sm:$0xff]  ;;  %364 = vst.msk [vmem:[#allocation2 + $0x99] sm:$0xff] %vm352_vm0, %v330_v48  ;;  %365 = vst.msk [vmem:[#allocation2 + $0xa9] sm:$0xff] %vm352_vm0, %v331_v51  ;;  %v335_v54 = vld [vmem:[%s3936_s7 + $0x80] sm:$0xff] }
  0x26   : > { %v329_v49 = vld [vmem:[%s3936_s7 + $0x50] sm:$0xff]  ;;  %v803_v50 = vpack.c.bf16 %v772_v47, %v771_v46  ;;  %v332_v53 = vld [vmem:[%s3936_s7 + $0x68] sm:$0xff]  ;;  %v334_v55 = vld [vmem:[%s3936_s7 + $0x78] sm:$0xff]  ;;  %369 = vst.msk [vmem:[#allocation2 + $0xd9] sm:$0xff] %vm352_vm0, %v335_v54 }
  0x27   : > { %363 = vst.msk [vmem:[#allocation2 + $0x91] sm:$0xff] %vm352_vm0, %v329_v49  ;;  %v333_v52 = vld [vmem:[%s3936_s7 + $0x70] sm:$0xff]  ;;  %366 = vst.msk [vmem:[#allocation2 + $0xb1] sm:$0xff] %vm352_vm0, %v332_v53  ;;  %v336_v57 = vld [vmem:[%s3936_s7 + $0x88] sm:$0xff] }
  0x28   : > { %367 = vst.msk [vmem:[#allocation2 + $0xc1] sm:$0xff] %vm352_vm0, %v333_v52  ;;  %368 = vst.msk [vmem:[#allocation2 + $0xc9] sm:$0xff] %vm352_vm0, %v334_v55  ;;  %v337_v56 = vld [vmem:[%s3936_s7 + $0x90] sm:$0xff]  ;;  %v339_v58 = vld [vmem:[%s3936_s7 + $0xa0] sm:$0xff] }
  0x29   : > { %473 = vrot.lane.b32.xlu0 %v397_v19, %s3760_s28  ;;  %475 = vrot.lane.b32.xlu1 %v398_v20, %s3760_s28  ;;  %371 = vst.msk [vmem:[#allocation2 + $0xf1] sm:$0xff] %vm352_vm0, %v337_v56  ;;  %370 = vst.msk [vmem:[#allocation2 + $0xe1] sm:$0xff] %vm352_vm0, %v336_v57  ;;  %v338_v59 = vld [vmem:[%s3936_s7 + $0x98] sm:$0xff]  ;;  %v341_v60 = vld [vmem:[%s3936_s7 + $0xb0] sm:$0xff] }
  0x2a   : > { %373 = vst.msk [vmem:[#allocation2 + $0x109] sm:$0xff] %vm352_vm0, %v339_v58  ;;  %372 = vst.msk [vmem:[#allocation2 + $0xf9] sm:$0xff] %vm352_vm0, %v338_v59  ;;  %v340_v61 = vld [vmem:[%s3936_s7 + $0xa8] sm:$0xff]  ;;  %v343_v62 = vld [vmem:[%s3936_s7 + $0xc0] sm:$0xff] }
  0x2b   : > { %375 = vst.msk [vmem:[#allocation2 + $0x121] sm:$0xff] %vm352_vm0, %v341_v60  ;;  %374 = vst.msk [vmem:[#allocation2 + $0x111] sm:$0xff] %vm352_vm0, %v340_v61  ;;  %v342_v63 = vld [vmem:[%s3936_s7 + $0xb8] sm:$0xff]  ;;  %v345_v1 = vld [vmem:[%s3936_s7 + $0xd0] sm:$0xff] }
  0x2c   : > { %377 = vst.msk [vmem:[#allocation2 + $0x139] sm:$0xff] %vm352_vm0, %v343_v62  ;;  %376 = vst.msk [vmem:[#allocation2 + $0x129] sm:$0xff] %vm352_vm0, %v342_v63  ;;  %v344_v2 = vld [vmem:[%s3936_s7 + $0xc8] sm:$0xff]  ;;  %v347_v3 = vld [vmem:[%s3936_s7 + $0xe0] sm:$0xff] }
  0x2d   : > { %477 = vrot.lane.b32.xlu0 %v399_v21, %s3760_s28  ;;  %479 = vrot.lane.b32.xlu1 %v400_v22, %s3760_s28  ;;  %379 = vst.msk [vmem:[#allocation2 + $0x151] sm:$0xff] %vm352_vm0, %v345_v1  ;;  %378 = vst.msk [vmem:[#allocation2 + $0x141] sm:$0xff] %vm352_vm0, %v344_v2  ;;  %v346_v4 = vld [vmem:[%s3936_s7 + $0xd8] sm:$0xff]  ;;  %v349_v5 = vld [vmem:[%s3936_s7 + $0xf0] sm:$0xff] }
  0x2e   : > { %381 = vst.msk [vmem:[#allocation2 + $0x169] sm:$0xff] %vm352_vm0, %v347_v3  ;;  %380 = vst.msk [vmem:[#allocation2 + $0x159] sm:$0xff] %vm352_vm0, %v346_v4  ;;  %v348_v6 = vld [vmem:[%s3936_s7 + $0xe8] sm:$0xff]  ;;  %v578_v7 = vld [vmem:[#allocation2] sm:$0xff] }
  0x2f   : > { %383 = vst.msk [vmem:[#allocation2 + $0x181] sm:$0xff] %vm352_vm0, %v349_v5  ;;  %382 = vst.msk [vmem:[#allocation2 + $0x171] sm:$0xff] %vm352_vm0, %v348_v6  ;;  %v579_v8 = vld [vmem:[#allocation2 + $0x8] sm:$0xff]  ;;  %v350_v9 = vld [vmem:[%s3936_s7 + $0xf8] sm:$0xff]  ;;  %s3769_s7 = smov 12  }
  0x30   : > { %v610_v10 = vpack.c.bf16 %v579_v8, %v578_v7  ;;  %384 = vst.msk [vmem:[#allocation2 + $0x189] sm:$0xff] %vm352_vm0, %v350_v9  ;;  %v3746_v54 = vld [vmem:[%s5064_s2 + $0x18] sm:$0xff]   ;;  %v3747_v61 = vld [vmem:[%s5064_s2 + $0x20] ss:$0 sps:$4 sm:$0xff]  }
  0x31   : > { %481 = vrot.lane.b32.xlu0 %v401_v23, %s3760_s28  ;;  %483 = vrot.lane.b32.xlu1 %v402_v24, %s3760_s28  ;;  %v1785_v3 = vsel %vm1783_vm5, %v3747_v61, 0 }
  0x32   : > { %626 = vst.msk [vmem:[#allocation3] sm:$0xff] %vm273_vm1, %v610_v10 }
  0x35   : > { %485 = vrot.lane.b32.xlu0 %v403_v27, %s3760_s28  ;;  %487 = vrot.lane.b32.xlu1 %v404_v28, %s3760_s28 }
  0x39   : > { %489 = vrot.lane.b32.xlu0 %v405_v29, %s3760_s28  ;;  %491 = vrot.lane.b32.xlu1 %v406_v30, %s3760_s28  ;;  %v3743_v30 = vld [vmem:[%s5064_s2] sm:$0xff]  }
  0x3a   : > { %3640 = vmatprep.subr.bf16.mxu0 %v3743_v30 }
  0x3b   : > { %3641 = vmatpush3.bf16.msra.mxu0 %v3743_v30 }
  0x3d   : > { %493 = vrot.lane.b32.xlu0 %v407_v31, %s3760_s28  ;;  %495 = vrot.lane.b32.xlu1 %v408_v32, %s3760_s28 }
  0x41   : > { %497 = vrot.lane.b32.xlu0 %v409_v35, %s3760_s28  ;;  %499 = vrot.lane.b32.xlu1 %v410_v36, %s3760_s28 }
  0x45   : > { %501 = vrot.lane.b32.xlu0 %v411_v37, %s3760_s28  ;;  %503 = vrot.lane.b32.xlu1 %v412_v38, %s3760_s28  ;;  %v3744_v37 = vld [vmem:[%s5064_s2 + $0x8] sm:$0xff]  }
  0x46   : > { %3642 = vmatprep.subr.bf16.mxu0 %v3744_v37 }
  0x47   : > { %3643 = vmatpush3.bf16.msra.mxu0 %v3744_v37 }
  0x49   : > { %505 = vrot.lane.b32.xlu0 %v413_v39, %s3760_s28  ;;  %507 = vrot.lane.b32.xlu1 %v414_v40, %s3760_s28 }
  0x4d   : > { %509 = vrot.lane.b32.xlu0 %v415_v42, %s3760_s28  ;;  %511 = vrot.lane.b32.xlu1 %v416_v44, %s3760_s28 }
  0x51   : > { %706 = vrot.lane.b32.xlu0 %v674_v45, %s3761_s8  ;;  %v3745_v45 = vld [vmem:[%s5064_s2 + $0x10] sm:$0xff]  }
  0x52   : > { %3644 = vmatprep.subr.bf16.mxu0 %v3745_v45 }
  0x53   : > { %3645 = vmatpush3.bf16.msra.mxu0 %v3745_v45 }
  0x54   : > { %3646 = vmatprep.subr.bf16.mxu0 %v3746_v54 }
  0x55   : > { %835 = vrot.lane.b32.xlu0 %v803_v50, %s3762_s9 }
  0x57   : > { %3647 = vmatpush3.bf16.msra.mxu0 %v3746_v54 }
  0x58   : > { %3720 = vmatprep.subr.msk.bf16.mxu0 %vm1783_vm5, %v3747_v61  ;;  %vm2491_vm5 = vcmask 130144  }
  0x5b   : > { %3649 = vmatpush3.bf16.msra.mxu0 %v1785_v3 }
  0x83   : > { %v450_v11 = vpop.permute.xlu0 %449  ;;  %v454_v12 = vpop.permute.xlu1 %453 }
  0x84   : > { %546 = vst.msk [vmem:[#allocation2 + $0x19] sm:$0xff] %vm545_vm4, %v450_v11  ;;  %548 = vst.msk [vmem:[#allocation2 + $0x31] sm:$0xff] %vm545_vm4, %v454_v12 }
  0x87   : > { %v452_v13 = vpop.permute.xlu0 %451  ;;  %v456_v14 = vpop.permute.xlu1 %455 }
  0x88   : > { %547 = vst.msk [vmem:[#allocation2 + $0x21] sm:$0xff] %vm545_vm4, %v452_v13  ;;  %549 = vst.msk [vmem:[#allocation2 + $0x39] sm:$0xff] %vm545_vm4, %v456_v14 }
  0x8b   : > { %v460_v15 = vpop.permute.xlu1 %459  ;;  %v458_v16 = vpop.permute.xlu0 %457  ;;  %v900_v17 = vld [vmem:[#allocation2 + $0x18] sm:$0xff]  ;;  %v902_v18 = vld [vmem:[#allocation2 + $0x30] sm:$0xff] }
  0x8c   : > { %551 = vst.msk [vmem:[#allocation2 + $0x51] sm:$0xff] %vm545_vm4, %v460_v15  ;;  %550 = vst.msk [vmem:[#allocation2 + $0x49] sm:$0xff] %vm545_vm4, %v458_v16  ;;  %v644_v20 = vld [vmem:[#allocation2 + $0x19] sm:$0xff]  ;;  %v1031_v43 = vld [vmem:[#allocation2 + $0x31] sm:$0xff] }
  0x8f   : > { %v901_v19 = vld [vmem:[#allocation2 + $0x20] sm:$0xff]  ;;  %v464_v22 = vpop.permute.xlu1 %463  ;;  %v462_v23 = vpop.permute.xlu0 %461  ;;  %v903_v26 = vld [vmem:[#allocation2 + $0x38] sm:$0xff] }
  0x90   : > { %v645_v21 = vld [vmem:[#allocation2 + $0x21] sm:$0xff]  ;;  %v932_v24 = vpack.c.bf16 %v901_v19, %v900_v17  ;;  %553 = vst.msk [vmem:[#allocation2 + $0x69] sm:$0xff] %vm545_vm4, %v464_v22  ;;  %552 = vst.msk [vmem:[#allocation2 + $0x61] sm:$0xff] %vm545_vm4, %v462_v23  ;;  %v933_v29 = vpack.c.bf16 %v903_v26, %v902_v18  ;;  %v1032_v44 = vld [vmem:[#allocation2 + $0x39] sm:$0xff] }
  0x91   : > { %v675_v25 = vpack.c.bf16 %v645_v21, %v644_v20  ;;  %v773_v27 = vld [vmem:[#allocation2 + $0x1a] sm:$0xff]  ;;  %v774_v28 = vld [vmem:[#allocation2 + $0x22] sm:$0xff]  ;;  %v4096_v50 = vpack.c.bf16 %v1032_v44, %v1031_v43  ;;  %v1160_v52 = vld [vmem:[#allocation2 + $0x32] sm:$0xff] }
  0x92   : > { %964 = vrot.lane.b32.xlu0 %v932_v24, %s3763_s12  ;;  %627 = vst.msk [vmem:[#allocation3 + $0x8] sm:$0xff] %vm273_vm1, %v932_v24  ;;  %628 = vst.msk [vmem:[#allocation3 + $0x10] sm:$0xff] %vm273_vm1, %v933_v29  ;;  %v804_v35 = vpack.c.bf16 %v774_v28, %v773_v27  ;;  %v1161_v53 = vld [vmem:[#allocation2 + $0x3a] sm:$0xff] }
  0x93   : > { %708 = vrot.lane.b32.xlu1 %v675_v25, %s3761_s8  ;;  %v1290_v31 = vld [vmem:[#allocation2 + $0x48] sm:$0xff]  ;;  %v1291_v32 = vld [vmem:[#allocation2 + $0x50] sm:$0xff]  ;;  %v468_v33 = vpop.permute.xlu1 %467  ;;  %v466_v34 = vpop.permute.xlu0 %465  ;;  %v1191_v59 = vpack.c.bf16 %v1161_v53, %v1160_v52 }
  0x94   : > { %v4074_v36 = vpack.c.bf16 %v1291_v32, %v1290_v31  ;;  %555 = vst.msk [vmem:[#allocation2 + $0x81] sm:$0xff] %vm545_vm4, %v468_v33  ;;  %554 = vst.msk [vmem:[#allocation2 + $0x79] sm:$0xff] %vm545_vm4, %v466_v34  ;;  %v1548_v4 = vld [vmem:[#allocation2 + $0x4a] sm:$0xff]  ;;  %v1549_v6 = vld [vmem:[#allocation2 + $0x52] sm:$0xff] }
  0x95   : > { %v1419_v7 = vld [vmem:[#allocation2 + $0x49] sm:$0xff]  ;;  %v1420_v8 = vld [vmem:[#allocation2 + $0x51] sm:$0xff]  ;;  %v1579_v13 = vpack.c.bf16 %v1549_v6, %v1548_v4 }
  0x96   : > { %1093 = vrot.lane.b32.xlu0 %v675_v25, %s3764_s15  ;;  %629 = vst.msk [vmem:[#allocation3 + $0x18] sm:$0xff] %vm273_vm1, %v4074_v36  ;;  %v1450_v14 = vpack.c.bf16 %v1420_v8, %v1419_v7 }
  0x97   : > { %837 = vrot.lane.b32.xlu1 %v804_v35, %s3762_s9  ;;  %v906_v38 = vld [vmem:[#allocation2 + $0x60] sm:$0xff]  ;;  %v907_v39 = vld [vmem:[#allocation2 + $0x68] sm:$0xff]  ;;  %v472_v40 = vpop.permute.xlu1 %471  ;;  %v470_v41 = vpop.permute.xlu0 %469 }
  0x98   : > { %v4085_v42 = vpack.c.bf16 %v907_v39, %v906_v38  ;;  %557 = vst.msk [vmem:[#allocation2 + $0x99] sm:$0xff] %vm545_vm4, %v472_v40  ;;  %556 = vst.msk [vmem:[#allocation2 + $0x91] sm:$0xff] %vm545_vm4, %v470_v41  ;;  %v1036_v37 = vld [vmem:[#allocation2 + $0x69] sm:$0xff] }
  0x99   : > { %v1164_v45 = vld [vmem:[#allocation2 + $0x62] sm:$0xff] }
  0x9a   : > { %1222 = vrot.lane.b32.xlu0 %v804_v35, %s3765_s18  ;;  %630 = vst.msk [vmem:[#allocation3 + $0x20] sm:$0xff] %vm273_vm1, %v4085_v42 }
  0x9b   : > { %966 = vrot.lane.b32.xlu1 %v933_v29, %s3763_s12  ;;  %v1294_v46 = vld [vmem:[#allocation2 + $0x78] sm:$0xff]  ;;  %v1295_v47 = vld [vmem:[#allocation2 + $0x80] sm:$0xff]  ;;  %v474_v48 = vpop.permute.xlu0 %473  ;;  %v476_v49 = vpop.permute.xlu1 %475 }
  0x9c   : > { %v4098_v51 = vpack.c.bf16 %v1295_v47, %v1294_v46  ;;  %558 = vst.msk [vmem:[#allocation2 + $0xa9] sm:$0xff] %vm545_vm4, %v474_v48  ;;  %559 = vst.msk [vmem:[#allocation2 + $0xb1] sm:$0xff] %vm545_vm4, %v476_v49  ;;  %v1165_v46 = vld [vmem:[#allocation2 + $0x6a] sm:$0xff]  ;;  %v1424_v61 = vld [vmem:[#allocation2 + $0x81] sm:$0xff] }
  0x9d   : > { %v1193_v52 = vpack.c.bf16 %v1165_v46, %v1164_v45 }
  0x9e   : > { %1352 = vrot.lane.b32.xlu0 %v933_v29, %s3766_s22  ;;  %631 = vst.msk [vmem:[#allocation3 + $0x28] sm:$0xff] %vm273_vm1, %v4098_v51 }
  0x9f   : > { %1095 = vrot.lane.b32.xlu1 %v4096_v50, %s3764_s15  ;;  %v478_v55 = vpop.permute.xlu0 %477  ;;  %v910_v56 = vld [vmem:[#allocation2 + $0x90] sm:$0xff]  ;;  %v911_v57 = vld [vmem:[#allocation2 + $0x98] sm:$0xff]  ;;  %v480_v58 = vpop.permute.xlu1 %479 }
  0xa0   : > { %560 = vst.msk [vmem:[#allocation2 + $0xc1] sm:$0xff] %vm545_vm4, %v478_v55  ;;  %v4111_v60 = vpack.c.bf16 %v911_v57, %v910_v56  ;;  %561 = vst.msk [vmem:[#allocation2 + $0xc9] sm:$0xff] %vm545_vm4, %v480_v58  ;;  %v1552_v56 = vld [vmem:[#allocation2 + $0x7a] sm:$0xff]  ;;  %v1553_v58 = vld [vmem:[#allocation2 + $0x82] sm:$0xff] }
  0xa1   : > { %v1040_v3 = vld [vmem:[#allocation2 + $0x99] sm:$0xff] }
  0xa2   : > { %1481 = vrot.lane.b32.xlu0 %v4096_v50, %s3767_s26  ;;  %632 = vst.msk [vmem:[#allocation3 + $0x30] sm:$0xff] %vm273_vm1, %v4111_v60  ;;  %v1168_v6 = vld [vmem:[#allocation2 + $0x92] sm:$0xff]  ;;  %v1169_v7 = vld [vmem:[#allocation2 + $0x9a] sm:$0xff] }
  0xa3   : > { %1224 = vrot.lane.b32.xlu1 %v1191_v59, %s3765_s18  ;;  %v482_v62 = vpop.permute.xlu0 %481  ;;  %v484_v63 = vpop.permute.xlu1 %483  ;;  %v1298_v1 = vld [vmem:[#allocation2 + $0xa8] sm:$0xff]  ;;  %v1299_v2 = vld [vmem:[#allocation2 + $0xb0] sm:$0xff] }
  0xa4   : > { %562 = vst.msk [vmem:[#allocation2 + $0xd9] sm:$0xff] %vm545_vm4, %v482_v62  ;;  %563 = vst.msk [vmem:[#allocation2 + $0xe1] sm:$0xff] %vm545_vm4, %v484_v63  ;;  %v4124_v5 = vpack.c.bf16 %v1299_v2, %v1298_v1  ;;  %v1581_v63 = vpack.c.bf16 %v1553_v58, %v1552_v56  ;;  %v1039_v2 = vld [vmem:[#allocation2 + $0x91] sm:$0xff] }
  0xa5   : > { %v1066_v4 = vpack.c.bf16 %v1040_v3, %v1039_v2  ;;  %v1556_v8 = vld [vmem:[#allocation2 + $0xaa] sm:$0xff] }
  0xa6   : > { %1610 = vrot.lane.b32.xlu0 %v1191_v59, %s3768_s27  ;;  %633 = vst.msk [vmem:[#allocation3 + $0x38] sm:$0xff] %vm273_vm1, %v4124_v5 }
  0xa7   : > { %1354 = vrot.lane.b32.xlu1 %v4074_v36, %s3766_s22  ;;  %v486_v9 = vpop.permute.xlu0 %485  ;;  %v488_v10 = vpop.permute.xlu1 %487  ;;  %v914_v11 = vld [vmem:[#allocation2 + $0xc0] sm:$0xff]  ;;  %v915_v12 = vld [vmem:[#allocation2 + $0xc8] sm:$0xff] }
  0xa8   : > { %564 = vst.msk [vmem:[#allocation2 + $0xf1] sm:$0xff] %vm545_vm4, %v486_v9  ;;  %565 = vst.msk [vmem:[#allocation2 + $0xf9] sm:$0xff] %vm545_vm4, %v488_v10  ;;  %v4133_v15 = vpack.c.bf16 %v915_v12, %v914_v11  ;;  %v1557_v9 = vld [vmem:[#allocation2 + $0xb2] sm:$0xff]  ;;  %v1427_v10 = vld [vmem:[#allocation2 + $0xa9] sm:$0xff] }
  0xa9   : > { %v1428_v11 = vld [vmem:[#allocation2 + $0xb1] sm:$0xff]  ;;  %v1583_v12 = vpack.c.bf16 %v1557_v9, %v1556_v8 }
  0xaa   : > { %1612 = vrot.lane.b32.xlu0 %v1579_v13, %s3768_s27  ;;  %634 = vst.msk [vmem:[#allocation3 + $0x40] sm:$0xff] %vm273_vm1, %v4133_v15 }
  0xab   : > { %1483 = vrot.lane.b32.xlu1 %v1450_v14, %s3767_s26  ;;  %v490_v16 = vpop.permute.xlu0 %489  ;;  %v492_v17 = vpop.permute.xlu1 %491  ;;  %v1302_v18 = vld [vmem:[#allocation2 + $0xd8] sm:$0xff]  ;;  %v1303_v19 = vld [vmem:[#allocation2 + $0xe0] sm:$0xff] }
  0xac   : > { %566 = vst.msk [vmem:[#allocation2 + $0x109] sm:$0xff] %vm545_vm4, %v490_v16  ;;  %567 = vst.msk [vmem:[#allocation2 + $0x111] sm:$0xff] %vm545_vm4, %v492_v17  ;;  %v4141_v20 = vpack.c.bf16 %v1303_v19, %v1302_v18  ;;  %v1172_v17 = vld [vmem:[#allocation2 + $0xc2] sm:$0xff]  ;;  %v1173_v18 = vld [vmem:[#allocation2 + $0xca] sm:$0xff] }
  0xae   : > { %839 = vrot.lane.b32.xlu0 %v1191_v59, %s3762_s9  ;;  %635 = vst.msk [vmem:[#allocation3 + $0x48] sm:$0xff] %vm273_vm1, %v4141_v20  ;;  %v1423_v59 = vld [vmem:[#allocation2 + $0x79] sm:$0xff] }
  0xaf   : > { %710 = vrot.lane.b32.xlu1 %v4096_v50, %s3761_s8  ;;  %v494_v21 = vpop.permute.xlu0 %493  ;;  %v496_v22 = vpop.permute.xlu1 %495  ;;  %v918_v23 = vld [vmem:[#allocation2 + $0xf0] sm:$0xff]  ;;  %v919_v24 = vld [vmem:[#allocation2 + $0xf8] sm:$0xff]  ;;  %v1452_v1 = vpack.c.bf16 %v1424_v61, %v1423_v59 }
  0xb0   : > { %568 = vst.msk [vmem:[#allocation2 + $0x121] sm:$0xff] %vm545_vm4, %v494_v21  ;;  %569 = vst.msk [vmem:[#allocation2 + $0x129] sm:$0xff] %vm545_vm4, %v496_v22  ;;  %v4150_v25 = vpack.c.bf16 %v919_v24, %v918_v23  ;;  %v1560_v22 = vld [vmem:[#allocation2 + $0xda] sm:$0xff]  ;;  %v1561_v23 = vld [vmem:[#allocation2 + $0xe2] sm:$0xff] }
  0xb1   : > { %v1431_v24 = vld [vmem:[#allocation2 + $0xd9] sm:$0xff] }
  0xb2   : > { %968 = vrot.lane.b32.xlu0 %v4074_v36, %s3763_s12  ;;  %636 = vst.msk [vmem:[#allocation3 + $0x50] sm:$0xff] %vm273_vm1, %v4150_v25  ;;  %v1035_v36 = vld [vmem:[#allocation2 + $0x61] sm:$0xff]  ;;  %v1176_v46 = vld [vmem:[#allocation2 + $0xf2] sm:$0xff] }
  0xb3   : > { %712 = vrot.lane.b32.xlu1 %v1450_v14, %s3761_s8  ;;  %v498_v26 = vpop.permute.xlu0 %497  ;;  %v500_v27 = vpop.permute.xlu1 %499  ;;  %v1306_v28 = vld [vmem:[#allocation2 + $0x108] sm:$0xff]  ;;  %v1307_v29 = vld [vmem:[#allocation2 + $0x110] sm:$0xff]  ;;  %v1064_v43 = vpack.c.bf16 %v1036_v37, %v1035_v36 }
  0xb4   : > { %570 = vst.msk [vmem:[#allocation2 + $0x139] sm:$0xff] %vm545_vm4, %v498_v26  ;;  %571 = vst.msk [vmem:[#allocation2 + $0x141] sm:$0xff] %vm545_vm4, %v500_v27  ;;  %v4159_v30 = vpack.c.bf16 %v1307_v29, %v1306_v28  ;;  %v1432_v26 = vld [vmem:[#allocation2 + $0xe1] sm:$0xff]  ;;  %v1585_v28 = vpack.c.bf16 %v1561_v23, %v1560_v22  ;;  %v1435_v58 = vld [vmem:[#allocation2 + $0x109] sm:$0xff] }
  0xb5   : > { %v1456_v29 = vpack.c.bf16 %v1432_v26, %v1431_v24  ;;  %v1436_v59 = vld [vmem:[#allocation2 + $0x111] sm:$0xff] }
  0xb6   : > { %1097 = vrot.lane.b32.xlu0 %v1450_v14, %s3764_s15  ;;  %637 = vst.msk [vmem:[#allocation3 + $0x58] sm:$0xff] %vm273_vm1, %v4159_v30  ;;  %v1044_v14 = vld [vmem:[#allocation2 + $0xc9] sm:$0xff] }
  0xb7   : > { %841 = vrot.lane.b32.xlu1 %v1579_v13, %s3762_s9  ;;  %v502_v31 = vpop.permute.xlu0 %501  ;;  %v504_v32 = vpop.permute.xlu1 %503  ;;  %v922_v33 = vld [vmem:[#allocation2 + $0x120] sm:$0xff]  ;;  %v923_v34 = vld [vmem:[#allocation2 + $0x128] sm:$0xff] }
  0xb8   : > { %572 = vst.msk [vmem:[#allocation2 + $0x151] sm:$0xff] %vm545_vm4, %v502_v31  ;;  %573 = vst.msk [vmem:[#allocation2 + $0x159] sm:$0xff] %vm545_vm4, %v504_v32  ;;  %v4167_v35 = vpack.c.bf16 %v923_v34, %v922_v33 }
  0xba   : > { %1226 = vrot.lane.b32.xlu0 %v1579_v13, %s3765_s18  ;;  %638 = vst.msk [vmem:[#allocation3 + $0x60] sm:$0xff] %vm273_vm1, %v4167_v35  ;;  %v1454_v13 = vpack.c.bf16 %v1428_v11, %v1427_v10  ;;  %v1051_v10 = vld [vmem:[#allocation2 + $0x121] sm:$0xff] }
  0xbb   : > { %970 = vrot.lane.b32.xlu1 %v4085_v42, %s3763_s12  ;;  %v506_v38 = vpop.permute.xlu0 %505  ;;  %v508_v39 = vpop.permute.xlu1 %507  ;;  %v1310_v40 = vld [vmem:[#allocation2 + $0x138] sm:$0xff]  ;;  %v1311_v41 = vld [vmem:[#allocation2 + $0x140] sm:$0xff] }
  0xbc   : > { %574 = vst.msk [vmem:[#allocation2 + $0x169] sm:$0xff] %vm545_vm4, %v506_v38  ;;  %575 = vst.msk [vmem:[#allocation2 + $0x171] sm:$0xff] %vm545_vm4, %v508_v39  ;;  %v4176_v44 = vpack.c.bf16 %v1311_v41, %v1310_v40  ;;  %v1048_v40 = vld [vmem:[#allocation2 + $0xf9] sm:$0xff]  ;;  %v1440_v26 = vld [vmem:[#allocation2 + $0x141] sm:$0xff] }
  0xbd   : > { %v1568_v22 = vld [vmem:[#allocation2 + $0x13a] sm:$0xff] }
  0xbe   : > { %1356 = vrot.lane.b32.xlu0 %v4085_v42, %s3766_s22  ;;  %639 = vst.msk [vmem:[#allocation3 + $0x68] sm:$0xff] %vm273_vm1, %v4176_v44  ;;  %v1439_v24 = vld [vmem:[#allocation2 + $0x139] sm:$0xff] }
  0xbf   : > { %1099 = vrot.lane.b32.xlu1 %v1064_v43, %s3764_s15  ;;  %v510_v47 = vpop.permute.xlu0 %509  ;;  %v512_v48 = vpop.permute.xlu1 %511  ;;  %v926_v49 = vld [vmem:[#allocation2 + $0x150] sm:$0xff]  ;;  %v927_v50 = vld [vmem:[#allocation2 + $0x158] sm:$0xff] }
  0xc0   : > { %576 = vst.msk [vmem:[#allocation2 + $0x181] sm:$0xff] %vm545_vm4, %v510_v47  ;;  %577 = vst.msk [vmem:[#allocation2 + $0x189] sm:$0xff] %vm545_vm4, %v512_v48  ;;  %v4185_v53 = vpack.c.bf16 %v927_v50, %v926_v49  ;;  %v1177_v47 = vld [vmem:[#allocation2 + $0xfa] sm:$0xff] }
  0xc2   : > { %1485 = vrot.lane.b32.xlu0 %v1064_v43, %s3767_s26  ;;  %640 = vst.msk [vmem:[#allocation3 + $0x70] sm:$0xff] %vm273_vm1, %v4185_v53 }
  0xc3   : > { %1228 = vrot.lane.b32.xlu1 %v1193_v52, %s3765_s18  ;;  %v707_v42 = vpop.permute.xlu0 %706  ;;  %v1314_v54 = vld [vmem:[#allocation2 + $0x168] sm:$0xff]  ;;  %v1315_v55 = vld [vmem:[#allocation2 + $0x170] sm:$0xff] }
  0xc4   : > { %755 = vst.msk [vmem:[#allocation3] sm:$0xff] %vm754_vm6, %v707_v42  ;;  %v4192_v57 = vpack.c.bf16 %v1315_v55, %v1314_v54  ;;  %v1565_v55 = vld [vmem:[#allocation2 + $0x112] sm:$0xff] }
  0xc6   : > { %1614 = vrot.lane.b32.xlu0 %v1193_v52, %s3768_s27  ;;  %641 = vst.msk [vmem:[#allocation3 + $0x78] sm:$0xff] %vm273_vm1, %v4192_v57  ;;  %vm1988_vm1 = vcmask 24576  }
  0xc7   : > { %1358 = vrot.lane.b32.xlu1 %v4098_v51, %s3766_s22  ;;  %v836_v62 = vpop.permute.xlu0 %835  ;;  %2007 = vst.msk [vmem:[#allocation4 + $0x11] sm:$0x1] %vm1988_vm1, %v3759_v0  ;;  %1989 = vst.msk [vmem:[#allocation4] sm:$0x1] %vm1988_vm1, %v3759_v0 }
  0xc8   : > { %884 = vst.msk [vmem:[#allocation3] sm:$0xff] %vm883_vm7, %v836_v62 }
  0xc9   : > { %1990 = vst.msk [vmem:[#allocation4 + $0x18] sm:$0x1] %vm1988_vm1, %v3759_v0  ;;  %1991 = vst.msk [vmem:[#allocation4 + $0x30] sm:$0x1] %vm1988_vm1, %v3759_v0 }
  0xca   : > { %1616 = vrot.lane.b32.xlu0 %v1581_v63, %s3768_s27  ;;  %1992 = vst.msk [vmem:[#allocation4 + $0x48] sm:$0x1] %vm1988_vm1, %v3759_v0  ;;  %1993 = vst.msk [vmem:[#allocation4 + $0x60] sm:$0x1] %vm1988_vm1, %v3759_v0 }
  0xcb   : > { %1487 = vrot.lane.b32.xlu1 %v1452_v1, %s3767_s26  ;;  %1994 = vst.msk [vmem:[#allocation4 + $0x78] sm:$0x1] %vm1988_vm1, %v3759_v0  ;;  %1995 = vst.msk [vmem:[#allocation4 + $0x90] sm:$0x1] %vm1988_vm1, %v3759_v0 }
  0xcc   : > { %1996 = vst.msk [vmem:[#allocation4 + $0xa8] sm:$0x1] %vm1988_vm1, %v3759_v0  ;;  %1997 = vst.msk [vmem:[#allocation4 + $0xc0] sm:$0x1] %vm1988_vm1, %v3759_v0 }
  0xcd   : > { %1998 = vst.msk [vmem:[#allocation4 + $0xd8] sm:$0x1] %vm1988_vm1, %v3759_v0  ;;  %1999 = vst.msk [vmem:[#allocation4 + $0xf0] sm:$0x1] %vm1988_vm1, %v3759_v0 }
  0xce   : > { %843 = vrot.lane.b32.xlu0 %v1193_v52, %s3762_s9  ;;  %v1199_v52 = vpack.c.bf16 %v1177_v47, %v1176_v46  ;;  %v1185_v46 = vld [vmem:[#allocation2 + $0x15a] sm:$0xff]  ;;  %2000 = vst.msk [vmem:[#allocation4 + $0x108] sm:$0x1] %vm1988_vm1, %v3759_v0  ;;  %2001 = vst.msk [vmem:[#allocation4 + $0x120] sm:$0x1] %vm1988_vm1, %v3759_v0 }
  0xcf   : > { %714 = vrot.lane.b32.xlu1 %v1064_v43, %s3761_s8  ;;  %2002 = vst.msk [vmem:[#allocation4 + $0x138] sm:$0x1] %vm1988_vm1, %v3759_v0  ;;  %2003 = vst.msk [vmem:[#allocation4 + $0x150] sm:$0x1] %vm1988_vm1, %v3759_v0 }
  0xd0   : > { %2004 = vst.msk [vmem:[#allocation4 + $0x168] sm:$0x1] %vm1988_vm1, %v3759_v0  ;;  %2005 = vst.msk [vmem:[#allocation4 + $0x180] sm:$0x1] %vm1988_vm1, %v3759_v0 }
  0xd1   : > { %2006 = vst.msk [vmem:[#allocation4 + $0x198] sm:$0x1] %vm1988_vm1, %v3759_v0  ;;  %2008 = vst.msk [vmem:[#allocation4 + $0x29] sm:$0x1] %vm1988_vm1, %v3759_v0 }
  0xd2   : > { %972 = vrot.lane.b32.xlu0 %v4098_v51, %s3763_s12  ;;  %v1195_v51 = vpack.c.bf16 %v1169_v7, %v1168_v6  ;;  %2009 = vst.msk [vmem:[#allocation4 + $0x41] sm:$0x1] %vm1988_vm1, %v3759_v0  ;;  %2010 = vst.msk [vmem:[#allocation4 + $0x59] sm:$0x1] %vm1988_vm1, %v3759_v0 }
  0xd3   : > { %716 = vrot.lane.b32.xlu1 %v1452_v1, %s3761_s8  ;;  %2011 = vst.msk [vmem:[#allocation4 + $0x71] sm:$0x1] %vm1988_vm1, %v3759_v0  ;;  %2012 = vst.msk [vmem:[#allocation4 + $0x89] sm:$0x1] %vm1988_vm1, %v3759_v0 }
  0xd4   : > { %2013 = vst.msk [vmem:[#allocation4 + $0xa1] sm:$0x1] %vm1988_vm1, %v3759_v0  ;;  %2014 = vst.msk [vmem:[#allocation4 + $0xb9] sm:$0x1] %vm1988_vm1, %v3759_v0 }
  0xd5   : > { %2015 = vst.msk [vmem:[#allocation4 + $0xd1] sm:$0x1] %vm1988_vm1, %v3759_v0  ;;  %2016 = vst.msk [vmem:[#allocation4 + $0xe9] sm:$0x1] %vm1988_vm1, %v3759_v0 }
  0xd6   : > { %1101 = vrot.lane.b32.xlu0 %v1452_v1, %s3764_s15  ;;  %v1458_v1 = vpack.c.bf16 %v1436_v59, %v1435_v58  ;;  %2017 = vst.msk [vmem:[#allocation4 + $0x101] sm:$0x1] %vm1988_vm1, %v3759_v0  ;;  %2018 = vst.msk [vmem:[#allocation4 + $0x119] sm:$0x1] %vm1988_vm1, %v3759_v0 }
  0xd7   : > { %845 = vrot.lane.b32.xlu1 %v1581_v63, %s3762_s9  ;;  %2019 = vst.msk [vmem:[#allocation4 + $0x131] sm:$0x1] %vm1988_vm1, %v3759_v0  ;;  %2020 = vst.msk [vmem:[#allocation4 + $0x149] sm:$0x1] %vm1988_vm1, %v3759_v0 }
  0xd8   : > { %2021 = vst.msk [vmem:[#allocation4 + $0x161] sm:$0x1] %vm1988_vm1, %v3759_v0  ;;  %2022 = vst.msk [vmem:[#allocation4 + $0x179] sm:$0x1] %vm1988_vm1, %v3759_v0 }
  0xd9   : > { %2023 = vst.msk [vmem:[#allocation4 + $0x191] sm:$0x1] %vm1988_vm1, %v3759_v0  ;;  %2024 = vst.msk [vmem:[#allocation4 + $0x1a9] sm:$0x1] %vm1988_vm1, %v3759_v0 }
  0xda   : > { %1230 = vrot.lane.b32.xlu0 %v1581_v63, %s3765_s18 }
  0xdb   : > { %974 = vrot.lane.b32.xlu1 %v4111_v60, %s3763_s12 }
  0xde   : > { %1360 = vrot.lane.b32.xlu0 %v4111_v60, %s3766_s22  ;;  %v1043_v60 = vld [vmem:[#allocation2 + $0xc1] sm:$0xff] }
  0xdf   : > { %1103 = vrot.lane.b32.xlu1 %v1066_v4, %s3764_s15  ;;  %v1068_v16 = vpack.c.bf16 %v1044_v14, %v1043_v60  ;;  %v1180_v60 = vld [vmem:[#allocation2 + $0x122] sm:$0xff]  ;;  %v1181_v14 = vld [vmem:[#allocation2 + $0x12a] sm:$0xff] }
  0xe2   : > { %1489 = vrot.lane.b32.xlu0 %v1066_v4, %s3767_s26 }
  0xe3   : > { %1232 = vrot.lane.b32.xlu1 %v1195_v51, %s3765_s18 }
  0xe6   : > { %1618 = vrot.lane.b32.xlu0 %v1195_v51, %s3768_s27 }
  0xe7   : > { %1362 = vrot.lane.b32.xlu1 %v4124_v5, %s3766_s22 }
  0xea   : > { %1620 = vrot.lane.b32.xlu0 %v1583_v12, %s3768_s27 }
  0xeb   : > { %1491 = vrot.lane.b32.xlu1 %v1454_v13, %s3767_s26 }
  0xee   : > { %847 = vrot.lane.b32.xlu0 %v1195_v51, %s3762_s9 }
  0xef   : > { %718 = vrot.lane.b32.xlu1 %v1066_v4, %s3761_s8 }
  0xf2   : > { %976 = vrot.lane.b32.xlu0 %v4124_v5, %s3763_s12  ;;  %v1197_v5 = vpack.c.bf16 %v1173_v18, %v1172_v17 }
  0xf3   : > { %720 = vrot.lane.b32.xlu1 %v1454_v13, %s3761_s8 }
  0xf6   : > { %1105 = vrot.lane.b32.xlu0 %v1454_v13, %s3764_s15 }
  0xf7   : > { %849 = vrot.lane.b32.xlu1 %v1583_v12, %s3762_s9 }
  0xfa   : > { %1234 = vrot.lane.b32.xlu0 %v1583_v12, %s3765_s18 }
  0xfb   : > { %978 = vrot.lane.b32.xlu1 %v4133_v15, %s3763_s12 }
  0xfe   : > { %1364 = vrot.lane.b32.xlu0 %v4133_v15, %s3766_s22 }
  0xff   : > { %1107 = vrot.lane.b32.xlu1 %v1068_v16, %s3764_s15 }
 0x102   : > { %1493 = vrot.lane.b32.xlu0 %v1068_v16, %s3767_s26 }
 0x103   : > { %1236 = vrot.lane.b32.xlu1 %v1197_v5, %s3765_s18 }
 0x104   : > { %v965_v19 = vpop.permute.xlu0 %964 }
 0x105   : > { %v709_v21 = vpop.permute.xlu1 %708  ;;  %1013 = vst.msk [vmem:[#allocation3] sm:$0xff] %vm1012_vm8, %v965_v19 }
 0x106   : > { %756 = vst.msk [vmem:[#allocation3 + $0x8] sm:$0xff] %vm754_vm6, %v709_v21  ;;  %1622 = vrot.lane.b32.xlu0 %v1197_v5, %s3768_s27 }
 0x107   : > { %1366 = vrot.lane.b32.xlu1 %v4141_v20, %s3766_s22 }
 0x108   : > { %v1094_v15 = vpop.permute.xlu0 %1093 }
 0x109   : > { %v838_v27 = vpop.permute.xlu1 %837  ;;  %1142 = vst.msk [vmem:[#allocation3] sm:$0xff] %vm1141_vm9, %v1094_v15 }
 0x10a   : > { %885 = vst.msk [vmem:[#allocation3 + $0x8] sm:$0xff] %vm883_vm7, %v838_v27  ;;  %1624 = vrot.lane.b32.xlu0 %v1585_v28, %s3768_s27 }
 0x10b   : > { %1495 = vrot.lane.b32.xlu1 %v1456_v29, %s3767_s26 }
 0x10c   : > { %v1223_v31 = vpop.permute.xlu0 %1222 }
 0x10d   : > { %v967_v32 = vpop.permute.xlu1 %966  ;;  %1271 = vst.msk [vmem:[#allocation3] sm:$0xff] %vm1270_vm10, %v1223_v31 }
 0x10e   : > { %1014 = vst.msk [vmem:[#allocation3 + $0x8] sm:$0xff] %vm1012_vm8, %v967_v32  ;;  %851 = vrot.lane.b32.xlu0 %v1197_v5, %s3762_s9  ;;  %v1201_v5 = vpack.c.bf16 %v1181_v14, %v1180_v60  ;;  %v1188_v60 = vld [vmem:[#allocation2 + $0x182] sm:$0xff]  ;;  %v1189_v14 = vld [vmem:[#allocation2 + $0x18a] sm:$0xff] }
 0x10f   : > { %722 = vrot.lane.b32.xlu1 %v1068_v16, %s3761_s8 }
 0x110   : > { %v1353_v33 = vpop.permute.xlu0 %1352 }
 0x111   : > { %v1096_v34 = vpop.permute.xlu1 %1095  ;;  %1401 = vst.msk [vmem:[#allocation3] sm:$0xff] %vm1400_vm11, %v1353_v33 }
 0x112   : > { %1143 = vst.msk [vmem:[#allocation3 + $0x8] sm:$0xff] %vm1141_vm9, %v1096_v34  ;;  %980 = vrot.lane.b32.xlu0 %v4141_v20, %s3763_s12  ;;  %v1047_v20 = vld [vmem:[#allocation2 + $0xf1] sm:$0xff] }
 0x113   : > { %724 = vrot.lane.b32.xlu1 %v1456_v29, %s3761_s8  ;;  %v1070_v45 = vpack.c.bf16 %v1048_v40, %v1047_v20  ;;  %v1055_v20 = vld [vmem:[#allocation2 + $0x151] sm:$0xff] }
 0x114   : > { %v1482_v36 = vpop.permute.xlu0 %1481 }
 0x115   : > { %v1225_v37 = vpop.permute.xlu1 %1224  ;;  %1530 = vst.msk [vmem:[#allocation3] sm:$0xff] %vm1529_vm12, %v1482_v36 }
 0x116   : > { %1272 = vst.msk [vmem:[#allocation3 + $0x8] sm:$0xff] %vm1270_vm10, %v1225_v37  ;;  %1109 = vrot.lane.b32.xlu0 %v1456_v29, %s3764_s15  ;;  %v1460_v29 = vpack.c.bf16 %v1440_v26, %v1439_v24  ;;  %v2123_v24 = vld [vmem:[#allocation4 + $0x9] sm:$0xff] }
 0x117   : > { %853 = vrot.lane.b32.xlu1 %v1585_v28, %s3762_s9 }
 0x118   : > { %v1611_v38 = vpop.permute.xlu0 %1610 }
 0x119   : > { %v1355_v39 = vpop.permute.xlu1 %1354  ;;  %1659 = vst.msk [vmem:[#allocation3] sm:$0xff] %vm1658_vm13, %v1611_v38 }
 0x11a   : > { %1402 = vst.msk [vmem:[#allocation3 + $0x8] sm:$0xff] %vm1400_vm11, %v1355_v39  ;;  %1238 = vrot.lane.b32.xlu0 %v1585_v28, %s3765_s18 }
 0x11b   : > { %982 = vrot.lane.b32.xlu1 %v4150_v25, %s3763_s12 }
 0x11c   : > { %v1613_v41 = vpop.permute.xlu0 %1612 }
 0x11d   : > { %v1484_v43 = vpop.permute.xlu1 %1483 }
 0x11e   : > { %1531 = vst.msk [vmem:[#allocation3 + $0x8] sm:$0xff] %vm1529_vm12, %v1484_v43  ;;  %1368 = vrot.lane.b32.xlu0 %v4150_v25, %s3766_s22  ;;  %v1564_v25 = vld [vmem:[#allocation2 + $0x10a] sm:$0xff] }
 0x11f   : > { %1660 = vst.msk [vmem:[#allocation3 + $0x8] sm:$0xff] %vm1658_vm13, %v1613_v41  ;;  %1111 = vrot.lane.b32.xlu1 %v1070_v45, %s3764_s15  ;;  %v1587_v63 = vpack.c.bf16 %v1565_v55, %v1564_v25  ;;  %v1443_v55 = vld [vmem:[#allocation2 + $0x169] sm:$0xff] }
 0x120   : > { %v840_v48 = vpop.permute.xlu0 %839  ;;  %v1675_v50 = vld [vmem:[#allocation3] sm:$0xff] }
 0x121   : > { %v711_v49 = vpop.permute.xlu1 %710  ;;  %3650 = vmatprep.mubr.msk.bf16.mxu0 %vm1734_vm14, %v1675_v50 }
 0x122   : > { %757 = vst.msk [vmem:[#allocation3 + $0x10] sm:$0xff] %vm754_vm6, %v711_v49  ;;  %1497 = vrot.lane.b32.xlu0 %v1070_v45, %s3767_s26 }
 0x123   : > { %886 = vst.msk [vmem:[#allocation3 + $0x10] sm:$0xff] %vm883_vm7, %v840_v48  ;;  %1240 = vrot.lane.b32.xlu1 %v1199_v52, %s3765_s18 }
 0x124   : > { %v969_v42 = vpop.permute.xlu0 %968 }
 0x125   : > { %v713_v54 = vpop.permute.xlu1 %712  ;;  %1015 = vst.msk [vmem:[#allocation3 + $0x10] sm:$0xff] %vm1012_vm8, %v969_v42 }
 0x126   : > { %758 = vst.msk [vmem:[#allocation3 + $0x18] sm:$0xff] %vm754_vm6, %v713_v54  ;;  %v1676_v56 = vld [vmem:[#allocation3 + $0x8] sm:$0xff]  ;;  %1626 = vrot.lane.b32.xlu0 %v1199_v52, %s3768_s27  ;;  %v1572_v54 = vld [vmem:[#allocation2 + $0x16a] sm:$0xff] }
 0x127   : > { %1370 = vrot.lane.b32.xlu1 %v4159_v30, %s3766_s22  ;;  %3651 = vmatmul.mubr.msk.bf16.vlgmr.msra.gmra.mrb[0].mxu0 %vm1734_vm14, %v1676_v56  ;;  %v1444_v56 = vld [vmem:[#allocation2 + $0x171] sm:$0xff] }
 0x128   : > { %v1098_v61 = vpop.permute.xlu0 %1097 }
 0x129   : > { %v842_v62 = vpop.permute.xlu1 %841  ;;  %1144 = vst.msk [vmem:[#allocation3 + $0x10] sm:$0xff] %vm1141_vm9, %v1098_v61 }
 0x12a   : > { %887 = vst.msk [vmem:[#allocation3 + $0x18] sm:$0xff] %vm883_vm7, %v842_v62  ;;  %1628 = vrot.lane.b32.xlu0 %v1587_v63, %s3768_s27  ;;  %v1462_v62 = vpack.c.bf16 %v1444_v56, %v1443_v55 }
 0x12b   : > { %1499 = vrot.lane.b32.xlu1 %v1458_v1, %s3767_s26 }
 0x12c   : > { %v1227_v2 = vpop.permute.xlu0 %1226 }
 0x12d   : > { %v971_v3 = vpop.permute.xlu1 %970  ;;  %1273 = vst.msk [vmem:[#allocation3 + $0x10] sm:$0xff] %vm1270_vm10, %v1227_v2 }
 0x12e   : > { %1016 = vst.msk [vmem:[#allocation3 + $0x18] sm:$0xff] %vm1012_vm8, %v971_v3  ;;  %855 = vrot.lane.b32.xlu0 %v1199_v52, %s3762_s9 }
 0x12f   : > { %726 = vrot.lane.b32.xlu1 %v1070_v45, %s3761_s8  ;;  %v1184_v45 = vld [vmem:[#allocation2 + $0x152] sm:$0xff] }
 0x130   : > { %v1357_v4 = vpop.permute.xlu0 %1356  ;;  %v1203_v50 = vpack.c.bf16 %v1185_v46, %v1184_v45 }
 0x131   : > { %v1100_v6 = vpop.permute.xlu1 %1099  ;;  %1403 = vst.msk [vmem:[#allocation3 + $0x10] sm:$0xff] %vm1400_vm11, %v1357_v4 }
 0x132   : > { %1145 = vst.msk [vmem:[#allocation3 + $0x18] sm:$0xff] %vm1141_vm9, %v1100_v6  ;;  %984 = vrot.lane.b32.xlu0 %v4159_v30, %s3763_s12  ;;  %v1052_v30 = vld [vmem:[#allocation2 + $0x129] sm:$0xff] }
 0x133   : > { %728 = vrot.lane.b32.xlu1 %v1458_v1, %s3761_s8  ;;  %v1072_v13 = vpack.c.bf16 %v1052_v30, %v1051_v10  ;;  %v1060_v30 = vld [vmem:[#allocation2 + $0x189] sm:$0xff] }
 0x134   : > { %v1486_v7 = vpop.permute.xlu0 %1485 }
 0x135   : > { %v1229_v51 = vpop.permute.xlu1 %1228  ;;  %1532 = vst.msk [vmem:[#allocation3 + $0x10] sm:$0xff] %vm1529_vm12, %v1486_v7  ;;  %v930_v7 = vld [vmem:[#allocation2 + $0x180] sm:$0xff] }
 0x136   : > { %1274 = vst.msk [vmem:[#allocation3 + $0x18] sm:$0xff] %vm1270_vm10, %v1229_v51  ;;  %1113 = vrot.lane.b32.xlu0 %v1458_v1, %s3764_s15  ;;  %v931_v51 = vld [vmem:[#allocation2 + $0x188] sm:$0xff] }
 0x137   : > { %857 = vrot.lane.b32.xlu1 %v1587_v63, %s3762_s9  ;;  %v947_v10 = vpack.c.bf16 %v931_v51, %v930_v7 }
 0x138   : > { %v1615_v8 = vpop.permute.xlu0 %1614 }
 0x139   : > { %v1359_v9 = vpop.permute.xlu1 %1358  ;;  %1661 = vst.msk [vmem:[#allocation3 + $0x10] sm:$0xff] %vm1658_vm13, %v1615_v8 }
 0x13a   : > { %1404 = vst.msk [vmem:[#allocation3 + $0x18] sm:$0xff] %vm1400_vm11, %v1359_v9  ;;  %1242 = vrot.lane.b32.xlu0 %v1587_v63, %s3765_s18 }
 0x13b   : > { %986 = vrot.lane.b32.xlu1 %v4167_v35, %s3763_s12 }
 0x13c   : > { %v1617_v11 = vpop.permute.xlu0 %1616 }
 0x13d   : > { %v1488_v12 = vpop.permute.xlu1 %1487 }
 0x13e   : > { %1533 = vst.msk [vmem:[#allocation3 + $0x18] sm:$0xff] %vm1529_vm12, %v1488_v12  ;;  %1372 = vrot.lane.b32.xlu0 %v4167_v35, %s3766_s22  ;;  %v1569_v35 = vld [vmem:[#allocation2 + $0x142] sm:$0xff] }
 0x13f   : > { %1662 = vst.msk [vmem:[#allocation3 + $0x18] sm:$0xff] %vm1658_vm13, %v1617_v11  ;;  %1115 = vrot.lane.b32.xlu1 %v1072_v13, %s3764_s15  ;;  %v1589_v28 = vpack.c.bf16 %v1569_v35, %v1568_v22  ;;  %v1447_v22 = vld [vmem:[#allocation2 + $0x199] sm:$0xff]  ;;  %v1448_v35 = vld [vmem:[#allocation2 + $0x1a1] sm:$0xff] }
 0x140   : > { %v844_v16 = vpop.permute.xlu0 %843  ;;  %v1677_v18 = vld [vmem:[#allocation3 + $0x10] sm:$0xff] }
 0x141   : > { %v715_v17 = vpop.permute.xlu1 %714  ;;  %3654 = vmatprep.mubr.msk.bf16.mxu0 %vm1734_vm14, %v1677_v18 }
 0x142   : > { %759 = vst.msk [vmem:[#allocation3 + $0x20] sm:$0xff] %vm754_vm6, %v715_v17  ;;  %1501 = vrot.lane.b32.xlu0 %v1072_v13, %s3767_s26  ;;  %v1319_v17 = vld [vmem:[#allocation2 + $0x1a0] sm:$0xff] }
 0x143   : > { %888 = vst.msk [vmem:[#allocation3 + $0x20] sm:$0xff] %vm883_vm7, %v844_v16  ;;  %1244 = vrot.lane.b32.xlu1 %v1201_v5, %s3765_s18  ;;  %v1318_v16 = vld [vmem:[#allocation2 + $0x198] sm:$0xff] }
 0x144   : > { %v973_v19 = vpop.permute.xlu0 %972  ;;  %v1335_v0 = vpack.c.bf16 %v1319_v17, %v1318_v16 }
 0x145   : > { %v717_v21 = vpop.permute.xlu1 %716  ;;  %1017 = vst.msk [vmem:[#allocation3 + $0x20] sm:$0xff] %vm1012_vm8, %v973_v19 }
 0x146   : > { %760 = vst.msk [vmem:[#allocation3 + $0x28] sm:$0xff] %vm754_vm6, %v717_v21  ;;  %v1678_v23 = vld [vmem:[#allocation3 + $0x18] sm:$0xff]  ;;  %1630 = vrot.lane.b32.xlu0 %v1201_v5, %s3768_s27  ;;  %v1205_v21 = vpack.c.bf16 %v1189_v14, %v1188_v60 }
 0x147   : > { %1374 = vrot.lane.b32.xlu1 %v4176_v44, %s3766_s22  ;;  %3655 = vmatmul.mubr.msk.bf16.gmra.mrb[4].mxu0 %vm1734_vm14, %v1678_v23  ;;  %v2122_v23 = vld [vmem:[#allocation4 + $0x1] sm:$0xff] }
 0x148   : > { %v1102_v15 = vpop.permute.xlu0 %1101 }
 0x149   : > { %v846_v27 = vpop.permute.xlu1 %845  ;;  %1146 = vst.msk [vmem:[#allocation3 + $0x20] sm:$0xff] %vm1141_vm9, %v1102_v15 }
 0x14a   : > { %889 = vst.msk [vmem:[#allocation3 + $0x28] sm:$0xff] %vm883_vm7, %v846_v27  ;;  %1632 = vrot.lane.b32.xlu0 %v1589_v28, %s3768_s27 }
 0x14b   : > { %1503 = vrot.lane.b32.xlu1 %v1460_v29, %s3767_s26 }
 0x14c   : > { %v1231_v31 = vpop.permute.xlu0 %1230 }
 0x14d   : > { %v975_v32 = vpop.permute.xlu1 %974  ;;  %1275 = vst.msk [vmem:[#allocation3 + $0x20] sm:$0xff] %vm1270_vm10, %v1231_v31  ;;  %v2154_v31 = vpack.c.bf16 %v2123_v24, %v2122_v23 }
 0x14e   : > { %1018 = vst.msk [vmem:[#allocation3 + $0x28] sm:$0xff] %vm1012_vm8, %v975_v32  ;;  %859 = vrot.lane.b32.xlu0 %v1201_v5, %s3762_s9  ;;  %v1577_v32 = vld [vmem:[#allocation2 + $0x1a2] sm:$0xff] }
 0x14f   : > { %730 = vrot.lane.b32.xlu1 %v1072_v13, %s3761_s8 }
 0x150   : > { %v1361_v33 = vpop.permute.xlu0 %1360 }
 0x151   : > { %v1104_v34 = vpop.permute.xlu1 %1103  ;;  %1405 = vst.msk [vmem:[#allocation3 + $0x20] sm:$0xff] %vm1400_vm11, %v1361_v33  ;;  %v2250_v33 = vld [vmem:[#allocation4 + $0x2] sm:$0xff] }
 0x152   : > { %1147 = vst.msk [vmem:[#allocation3 + $0x28] sm:$0xff] %vm1141_vm9, %v1104_v34  ;;  %988 = vrot.lane.b32.xlu0 %v4176_v44, %s3763_s12  ;;  %v1056_v44 = vld [vmem:[#allocation2 + $0x159] sm:$0xff] }
 0x153   : > { %732 = vrot.lane.b32.xlu1 %v1460_v29, %s3761_s8  ;;  %v1074_v43 = vpack.c.bf16 %v1056_v44, %v1055_v20  ;;  %v2251_v34 = vld [vmem:[#allocation4 + $0xa] sm:$0xff] }
 0x154   : > { %v1490_v36 = vpop.permute.xlu0 %1489 }
 0x155   : > { %v1233_v37 = vpop.permute.xlu1 %1232  ;;  %1534 = vst.msk [vmem:[#allocation3 + $0x20] sm:$0xff] %vm1529_vm12, %v1490_v36 }
 0x156   : > { %1276 = vst.msk [vmem:[#allocation3 + $0x28] sm:$0xff] %vm1270_vm10, %v1233_v37  ;;  %1117 = vrot.lane.b32.xlu0 %v1460_v29, %s3764_s15  ;;  %v1576_v29 = vld [vmem:[#allocation2 + $0x19a] sm:$0xff] }
 0x157   : > { %861 = vrot.lane.b32.xlu1 %v1589_v28, %s3762_s9 }
 0x158   : > { %v1619_v38 = vpop.permute.xlu0 %1618 }
 0x159   : > { %v1363_v39 = vpop.permute.xlu1 %1362  ;;  %1663 = vst.msk [vmem:[#allocation3 + $0x20] sm:$0xff] %vm1658_vm13, %v1619_v38  ;;  %v1593_v38 = vpack.c.bf16 %v1577_v32, %v1576_v29 }
 0x15a   : > { %1406 = vst.msk [vmem:[#allocation3 + $0x28] sm:$0xff] %vm1400_vm11, %v1363_v39  ;;  %1246 = vrot.lane.b32.xlu0 %v1589_v28, %s3765_s18  ;;  %v1464_v28 = vpack.c.bf16 %v1448_v35, %v1447_v22  ;;  %v2282_v39 = vpack.c.bf16 %v2251_v34, %v2250_v33  ;;  %v2058_v33 = vld [vmem:[#allocation4] sm:$0xff]  ;;  %v2059_v34 = vld [vmem:[#allocation4 + $0x8] sm:$0xff] }
 0x15b   : > { %990 = vrot.lane.b32.xlu1 %v4185_v53, %s3763_s12 }
 0x15c   : > { %v1621_v40 = vpop.permute.xlu0 %1620 }
 0x15d   : > { %v1492_v41 = vpop.permute.xlu1 %1491 }
 0x15e   : > { %1535 = vst.msk [vmem:[#allocation3 + $0x28] sm:$0xff] %vm1529_vm12, %v1492_v41  ;;  %1376 = vrot.lane.b32.xlu0 %v4185_v53, %s3766_s22  ;;  %v1573_v53 = vld [vmem:[#allocation2 + $0x172] sm:$0xff] }
 0x15f   : > { %1664 = vst.msk [vmem:[#allocation3 + $0x28] sm:$0xff] %vm1658_vm13, %v1621_v40  ;;  %1119 = vrot.lane.b32.xlu1 %v1074_v43, %s3764_s15  ;;  %v1591_v61 = vpack.c.bf16 %v1573_v53, %v1572_v54 }
 0x160   : > { %v848_v47 = vpop.permute.xlu0 %847  ;;  %v1679_v49 = vld [vmem:[#allocation3 + $0x20] sm:$0xff] }
 0x161   : > { %v719_v48 = vpop.permute.xlu1 %718  ;;  %3658 = vmatprep.mubr.msk.bf16.mxu0 %vm1734_vm14, %v1679_v49 }
 0x162   : > { %761 = vst.msk [vmem:[#allocation3 + $0x30] sm:$0xff] %vm754_vm6, %v719_v48  ;;  %1505 = vrot.lane.b32.xlu0 %v1074_v43, %s3767_s26 }
 0x163   : > { %890 = vst.msk [vmem:[#allocation3 + $0x30] sm:$0xff] %vm883_vm7, %v848_v47  ;;  %1248 = vrot.lane.b32.xlu1 %v1203_v50, %s3765_s18 }
 0x164   : > { %v977_v52 = vpop.permute.xlu0 %976 }
 0x165   : > { %v721_v42 = vpop.permute.xlu1 %720  ;;  %1019 = vst.msk [vmem:[#allocation3 + $0x30] sm:$0xff] %vm1012_vm8, %v977_v52 }
 0x166   : > { %762 = vst.msk [vmem:[#allocation3 + $0x38] sm:$0xff] %vm754_vm6, %v721_v42  ;;  %v1680_v25 = vld [vmem:[#allocation3 + $0x28] sm:$0xff]  ;;  %1634 = vrot.lane.b32.xlu0 %v1203_v50, %s3768_s27 }
 0x167   : > { %1378 = vrot.lane.b32.xlu1 %v4192_v57, %s3766_s22  ;;  %3659 = vmatmul.mubr.msk.bf16.gmra.mrb[8].mxu0 %vm1734_vm14, %v1680_v25 }
 0x168   : > { %v1106_v58 = vpop.permute.xlu0 %1105 }
 0x169   : > { %v850_v59 = vpop.permute.xlu1 %849  ;;  %1148 = vst.msk [vmem:[#allocation3 + $0x30] sm:$0xff] %vm1141_vm9, %v1106_v58 }
 0x16a   : > { %891 = vst.msk [vmem:[#allocation3 + $0x38] sm:$0xff] %vm883_vm7, %v850_v59  ;;  %1636 = vrot.lane.b32.xlu0 %v1591_v61, %s3768_s27 }
 0x16b   : > { %1507 = vrot.lane.b32.xlu1 %v1462_v62, %s3767_s26 }
 0x16c   : > { %v1235_v63 = vpop.permute.xlu0 %1234 }
 0x16d   : > { %v979_v1 = vpop.permute.xlu1 %978  ;;  %1277 = vst.msk [vmem:[#allocation3 + $0x30] sm:$0xff] %vm1270_vm10, %v1235_v63 }
 0x16e   : > { %1020 = vst.msk [vmem:[#allocation3 + $0x38] sm:$0xff] %vm1012_vm8, %v979_v1  ;;  %863 = vrot.lane.b32.xlu0 %v1203_v50, %s3762_s9 }
 0x16f   : > { %734 = vrot.lane.b32.xlu1 %v1074_v43, %s3761_s8 }
 0x170   : > { %v1365_v2 = vpop.permute.xlu0 %1364 }
 0x171   : > { %v1108_v3 = vpop.permute.xlu1 %1107  ;;  %1407 = vst.msk [vmem:[#allocation3 + $0x30] sm:$0xff] %vm1400_vm11, %v1365_v2 }
 0x172   : > { %1149 = vst.msk [vmem:[#allocation3 + $0x38] sm:$0xff] %vm1141_vm9, %v1108_v3  ;;  %992 = vrot.lane.b32.xlu0 %v4192_v57, %s3763_s12  ;;  %v1059_v57 = vld [vmem:[#allocation2 + $0x181] sm:$0xff] }
 0x173   : > { %736 = vrot.lane.b32.xlu1 %v1462_v62, %s3761_s8  ;;  %v1076_v13 = vpack.c.bf16 %v1060_v30, %v1059_v57 }
 0x174   : > { %v1494_v4 = vpop.permute.xlu0 %1493 }
 0x175   : > { %v1237_v6 = vpop.permute.xlu1 %1236  ;;  %1536 = vst.msk [vmem:[#allocation3 + $0x30] sm:$0xff] %vm1529_vm12, %v1494_v4 }
 0x176   : > { %1278 = vst.msk [vmem:[#allocation3 + $0x38] sm:$0xff] %vm1270_vm10, %v1237_v6  ;;  %1121 = vrot.lane.b32.xlu0 %v1462_v62, %s3764_s15 }
 0x177   : > { %865 = vrot.lane.b32.xlu1 %v1591_v61, %s3762_s9 }
 0x178   : > { %v1623_v8 = vpop.permute.xlu0 %1622 }
 0x179   : > { %v1367_v9 = vpop.permute.xlu1 %1366  ;;  %1665 = vst.msk [vmem:[#allocation3 + $0x30] sm:$0xff] %vm1658_vm13, %v1623_v8 }
 0x17a   : > { %1408 = vst.msk [vmem:[#allocation3 + $0x38] sm:$0xff] %vm1400_vm11, %v1367_v9  ;;  %1250 = vrot.lane.b32.xlu0 %v1591_v61, %s3765_s18 }
 0x17b   : > { %994 = vrot.lane.b32.xlu1 %v947_v10, %s3763_s12 }
 0x17c   : > { %v1625_v11 = vpop.permute.xlu0 %1624 }
 0x17d   : > { %v1496_v12 = vpop.permute.xlu1 %1495 }
 0x17e   : > { %1537 = vst.msk [vmem:[#allocation3 + $0x38] sm:$0xff] %vm1529_vm12, %v1496_v12  ;;  %1380 = vrot.lane.b32.xlu0 %v947_v10, %s3766_s22 }
 0x17f   : > { %1666 = vst.msk [vmem:[#allocation3 + $0x38] sm:$0xff] %vm1658_vm13, %v1625_v11  ;;  %1123 = vrot.lane.b32.xlu1 %v1076_v13, %s3764_s15 }
 0x180   : > { %v852_v18 = vpop.permute.xlu0 %851  ;;  %v1681_v19 = vld [vmem:[#allocation3 + $0x30] sm:$0xff] }
 0x181   : > { %v723_v5 = vpop.permute.xlu1 %722  ;;  %3662 = vmatprep.mubr.msk.bf16.mxu0 %vm1734_vm14, %v1681_v19 }
 0x182   : > { %763 = vst.msk [vmem:[#allocation3 + $0x40] sm:$0xff] %vm754_vm6, %v723_v5  ;;  %1509 = vrot.lane.b32.xlu0 %v1076_v13, %s3767_s26 }
 0x183   : > { %892 = vst.msk [vmem:[#allocation3 + $0x40] sm:$0xff] %vm883_vm7, %v852_v18  ;;  %1252 = vrot.lane.b32.xlu1 %v1205_v21, %s3765_s18 }
 0x184   : > { %v981_v26 = vpop.permute.xlu0 %980 }
 0x185   : > { %v725_v15 = vpop.permute.xlu1 %724  ;;  %1021 = vst.msk [vmem:[#allocation3 + $0x40] sm:$0xff] %vm1012_vm8, %v981_v26 }
 0x186   : > { %764 = vst.msk [vmem:[#allocation3 + $0x48] sm:$0xff] %vm754_vm6, %v725_v15  ;;  %v1682_v27 = vld [vmem:[#allocation3 + $0x38] sm:$0xff]  ;;  %1638 = vrot.lane.b32.xlu0 %v1205_v21, %s3768_s27 }
 0x187   : > { %1382 = vrot.lane.b32.xlu1 %v1335_v0, %s3766_s22  ;;  %3663 = vmatmul.mubr.msk.bf16.gmra.mrb[12].mxu0 %vm1734_vm14, %v1682_v27 }
 0x188   : > { %v1110_v36 = vpop.permute.xlu0 %1109 }
 0x189   : > { %v854_v37 = vpop.permute.xlu1 %853  ;;  %1150 = vst.msk [vmem:[#allocation3 + $0x40] sm:$0xff] %vm1141_vm9, %v1110_v36 }
 0x18a   : > { %893 = vst.msk [vmem:[#allocation3 + $0x48] sm:$0xff] %vm883_vm7, %v854_v37  ;;  %2186 = vrot.lane.b32.xlu0 %v2154_v31, %s3760_s28 }
 0x18b   : > { %1511 = vrot.lane.b32.xlu1 %v1464_v28, %s3767_s26 }
 0x18c   : > { %v1239_v20 = vpop.permute.xlu0 %1238 }
 0x18d   : > { %v983_v44 = vpop.permute.xlu1 %982  ;;  %1279 = vst.msk [vmem:[#allocation3 + $0x40] sm:$0xff] %vm1270_vm10, %v1239_v20 }
 0x18e   : > { %1022 = vst.msk [vmem:[#allocation3 + $0x48] sm:$0xff] %vm1012_vm8, %v983_v44  ;;  %2314 = vrot.lane.b32.xlu0 %v2282_v39, %s3761_s8  ;;  %v4535_v44 = vld [vmem:[%s5065_s3] ss:$0 sm:$0xff] }
 0x18f   : > { %1640 = vrot.lane.b32.xlu1 %v1593_v38, %s3768_s27  ;;  %v2090_v38 = vpack.c.bf16 %v2059_v34, %v2058_v33 }
 0x190   : > { %v1369_v40 = vpop.permute.xlu0 %1368 }
 0x191   : > { %v1112_v41 = vpop.permute.xlu1 %1111  ;;  %1409 = vst.msk [vmem:[#allocation3 + $0x40] sm:$0xff] %vm1400_vm11, %v1369_v40 }
 0x192   : > { %1151 = vst.msk [vmem:[#allocation3 + $0x48] sm:$0xff] %vm1141_vm9, %v1112_v41 }
 0x193   : > { %2106 = vst.msk [vmem:[#allocation5] sm:$0xff] %vm352_vm0, %v2090_v38 }
 0x194   : > { %v1498_v43 = vpop.permute.xlu0 %1497 }
 0x195   : > { %v1241_v45 = vpop.permute.xlu1 %1240  ;;  %1538 = vst.msk [vmem:[#allocation3 + $0x40] sm:$0xff] %vm1529_vm12, %v1498_v43 }
 0x196   : > { %1280 = vst.msk [vmem:[#allocation3 + $0x48] sm:$0xff] %vm1270_vm10, %v1241_v45 }
 0x198   : > { %v1627_v46 = vpop.permute.xlu0 %1626 }
 0x199   : > { %v1371_v47 = vpop.permute.xlu1 %1370  ;;  %1667 = vst.msk [vmem:[#allocation3 + $0x40] sm:$0xff] %vm1658_vm13, %v1627_v46 }
 0x19a   : > { %1410 = vst.msk [vmem:[#allocation3 + $0x48] sm:$0xff] %vm1400_vm11, %v1371_v47 }
 0x19c   : > { %v1629_v48 = vpop.permute.xlu0 %1628 }
 0x19d   : > { %v1500_v49 = vpop.permute.xlu1 %1499 }
 0x19e   : > { %1539 = vst.msk [vmem:[#allocation3 + $0x48] sm:$0xff] %vm1529_vm12, %v1500_v49 }
 0x19f   : > { %1668 = vst.msk [vmem:[#allocation3 + $0x48] sm:$0xff] %vm1658_vm13, %v1629_v48 }
 0x1a0   : > { %v856_v50 = vpop.permute.xlu0 %855  ;;  %v1683_v42 = vld [vmem:[#allocation3 + $0x40] sm:$0xff] }
 0x1a1   : > { %v727_v52 = vpop.permute.xlu1 %726  ;;  %3666 = vmatprep.mubr.msk.bf16.mxu0 %vm1734_vm14, %v1683_v42 }
 0x1a2   : > { %765 = vst.msk [vmem:[#allocation3 + $0x50] sm:$0xff] %vm754_vm6, %v727_v52 }
 0x1a3   : > { %894 = vst.msk [vmem:[#allocation3 + $0x50] sm:$0xff] %vm883_vm7, %v856_v50 }
 0x1a4   : > { %v985_v54 = vpop.permute.xlu0 %984 }
 0x1a5   : > { %v729_v53 = vpop.permute.xlu1 %728  ;;  %1023 = vst.msk [vmem:[#allocation3 + $0x50] sm:$0xff] %vm1012_vm8, %v985_v54 }
 0x1a6   : > { %766 = vst.msk [vmem:[#allocation3 + $0x58] sm:$0xff] %vm754_vm6, %v729_v53  ;;  %v1684_v25 = vld [vmem:[#allocation3 + $0x48] sm:$0xff] }
 0x1a7   : > { %3667 = vmatmul.mubr.msk.bf16.gmra.mrb[16].mxu0 %vm1734_vm14, %v1684_v25 }
 0x1a8   : > { %v1114_v55 = vpop.permute.xlu0 %1113 }
 0x1a9   : > { %v858_v56 = vpop.permute.xlu1 %857  ;;  %1152 = vst.msk [vmem:[#allocation3 + $0x50] sm:$0xff] %vm1141_vm9, %v1114_v55 }
 0x1aa   : > { %895 = vst.msk [vmem:[#allocation3 + $0x58] sm:$0xff] %vm883_vm7, %v858_v56 }
 0x1ac   : > { %v1243_v58 = vpop.permute.xlu0 %1242 }
 0x1ad   : > { %v987_v59 = vpop.permute.xlu1 %986  ;;  %1281 = vst.msk [vmem:[#allocation3 + $0x50] sm:$0xff] %vm1270_vm10, %v1243_v58 }
 0x1ae   : > { %1024 = vst.msk [vmem:[#allocation3 + $0x58] sm:$0xff] %vm1012_vm8, %v987_v59 }
 0x1b0   : > { %v1373_v61 = vpop.permute.xlu0 %1372 }
 0x1b1   : > { %v1116_v62 = vpop.permute.xlu1 %1115  ;;  %1411 = vst.msk [vmem:[#allocation3 + $0x50] sm:$0xff] %vm1400_vm11, %v1373_v61 }
 0x1b2   : > { %1153 = vst.msk [vmem:[#allocation3 + $0x58] sm:$0xff] %vm1141_vm9, %v1116_v62 }
 0x1b4   : > { %v1502_v63 = vpop.permute.xlu0 %1501 }
 0x1b5   : > { %v1245_v1 = vpop.permute.xlu1 %1244  ;;  %1540 = vst.msk [vmem:[#allocation3 + $0x50] sm:$0xff] %vm1529_vm12, %v1502_v63 }
 0x1b6   : > { %1282 = vst.msk [vmem:[#allocation3 + $0x58] sm:$0xff] %vm1270_vm10, %v1245_v1 }
 0x1b8   : > { %v1631_v2 = vpop.permute.xlu0 %1630 }
 0x1b9   : > { %v1375_v3 = vpop.permute.xlu1 %1374  ;;  %1669 = vst.msk [vmem:[#allocation3 + $0x50] sm:$0xff] %vm1658_vm13, %v1631_v2 }
 0x1ba   : > { %1412 = vst.msk [vmem:[#allocation3 + $0x58] sm:$0xff] %vm1400_vm11, %v1375_v3 }
 0x1bc   : > { %v1633_v4 = vpop.permute.xlu0 %1632 }
 0x1bd   : > { %v1504_v6 = vpop.permute.xlu1 %1503 }
 0x1be   : > { %1541 = vst.msk [vmem:[#allocation3 + $0x58] sm:$0xff] %vm1529_vm12, %v1504_v6 }
 0x1bf   : > { %1670 = vst.msk [vmem:[#allocation3 + $0x58] sm:$0xff] %vm1658_vm13, %v1633_v4 }
 0x1c0   : > { %v860_v7 = vpop.permute.xlu0 %859  ;;  %v1685_v8 = vld [vmem:[#allocation3 + $0x50] sm:$0xff] }
 0x1c1   : > { %v731_v51 = vpop.permute.xlu1 %730  ;;  %3670 = vmatprep.mubr.msk.bf16.mxu0 %vm1734_vm14, %v1685_v8 }
 0x1c2   : > { %767 = vst.msk [vmem:[#allocation3 + $0x60] sm:$0xff] %vm754_vm6, %v731_v51 }
 0x1c3   : > { %896 = vst.msk [vmem:[#allocation3 + $0x60] sm:$0xff] %vm883_vm7, %v860_v7 }
 0x1c4   : > { %v989_v9 = vpop.permute.xlu0 %988 }
 0x1c5   : > { %v733_v10 = vpop.permute.xlu1 %732  ;;  %1025 = vst.msk [vmem:[#allocation3 + $0x60] sm:$0xff] %vm1012_vm8, %v989_v9 }
 0x1c6   : > { %768 = vst.msk [vmem:[#allocation3 + $0x68] sm:$0xff] %vm754_vm6, %v733_v10  ;;  %v1686_v57 = vld [vmem:[#allocation3 + $0x58] sm:$0xff] }
 0x1c7   : > { %3671 = vmatmul.mubr.msk.bf16.gmra.mrb[20].mxu0 %vm1734_vm14, %v1686_v57 }
 0x1c8   : > { %v1118_v30 = vpop.permute.xlu0 %1117 }
 0x1c9   : > { %v862_v11 = vpop.permute.xlu1 %861  ;;  %1154 = vst.msk [vmem:[#allocation3 + $0x60] sm:$0xff] %vm1141_vm9, %v1118_v30 }
 0x1ca   : > { %897 = vst.msk [vmem:[#allocation3 + $0x68] sm:$0xff] %vm883_vm7, %v862_v11 }
 0x1cc   : > { %v1247_v12 = vpop.permute.xlu0 %1246 }
 0x1cd   : > { %v991_v13 = vpop.permute.xlu1 %990  ;;  %1283 = vst.msk [vmem:[#allocation3 + $0x60] sm:$0xff] %vm1270_vm10, %v1247_v12 }
 0x1ce   : > { %1026 = vst.msk [vmem:[#allocation3 + $0x68] sm:$0xff] %vm1012_vm8, %v991_v13 }
 0x1d0   : > { %v1377_v60 = vpop.permute.xlu0 %1376 }
 0x1d1   : > { %v1120_v14 = vpop.permute.xlu1 %1119  ;;  %1413 = vst.msk [vmem:[#allocation3 + $0x60] sm:$0xff] %vm1400_vm11, %v1377_v60 }
 0x1d2   : > { %1155 = vst.msk [vmem:[#allocation3 + $0x68] sm:$0xff] %vm1141_vm9, %v1120_v14 }
 0x1d4   : > { %v1506_v16 = vpop.permute.xlu0 %1505 }
 0x1d5   : > { %v1249_v17 = vpop.permute.xlu1 %1248  ;;  %1542 = vst.msk [vmem:[#allocation3 + $0x60] sm:$0xff] %vm1529_vm12, %v1506_v16 }
 0x1d6   : > { %1284 = vst.msk [vmem:[#allocation3 + $0x68] sm:$0xff] %vm1270_vm10, %v1249_v17 }
 0x1d8   : > { %v1635_v18 = vpop.permute.xlu0 %1634 }
 0x1d9   : > { %v1379_v5 = vpop.permute.xlu1 %1378  ;;  %1671 = vst.msk [vmem:[#allocation3 + $0x60] sm:$0xff] %vm1658_vm13, %v1635_v18 }
 0x1da   : > { %1414 = vst.msk [vmem:[#allocation3 + $0x68] sm:$0xff] %vm1400_vm11, %v1379_v5 }
 0x1dc   : > { %v1637_v19 = vpop.permute.xlu0 %1636 }
 0x1dd   : > { %v1508_v21 = vpop.permute.xlu1 %1507 }
 0x1de   : > { %1543 = vst.msk [vmem:[#allocation3 + $0x68] sm:$0xff] %vm1529_vm12, %v1508_v21 }
 0x1df   : > { %1672 = vst.msk [vmem:[#allocation3 + $0x68] sm:$0xff] %vm1658_vm13, %v1637_v19 }
 0x1e0   : > { %v864_v0 = vpop.permute.xlu0 %863  ;;  %v1687_v35 = vld [vmem:[#allocation3 + $0x60] sm:$0xff] }
 0x1e1   : > { %v735_v22 = vpop.permute.xlu1 %734  ;;  %3674 = vmatprep.mubr.msk.bf16.mxu0 %vm1734_vm14, %v1687_v35 }
 0x1e2   : > { %769 = vst.msk [vmem:[#allocation3 + $0x70] sm:$0xff] %vm754_vm6, %v735_v22 }
 0x1e3   : > { %898 = vst.msk [vmem:[#allocation3 + $0x70] sm:$0xff] %vm883_vm7, %v864_v0 }
 0x1e4   : > { %v993_v23 = vpop.permute.xlu0 %992 }
 0x1e5   : > { %v737_v24 = vpop.permute.xlu1 %736  ;;  %1027 = vst.msk [vmem:[#allocation3 + $0x70] sm:$0xff] %vm1012_vm8, %v993_v23 }
 0x1e6   : > { %770 = vst.msk [vmem:[#allocation3 + $0x78] sm:$0xff] %vm754_vm6, %v737_v24  ;;  %v1688_v26 = vld [vmem:[#allocation3 + $0x68] sm:$0xff]  ;;  %vm2620_vm6 = vcmask 162944  }
 0x1e7   : > { %3675 = vmatmul.mubr.msk.bf16.gmra.mrb[24].mxu0 %vm1734_vm14, %v1688_v26 }
 0x1e8   : > { %v1122_v15 = vpop.permute.xlu0 %1121 }
 0x1e9   : > { %v866_v27 = vpop.permute.xlu1 %865  ;;  %1156 = vst.msk [vmem:[#allocation3 + $0x70] sm:$0xff] %vm1141_vm9, %v1122_v15 }
 0x1ea   : > { %899 = vst.msk [vmem:[#allocation3 + $0x78] sm:$0xff] %vm883_vm7, %v866_v27  ;;  %vm2749_vm7 = vcmask 195744  }
 0x1ec   : > { %v1251_v28 = vpop.permute.xlu0 %1250 }
 0x1ed   : > { %v995_v29 = vpop.permute.xlu1 %994  ;;  %1285 = vst.msk [vmem:[#allocation3 + $0x70] sm:$0xff] %vm1270_vm10, %v1251_v28 }
 0x1ee   : > { %1028 = vst.msk [vmem:[#allocation3 + $0x78] sm:$0xff] %vm1012_vm8, %v995_v29  ;;  %vm2879_vm8 = vcmask 228544  }
 0x1f0   : > { %v1381_v31 = vpop.permute.xlu0 %1380 }
 0x1f1   : > { %v1124_v32 = vpop.permute.xlu1 %1123  ;;  %1415 = vst.msk [vmem:[#allocation3 + $0x70] sm:$0xff] %vm1400_vm11, %v1381_v31 }
 0x1f2   : > { %1157 = vst.msk [vmem:[#allocation3 + $0x78] sm:$0xff] %vm1141_vm9, %v1124_v32  ;;  %vm3008_vm9 = vcmask 261344  }
 0x1f4   : > { %v1510_v36 = vpop.permute.xlu0 %1509 }
 0x1f5   : > { %v1253_v37 = vpop.permute.xlu1 %1252  ;;  %1544 = vst.msk [vmem:[#allocation3 + $0x70] sm:$0xff] %vm1529_vm12, %v1510_v36 }
 0x1f6   : > { %1286 = vst.msk [vmem:[#allocation3 + $0x78] sm:$0xff] %vm1270_vm10, %v1253_v37  ;;  %v3748_v37 = vld [vmem:[%s5066_s4] sm:$0xff]   ;;  %vm3137_vm10 = vcmask 294144  }
 0x1f7   : > { %3682 = vmatprep.subr.bf16.mxu1 %v3748_v37 }
 0x1f8   : > { %v1639_v39 = vpop.permute.xlu0 %1638  ;;  %3683 = vmatpush3.bf16.msra.mxu1 %v3748_v37 }
 0x1f9   : > { %v1383_v20 = vpop.permute.xlu1 %1382  ;;  %1673 = vst.msk [vmem:[#allocation3 + $0x70] sm:$0xff] %vm1658_vm13, %v1639_v39  ;;  %v3749_v39 = vld [vmem:[%s5066_s4 + $0x8] sm:$0xff]  }
 0x1fa   : > { %1416 = vst.msk [vmem:[#allocation3 + $0x78] sm:$0xff] %vm1400_vm11, %v1383_v20  ;;  %v3652_v40 = vpop.f32.mrb[0].mxu0  ;;  %3684 = vmatprep.subr.bf16.mxu1 %v3749_v39  ;;  %vm3197_vm11 = vcmask 293888  }
 0x1fb   : > { %v1830_v41 = vadd.f32 %v3652_v40, %v4535_v44  ;;  %v1821_v43 = vpop.f32.mrb[1].mxu0 }
 0x1fc   : > { %v1822_v45 = vadd.f32 %v4535_v44, %v1821_v43  ;;  %v3653_v46 = vpop.f32.mrb[2].mxu0  ;;  %v2187_v52 = vpop.permute.xlu0 %2186  ;;  %3685 = vmatpush3.bf16.msra.mxu1 %v3749_v39 }
 0x1fd   : > { %v1512_v47 = vpop.permute.xlu1 %1511  ;;  %v1950_v48 = vmax.f32 %v1830_v41, 0.0  ;;  %v1833_v49 = vadd.f32 %v3653_v46, %v4535_v44  ;;  %v1824_v50 = vpop.f32.mrb[3].mxu0  ;;  %2234 = vst.msk [vmem:[#allocation5] sm:$0xff] %vm545_vm4, %v2187_v52  ;;  %v3750_v41 = vld [vmem:[%s5066_s4 + $0x10] ss:$0 sps:$4 sm:$0x33]  }
 0x1fe   : > { %1545 = vst.msk [vmem:[#allocation3 + $0x78] sm:$0xff] %vm1529_vm12, %v1512_v47  ;;  %v1948_v42 = vmax.f32 %v1822_v45, 0.0  ;;  %v1825_v54 = vadd.f32 %v4535_v44, %v1824_v50  ;;  %3721 = vmatprep.subr.msk.bf16.mxu1 %vm3246_vm3, %v3750_v41  ;;  %v3248_v43 = vsel %vm3246_vm3, %v3750_v41, 0 }
 0x1ff   : > { %2028 = vst.msk [vmem:[#allocation4 + $0x31] sm:$0xff] %vm352_vm0, %v1950_v48  ;;  %v1951_v53 = vmax.f32 %v1833_v49, 0.0 }
 0x200   : > { %2026 = vst.msk [vmem:[#allocation4 + $0x19] sm:$0xff] %vm352_vm0, %v1948_v42  ;;  %v1949_v25 = vmax.f32 %v1825_v54, 0.0  ;;  %v1689_v56 = vld [vmem:[#allocation3 + $0x70] sm:$0xff]  ;;  %v2315_v58 = vpop.permute.xlu0 %2314  ;;  %3687 = vmatpush3.bf16.msra.mxu1 %v3248_v43 }
 0x201   : > { %v1641_v55 = vpop.permute.xlu1 %1640  ;;  %2029 = vst.msk [vmem:[#allocation4 + $0x39] sm:$0xff] %vm352_vm0, %v1951_v53  ;;  %3678 = vmatprep.mubr.msk.bf16.mxu0 %vm1734_vm14, %v1689_v56 }
 0x202   : > { %1674 = vst.msk [vmem:[#allocation3 + $0x78] sm:$0xff] %vm1658_vm13, %v1641_v55 }
 0x203   : > { %2027 = vst.msk [vmem:[#allocation4 + $0x21] sm:$0xff] %vm352_vm0, %v1949_v25 }
 0x204   : > { %2363 = vst.msk [vmem:[#allocation5] sm:$0xff] %vm2362_vm2, %v2315_v58 }
 0x206   : > { %v2767_v61 = vld [vmem:[#allocation4 + $0x30] sm:$0xff] }
 0x207   : > { %v2379_v1 = vld [vmem:[#allocation4 + $0x18] sm:$0xff] }
 0x208   : > { %v2768_v62 = vld [vmem:[#allocation4 + $0x38] sm:$0xff] }
 0x209   : > { %v1690_v59 = vld [vmem:[#allocation3 + $0x78] sm:$0xff]  ;;  %v2799_v63 = vpack.c.bf16 %v2768_v62, %v2767_v61 }
 0x20a   : > { %3679 = vmatmul.mubr.msk.bf16.gmra.mrb[28].mxu0 %vm1734_vm14, %v1690_v59  ;;  %v2380_v2 = vld [vmem:[#allocation4 + $0x20] sm:$0xff]  ;;  %v2896_v6 = vld [vmem:[#allocation4 + $0x31] sm:$0xff] }
 0x20b   : > { %v2897_v3 = vld [vmem:[#allocation4 + $0x39] sm:$0xff]  ;;  %v2411_v4 = vpack.c.bf16 %v2380_v2, %v2379_v1  ;;  %2831 = vrot.lane.b32.xlu0 %v2799_v63, %s3763_s12  ;;  %2445 = vrot.lane.b32.xlu1 %v2799_v63, %s3769_s7  ;;  %2108 = vst.msk [vmem:[#allocation5 + $0x10] sm:$0xff] %vm352_vm0, %v2799_v63  ;;  %v2125_v10 = vld [vmem:[#allocation4 + $0x21] sm:$0xff] }
 0x20c   : > { %v2928_v7 = vpack.c.bf16 %v2897_v3, %v2896_v6  ;;  %v3025_v51 = vld [vmem:[#allocation4 + $0x32] sm:$0xff]  ;;  %v3026_v8 = vld [vmem:[#allocation4 + $0x3a] sm:$0xff]  ;;  %v2253_v13 = vld [vmem:[#allocation4 + $0x22] sm:$0xff] }
 0x20d   : > { %2107 = vst.msk [vmem:[#allocation5 + $0x8] sm:$0xff] %vm352_vm0, %v2411_v4  ;;  %v3057_v9 = vpack.c.bf16 %v3026_v8, %v3025_v51  ;;  %v2124_v57 = vld [vmem:[#allocation4 + $0x19] sm:$0xff] }
 0x20e   : > { %v2155_v30 = vpack.c.bf16 %v2125_v10, %v2124_v57  ;;  %v2252_v12 = vld [vmem:[#allocation4 + $0x1a] sm:$0xff] }
 0x20f   : > { %2960 = vrot.lane.b32.xlu0 %v2928_v7, %s3770_s10  ;;  %2574 = vrot.lane.b32.xlu1 %v2928_v7, %s3762_s9  ;;  %v2283_v21 = vpack.c.bf16 %v2253_v13, %v2252_v12 }
 0x213   : > { %3089 = vrot.lane.b32.xlu0 %v3057_v9, %s3764_s15  ;;  %2703 = vrot.lane.b32.xlu1 %v3057_v9, %s3771_s11 }
 0x217   : > { %2318 = vrot.lane.b32.xlu0 %v3057_v9, %s3761_s8  ;;  %2190 = vrot.lane.b32.xlu1 %v2928_v7, %s3760_s28 }
 0x21a   : > { %v3656_v11 = vpop.f32.mrb[4].mxu0 }
 0x21b   : > { %v1846_v60 = vadd.f32 %v3656_v11, %v4535_v44  ;;  %v1837_v14 = vpop.f32.mrb[5].mxu0  ;;  %2443 = vrot.lane.b32.xlu0 %v2411_v4, %s3769_s7  ;;  %2188 = vrot.lane.b32.xlu1 %v2155_v30, %s3760_s28 }
 0x21c   : > { %v1838_v16 = vadd.f32 %v4535_v44, %v1837_v14  ;;  %v3657_v17 = vpop.f32.mrb[6].mxu0 }
 0x21d   : > { %v1954_v18 = vmax.f32 %v1846_v60, 0.0  ;;  %v1849_v5 = vadd.f32 %v3657_v17, %v4535_v44  ;;  %v1840_v19 = vpop.f32.mrb[7].mxu0 }
 0x21e   : > { %v1952_v0 = vmax.f32 %v1838_v16, 0.0  ;;  %v1841_v22 = vadd.f32 %v4535_v44, %v1840_v19 }
 0x21f   : > { %2032 = vst.msk [vmem:[#allocation4 + $0x61] sm:$0xff] %vm352_vm0, %v1954_v18  ;;  %v1955_v35 = vmax.f32 %v1849_v5, 0.0  ;;  %2572 = vrot.lane.b32.xlu0 %v2155_v30, %s3762_s9  ;;  %2316 = vrot.lane.b32.xlu1 %v2283_v21, %s3761_s8 }
 0x220   : > { %2030 = vst.msk [vmem:[#allocation4 + $0x49] sm:$0xff] %vm352_vm0, %v1952_v0  ;;  %v1953_v23 = vmax.f32 %v1841_v22, 0.0 }
 0x221   : > { %2033 = vst.msk [vmem:[#allocation4 + $0x69] sm:$0xff] %vm352_vm0, %v1955_v35 }
 0x222   : > { %2031 = vst.msk [vmem:[#allocation4 + $0x51] sm:$0xff] %vm352_vm0, %v1953_v23 }
 0x223   : > { %2701 = vrot.lane.b32.xlu0 %v2283_v21, %s3771_s11 }
 0x226   : > { %v2771_v24 = vld [vmem:[#allocation4 + $0x60] sm:$0xff] }
 0x227   : > { %v2769_v28 = vld [vmem:[#allocation4 + $0x48] sm:$0xff] }
 0x228   : > { %v2772_v26 = vld [vmem:[#allocation4 + $0x68] sm:$0xff] }
 0x229   : > { %v2801_v15 = vpack.c.bf16 %v2772_v26, %v2771_v24  ;;  %v2901_v27 = vld [vmem:[#allocation4 + $0x69] sm:$0xff]  ;;  %v2900_v32 = vld [vmem:[#allocation4 + $0x61] sm:$0xff]  ;;  %v3028_v40 = vld [vmem:[#allocation4 + $0x52] sm:$0xff] }
 0x22a   : > { %v2770_v29 = vld [vmem:[#allocation4 + $0x50] sm:$0xff]  ;;  %v2930_v33 = vpack.c.bf16 %v2901_v27, %v2900_v32  ;;  %v3029_v34 = vld [vmem:[#allocation4 + $0x62] sm:$0xff] }
 0x22b   : > { %2835 = vrot.lane.b32.xlu0 %v2801_v15, %s3763_s12  ;;  %2449 = vrot.lane.b32.xlu1 %v2801_v15, %s3769_s7  ;;  %v2800_v31 = vpack.c.bf16 %v2770_v29, %v2769_v28  ;;  %2110 = vst.msk [vmem:[#allocation5 + $0x20] sm:$0xff] %vm352_vm0, %v2801_v15  ;;  %v3030_v36 = vld [vmem:[#allocation4 + $0x6a] sm:$0xff] }
 0x22c   : > { %v3059_v38 = vpack.c.bf16 %v3030_v36, %v3029_v34  ;;  %v3027_v20 = vld [vmem:[#allocation4 + $0x4a] sm:$0xff] }
 0x22d   : > { %2109 = vst.msk [vmem:[#allocation5 + $0x18] sm:$0xff] %vm352_vm0, %v2800_v31  ;;  %v3058_v45 = vpack.c.bf16 %v3028_v40, %v3027_v20  ;;  %v2899_v47 = vld [vmem:[#allocation4 + $0x51] sm:$0xff]  ;;  %v2898_v42 = vld [vmem:[#allocation4 + $0x49] sm:$0xff] }
 0x22e   : > { %v2929_v55 = vpack.c.bf16 %v2899_v47, %v2898_v42 }
 0x22f   : > { %2964 = vrot.lane.b32.xlu0 %v2930_v33, %s3770_s10  ;;  %2578 = vrot.lane.b32.xlu1 %v2930_v33, %s3762_s9 }
 0x233   : > { %3093 = vrot.lane.b32.xlu0 %v3059_v38, %s3764_s15  ;;  %2707 = vrot.lane.b32.xlu1 %v3059_v38, %s3771_s11 }
 0x237   : > { %2322 = vrot.lane.b32.xlu0 %v3059_v38, %s3761_s8  ;;  %2194 = vrot.lane.b32.xlu1 %v2930_v33, %s3760_s28 }
 0x23a   : > { %v3660_v46 = vpop.f32.mrb[8].mxu0 }
 0x23b   : > { %v1862_v48 = vadd.f32 %v3660_v46, %v4535_v44  ;;  %v1853_v49 = vpop.f32.mrb[9].mxu0  ;;  %3091 = vrot.lane.b32.xlu0 %v3058_v45, %s3764_s15  ;;  %2833 = vrot.lane.b32.xlu1 %v2800_v31, %s3763_s12 }
 0x23c   : > { %v1854_v50 = vadd.f32 %v4535_v44, %v1853_v49  ;;  %v3661_v52 = vpop.f32.mrb[10].mxu0 }
 0x23d   : > { %v1958_v54 = vmax.f32 %v1862_v48, 0.0  ;;  %v1865_v53 = vadd.f32 %v3661_v52, %v4535_v44  ;;  %v1856_v25 = vpop.f32.mrb[11].mxu0 }
 0x23e   : > { %v1956_v56 = vmax.f32 %v1854_v50, 0.0  ;;  %v1857_v58 = vadd.f32 %v4535_v44, %v1856_v25 }
 0x23f   : > { %2036 = vst.msk [vmem:[#allocation4 + $0x91] sm:$0xff] %vm352_vm0, %v1958_v54  ;;  %v1959_v59 = vmax.f32 %v1865_v53, 0.0  ;;  %2447 = vrot.lane.b32.xlu0 %v2800_v31, %s3769_s7  ;;  %2962 = vrot.lane.b32.xlu1 %v2929_v55, %s3770_s10 }
 0x240   : > { %2034 = vst.msk [vmem:[#allocation4 + $0x79] sm:$0xff] %vm352_vm0, %v1956_v56  ;;  %v1957_v61 = vmax.f32 %v1857_v58, 0.0 }
 0x241   : > { %2037 = vst.msk [vmem:[#allocation4 + $0x99] sm:$0xff] %vm352_vm0, %v1959_v59 }
 0x242   : > { %2035 = vst.msk [vmem:[#allocation4 + $0x81] sm:$0xff] %vm352_vm0, %v1957_v61 }
 0x243   : > { %2576 = vrot.lane.b32.xlu0 %v2929_v55, %s3762_s9  ;;  %2192 = vrot.lane.b32.xlu1 %v2929_v55, %s3760_s28 }
 0x246   : > { %v2775_v62 = vld [vmem:[#allocation4 + $0x90] sm:$0xff] }
 0x247   : > { %2705 = vrot.lane.b32.xlu0 %v3058_v45, %s3771_s11  ;;  %2320 = vrot.lane.b32.xlu1 %v3058_v45, %s3761_s8  ;;  %v2773_v3 = vld [vmem:[#allocation4 + $0x78] sm:$0xff] }
 0x248   : > { %v2776_v63 = vld [vmem:[#allocation4 + $0x98] sm:$0xff] }
 0x249   : > { %v2803_v1 = vpack.c.bf16 %v2776_v63, %v2775_v62  ;;  %v2905_v2 = vld [vmem:[#allocation4 + $0x99] sm:$0xff]  ;;  %v2904_v7 = vld [vmem:[#allocation4 + $0x91] sm:$0xff]  ;;  %v3032_v30 = vld [vmem:[#allocation4 + $0x82] sm:$0xff] }
 0x24a   : > { %v2774_v4 = vld [vmem:[#allocation4 + $0x80] sm:$0xff]  ;;  %v2932_v51 = vpack.c.bf16 %v2905_v2, %v2904_v7  ;;  %v3033_v8 = vld [vmem:[#allocation4 + $0x92] sm:$0xff] }
 0x24b   : > { %2839 = vrot.lane.b32.xlu0 %v2803_v1, %s3763_s12  ;;  %2453 = vrot.lane.b32.xlu1 %v2803_v1, %s3769_s7  ;;  %v2802_v6 = vpack.c.bf16 %v2774_v4, %v2773_v3  ;;  %2112 = vst.msk [vmem:[#allocation5 + $0x30] sm:$0xff] %vm352_vm0, %v2803_v1  ;;  %v3034_v9 = vld [vmem:[#allocation4 + $0x9a] sm:$0xff] }
 0x24c   : > { %v3061_v10 = vpack.c.bf16 %v3034_v9, %v3033_v8  ;;  %v3031_v57 = vld [vmem:[#allocation4 + $0x7a] sm:$0xff] }
 0x24d   : > { %2111 = vst.msk [vmem:[#allocation5 + $0x28] sm:$0xff] %vm352_vm0, %v2802_v6  ;;  %v3060_v11 = vpack.c.bf16 %v3032_v30, %v3031_v57  ;;  %v2903_v13 = vld [vmem:[#allocation4 + $0x81] sm:$0xff]  ;;  %v2902_v18 = vld [vmem:[#allocation4 + $0x79] sm:$0xff] }
 0x24e   : > { %v2931_v0 = vpack.c.bf16 %v2903_v13, %v2902_v18 }
 0x24f   : > { %2968 = vrot.lane.b32.xlu0 %v2932_v51, %s3770_s10  ;;  %2582 = vrot.lane.b32.xlu1 %v2932_v51, %s3762_s9 }
 0x253   : > { %3097 = vrot.lane.b32.xlu0 %v3061_v10, %s3764_s15  ;;  %2711 = vrot.lane.b32.xlu1 %v3061_v10, %s3771_s11 }
 0x257   : > { %2326 = vrot.lane.b32.xlu0 %v3061_v10, %s3761_s8  ;;  %2198 = vrot.lane.b32.xlu1 %v2932_v51, %s3760_s28 }
 0x25a   : > { %v3664_v12 = vpop.f32.mrb[12].mxu0 }
 0x25b   : > { %v1878_v60 = vadd.f32 %v3664_v12, %v4535_v44  ;;  %v1869_v14 = vpop.f32.mrb[13].mxu0  ;;  %3095 = vrot.lane.b32.xlu0 %v3060_v11, %s3764_s15  ;;  %2837 = vrot.lane.b32.xlu1 %v2802_v6, %s3763_s12 }
 0x25c   : > { %v1870_v16 = vadd.f32 %v4535_v44, %v1869_v14  ;;  %v3665_v17 = vpop.f32.mrb[14].mxu0 }
 0x25d   : > { %v1962_v5 = vmax.f32 %v1878_v60, 0.0  ;;  %v1881_v19 = vadd.f32 %v3665_v17, %v4535_v44  ;;  %v1872_v21 = vpop.f32.mrb[15].mxu0 }
 0x25e   : > { %v1960_v22 = vmax.f32 %v1870_v16, 0.0  ;;  %v1873_v35 = vadd.f32 %v4535_v44, %v1872_v21 }
 0x25f   : > { %2040 = vst.msk [vmem:[#allocation4 + $0xc1] sm:$0xff] %vm352_vm0, %v1962_v5  ;;  %v1963_v23 = vmax.f32 %v1881_v19, 0.0  ;;  %2451 = vrot.lane.b32.xlu0 %v2802_v6, %s3769_s7  ;;  %2966 = vrot.lane.b32.xlu1 %v2931_v0, %s3770_s10 }
 0x260   : > { %2038 = vst.msk [vmem:[#allocation4 + $0xa9] sm:$0xff] %vm352_vm0, %v1960_v22  ;;  %v1961_v24 = vmax.f32 %v1873_v35, 0.0 }
 0x261   : > { %2041 = vst.msk [vmem:[#allocation4 + $0xc9] sm:$0xff] %vm352_vm0, %v1963_v23 }
 0x262   : > { %2039 = vst.msk [vmem:[#allocation4 + $0xb1] sm:$0xff] %vm352_vm0, %v1961_v24 }
 0x263   : > { %2580 = vrot.lane.b32.xlu0 %v2931_v0, %s3762_s9  ;;  %2196 = vrot.lane.b32.xlu1 %v2931_v0, %s3760_s28 }
 0x266   : > { %v2779_v26 = vld [vmem:[#allocation4 + $0xc0] sm:$0xff] }
 0x267   : > { %2709 = vrot.lane.b32.xlu0 %v3060_v11, %s3771_s11  ;;  %2324 = vrot.lane.b32.xlu1 %v3060_v11, %s3761_s8  ;;  %v2777_v29 = vld [vmem:[#allocation4 + $0xa8] sm:$0xff] }
 0x268   : > { %v2780_v15 = vld [vmem:[#allocation4 + $0xc8] sm:$0xff] }
 0x269   : > { %v2805_v27 = vpack.c.bf16 %v2780_v15, %v2779_v26  ;;  %v2909_v28 = vld [vmem:[#allocation4 + $0xc9] sm:$0xff]  ;;  %v2908_v33 = vld [vmem:[#allocation4 + $0xc1] sm:$0xff]  ;;  %v3036_v20 = vld [vmem:[#allocation4 + $0xb2] sm:$0xff] }
 0x26a   : > { %v2778_v31 = vld [vmem:[#allocation4 + $0xb0] sm:$0xff]  ;;  %v2934_v34 = vpack.c.bf16 %v2909_v28, %v2908_v33  ;;  %v3037_v36 = vld [vmem:[#allocation4 + $0xc2] sm:$0xff] }
 0x26b   : > { %2843 = vrot.lane.b32.xlu0 %v2805_v27, %s3763_s12  ;;  %2457 = vrot.lane.b32.xlu1 %v2805_v27, %s3769_s7  ;;  %v2804_v32 = vpack.c.bf16 %v2778_v31, %v2777_v29  ;;  %2114 = vst.msk [vmem:[#allocation5 + $0x40] sm:$0xff] %vm352_vm0, %v2805_v27  ;;  %v3038_v37 = vld [vmem:[#allocation4 + $0xca] sm:$0xff] }
 0x26c   : > { %v3063_v38 = vpack.c.bf16 %v3038_v37, %v3037_v36  ;;  %v3035_v39 = vld [vmem:[#allocation4 + $0xaa] sm:$0xff] }
 0x26d   : > { %2113 = vst.msk [vmem:[#allocation5 + $0x38] sm:$0xff] %vm352_vm0, %v2804_v32  ;;  %v3062_v41 = vpack.c.bf16 %v3036_v20, %v3035_v39  ;;  %v2907_v46 = vld [vmem:[#allocation4 + $0xb1] sm:$0xff]  ;;  %v2906_v42 = vld [vmem:[#allocation4 + $0xa9] sm:$0xff] }
 0x26e   : > { %v2933_v56 = vpack.c.bf16 %v2907_v46, %v2906_v42 }
 0x26f   : > { %2972 = vrot.lane.b32.xlu0 %v2934_v34, %s3770_s10  ;;  %2586 = vrot.lane.b32.xlu1 %v2934_v34, %s3762_s9 }
 0x273   : > { %3101 = vrot.lane.b32.xlu0 %v3063_v38, %s3764_s15  ;;  %2715 = vrot.lane.b32.xlu1 %v3063_v38, %s3771_s11 }
 0x277   : > { %2330 = vrot.lane.b32.xlu0 %v3063_v38, %s3761_s8  ;;  %2202 = vrot.lane.b32.xlu1 %v2934_v34, %s3760_s28 }
 0x27a   : > { %v3668_v40 = vpop.f32.mrb[16].mxu0 }
 0x27b   : > { %v1894_v43 = vadd.f32 %v3668_v40, %v4535_v44  ;;  %v1885_v45 = vpop.f32.mrb[17].mxu0  ;;  %3099 = vrot.lane.b32.xlu0 %v3062_v41, %s3764_s15  ;;  %2841 = vrot.lane.b32.xlu1 %v2804_v32, %s3763_s12 }
 0x27c   : > { %v1886_v47 = vadd.f32 %v4535_v44, %v1885_v45  ;;  %v3669_v48 = vpop.f32.mrb[18].mxu0 }
 0x27d   : > { %v1966_v49 = vmax.f32 %v1894_v43, 0.0  ;;  %v1897_v50 = vadd.f32 %v3669_v48, %v4535_v44  ;;  %v1888_v52 = vpop.f32.mrb[19].mxu0  ;;  %v4652_v53 = vpop.permute.xlu0 %2831 }
 0x27e   : > { %v1964_v54 = vmax.f32 %v1886_v47, 0.0  ;;  %v2446_v25 = vpop.permute.xlu1 %2445  ;;  %v1889_v55 = vadd.f32 %v4535_v44, %v1888_v52 }
 0x27f   : > { %2044 = vst.msk [vmem:[#allocation4 + $0xf1] sm:$0xff] %vm352_vm0, %v1966_v49  ;;  %v1967_v58 = vmax.f32 %v1897_v50, 0.0  ;;  %2455 = vrot.lane.b32.xlu0 %v2804_v32, %s3769_s7  ;;  %2970 = vrot.lane.b32.xlu1 %v2933_v56, %s3770_s10 }
 0x280   : > { %2042 = vst.msk [vmem:[#allocation4 + $0xd9] sm:$0xff] %vm352_vm0, %v1964_v54  ;;  %v1965_v59 = vmax.f32 %v1889_v55, 0.0 }
 0x281   : > { %2045 = vst.msk [vmem:[#allocation4 + $0xf9] sm:$0xff] %vm352_vm0, %v1967_v58  ;;  %v2961_v61 = vpop.permute.xlu0 %2960 }
 0x282   : > { %2043 = vst.msk [vmem:[#allocation4 + $0xe1] sm:$0xff] %vm352_vm0, %v1965_v59  ;;  %v2575_v62 = vpop.permute.xlu1 %2574 }
 0x283   : > { %2584 = vrot.lane.b32.xlu0 %v2933_v56, %s3762_s9  ;;  %2200 = vrot.lane.b32.xlu1 %v2933_v56, %s3760_s28 }
 0x285   : > { %v3090_v63 = vpop.permute.xlu0 %3089 }
 0x286   : > { %v2704_v1 = vpop.permute.xlu1 %2703  ;;  %v2783_v2 = vld [vmem:[#allocation4 + $0xf0] sm:$0xff] }
 0x287   : > { %2713 = vrot.lane.b32.xlu0 %v3062_v41, %s3771_s11  ;;  %2328 = vrot.lane.b32.xlu1 %v3062_v41, %s3761_s8  ;;  %v2781_v51 = vld [vmem:[#allocation4 + $0xd8] sm:$0xff] }
 0x288   : > { %v2784_v3 = vld [vmem:[#allocation4 + $0xf8] sm:$0xff] }
 0x289   : > { %v2807_v4 = vpack.c.bf16 %v2784_v3, %v2783_v2  ;;  %v2319_v6 = vpop.permute.xlu0 %2318  ;;  %v2782_v8 = vld [vmem:[#allocation4 + $0xe0] sm:$0xff]  ;;  %v2912_v57 = vld [vmem:[#allocation4 + $0xf1] sm:$0xff] }
 0x28a   : > { %v2191_v7 = vpop.permute.xlu1 %2190  ;;  %v2913_v9 = vld [vmem:[#allocation4 + $0xf9] sm:$0xff]  ;;  %v4666_v10 = vpack.c.bf16 %v2782_v8, %v2781_v51  ;;  %v3040_v19 = vld [vmem:[#allocation4 + $0xe2] sm:$0xff] }
 0x28b   : > { %2236 = vst.msk [vmem:[#allocation5 + $0x10] sm:$0xff] %vm545_vm4, %v2191_v7  ;;  %2847 = vrot.lane.b32.xlu0 %v2807_v4, %s3763_s12  ;;  %2461 = vrot.lane.b32.xlu1 %v2807_v4, %s3769_s7  ;;  %v2936_v12 = vpack.c.bf16 %v2913_v9, %v2912_v57  ;;  %v3041_v13 = vld [vmem:[#allocation4 + $0xf2] sm:$0xff]  ;;  %v3042_v60 = vld [vmem:[#allocation4 + $0xfa] sm:$0xff] }
 0x28c   : > { %2116 = vst.msk [vmem:[#allocation5 + $0x50] sm:$0xff] %vm352_vm0, %v2807_v4  ;;  %2115 = vst.msk [vmem:[#allocation5 + $0x48] sm:$0xff] %vm352_vm0, %v4666_v10  ;;  %v3065_v17 = vpack.c.bf16 %v3042_v60, %v3041_v13  ;;  %v3039_v5 = vld [vmem:[#allocation4 + $0xda] sm:$0xff] }
 0x28d   : > { %2365 = vst.msk [vmem:[#allocation5 + $0x10] sm:$0xff] %vm2362_vm2, %v2319_v6  ;;  %v2444_v30 = vpop.permute.xlu0 %2443  ;;  %v3064_v0 = vpack.c.bf16 %v3040_v19, %v3039_v5  ;;  %v2911_v23 = vld [vmem:[#allocation4 + $0xe1] sm:$0xff]  ;;  %v2910_v29 = vld [vmem:[#allocation4 + $0xd9] sm:$0xff] }
 0x28e   : > { %v2189_v11 = vpop.permute.xlu1 %2188  ;;  %2492 = vst.msk [vmem:[#allocation5] sm:$0xff] %vm2491_vm5, %v2444_v30  ;;  %v2935_v36 = vpack.c.bf16 %v2911_v23, %v2910_v29 }
 0x28f   : > { %2235 = vst.msk [vmem:[#allocation5 + $0x8] sm:$0xff] %vm545_vm4, %v2189_v11  ;;  %2976 = vrot.lane.b32.xlu0 %v2936_v12, %s3770_s10  ;;  %2590 = vrot.lane.b32.xlu1 %v2936_v12, %s3762_s9 }
 0x291   : > { %v2573_v14 = vpop.permute.xlu0 %2572 }
 0x292   : > { %v2317_v16 = vpop.permute.xlu1 %2316  ;;  %2621 = vst.msk [vmem:[#allocation5] sm:$0xff] %vm2620_vm6, %v2573_v14 }
 0x293   : > { %2364 = vst.msk [vmem:[#allocation5 + $0x8] sm:$0xff] %vm2362_vm2, %v2317_v16  ;;  %3105 = vrot.lane.b32.xlu0 %v3065_v17, %s3764_s15  ;;  %2719 = vrot.lane.b32.xlu1 %v3065_v17, %s3771_s11 }
 0x294   : > { %2493 = vst.msk [vmem:[#allocation5 + $0x8] sm:$0xff] %vm2491_vm5, %v2446_v25 }
 0x295   : > { %2622 = vst.msk [vmem:[#allocation5 + $0x8] sm:$0xff] %vm2620_vm6, %v2575_v62  ;;  %v2702_v18 = vpop.permute.xlu0 %2701 }
 0x296   : > { %2751 = vst.msk [vmem:[#allocation5 + $0x8] sm:$0xff] %vm2749_vm7, %v2704_v1  ;;  %2750 = vst.msk [vmem:[#allocation5] sm:$0xff] %vm2749_vm7, %v2702_v18 }
 0x297   : > { %2880 = vst.msk [vmem:[#allocation5] sm:$0xff] %vm2879_vm8, %v4652_v53  ;;  %2334 = vrot.lane.b32.xlu0 %v3065_v17, %s3761_s8  ;;  %2206 = vrot.lane.b32.xlu1 %v2936_v12, %s3760_s28 }
 0x298   : > { %3009 = vst.msk [vmem:[#allocation5] sm:$0xff] %vm3008_vm9, %v2961_v61 }
 0x299   : > { %3138 = vst.msk [vmem:[#allocation5] sm:$0xff] %vm3137_vm10, %v3090_v63 }
 0x29a   : > { %v3672_v21 = vpop.f32.mrb[20].mxu0 }
 0x29b   : > { %v1910_v22 = vadd.f32 %v3672_v21, %v4535_v44  ;;  %v1901_v35 = vpop.f32.mrb[21].mxu0  ;;  %3103 = vrot.lane.b32.xlu0 %v3064_v0, %s3764_s15  ;;  %2845 = vrot.lane.b32.xlu1 %v4666_v10, %s3763_s12 }
 0x29c   : > { %v1902_v24 = vadd.f32 %v4535_v44, %v1901_v35  ;;  %v3673_v26 = vpop.f32.mrb[22].mxu0 }
 0x29d   : > { %v1970_v15 = vmax.f32 %v1910_v22, 0.0  ;;  %v1913_v27 = vadd.f32 %v3673_v26, %v4535_v44  ;;  %v1904_v28 = vpop.f32.mrb[23].mxu0  ;;  %v4699_v33 = vpop.permute.xlu0 %2835 }
 0x29e   : > { %v1968_v31 = vmax.f32 %v1902_v24, 0.0  ;;  %v1905_v32 = vadd.f32 %v4535_v44, %v1904_v28  ;;  %v4701_v34 = vpop.permute.xlu1 %2449 }
 0x29f   : > { %2048 = vst.msk [vmem:[#allocation4 + $0x121] sm:$0xff] %vm352_vm0, %v1970_v15  ;;  %v1971_v37 = vmax.f32 %v1913_v27, 0.0  ;;  %2459 = vrot.lane.b32.xlu0 %v4666_v10, %s3769_s7  ;;  %2974 = vrot.lane.b32.xlu1 %v2935_v36, %s3770_s10 }
 0x2a0   : > { %2046 = vst.msk [vmem:[#allocation4 + $0x109] sm:$0xff] %vm352_vm0, %v1968_v31  ;;  %v1969_v38 = vmax.f32 %v1905_v32, 0.0  ;;  %v3154_v39 = vld [vmem:[#allocation5] sm:$0xff] }
 0x2a1   : > { %2049 = vst.msk [vmem:[#allocation4 + $0x129] sm:$0xff] %vm352_vm0, %v1971_v37  ;;  %3688 = vmatprep.mubr.msk.bf16.mxu1 %vm3197_vm11, %v3154_v39  ;;  %v2965_v20 = vpop.permute.xlu0 %2964 }
 0x2a2   : > { %2047 = vst.msk [vmem:[#allocation4 + $0x111] sm:$0xff] %vm352_vm0, %v1969_v38  ;;  %v2579_v40 = vpop.permute.xlu1 %2578 }
 0x2a3   : > { %2588 = vrot.lane.b32.xlu0 %v2935_v36, %s3762_s9  ;;  %2204 = vrot.lane.b32.xlu1 %v2935_v36, %s3760_s28 }
 0x2a5   : > { %v4713_v41 = vpop.permute.xlu0 %3093 }
 0x2a6   : > { %v4715_v43 = vpop.permute.xlu1 %2707  ;;  %v2787_v45 = vld [vmem:[#allocation4 + $0x120] sm:$0xff] }
 0x2a7   : > { %2717 = vrot.lane.b32.xlu0 %v3064_v0, %s3771_s11  ;;  %2332 = vrot.lane.b32.xlu1 %v3064_v0, %s3761_s8  ;;  %v2785_v50 = vld [vmem:[#allocation4 + $0x108] sm:$0xff] }
 0x2a8   : > { %v2788_v46 = vld [vmem:[#allocation4 + $0x128] sm:$0xff] }
 0x2a9   : > { %v2809_v47 = vpack.c.bf16 %v2788_v46, %v2787_v45  ;;  %v2323_v48 = vpop.permute.xlu0 %2322  ;;  %v2786_v52 = vld [vmem:[#allocation4 + $0x110] sm:$0xff]  ;;  %v2916_v53 = vld [vmem:[#allocation4 + $0x121] sm:$0xff] }
 0x2aa   : > { %v2195_v49 = vpop.permute.xlu1 %2194  ;;  %v2917_v42 = vld [vmem:[#allocation4 + $0x129] sm:$0xff]  ;;  %v2808_v54 = vpack.c.bf16 %v2786_v52, %v2785_v50  ;;  %v3044_v4 = vld [vmem:[#allocation4 + $0x112] sm:$0xff] }
 0x2ab   : > { %2238 = vst.msk [vmem:[#allocation5 + $0x20] sm:$0xff] %vm545_vm4, %v2195_v49  ;;  %2851 = vrot.lane.b32.xlu0 %v2809_v47, %s3763_s12  ;;  %2465 = vrot.lane.b32.xlu1 %v2809_v47, %s3769_s7  ;;  %v2938_v56 = vpack.c.bf16 %v2917_v42, %v2916_v53  ;;  %v3045_v58 = vld [vmem:[#allocation4 + $0x122] sm:$0xff]  ;;  %v3046_v59 = vld [vmem:[#allocation4 + $0x12a] sm:$0xff] }
 0x2ac   : > { %2118 = vst.msk [vmem:[#allocation5 + $0x60] sm:$0xff] %vm352_vm0, %v2809_v47  ;;  %2117 = vst.msk [vmem:[#allocation5 + $0x58] sm:$0xff] %vm352_vm0, %v2808_v54  ;;  %v3067_v63 = vpack.c.bf16 %v3046_v59, %v3045_v58  ;;  %v3043_v3 = vld [vmem:[#allocation4 + $0x10a] sm:$0xff] }
 0x2ad   : > { %2367 = vst.msk [vmem:[#allocation5 + $0x20] sm:$0xff] %vm2362_vm2, %v2323_v48  ;;  %v3092_v25 = vpop.permute.xlu0 %3091  ;;  %v3066_v51 = vpack.c.bf16 %v3044_v4, %v3043_v3  ;;  %v2915_v10 = vld [vmem:[#allocation4 + $0x111] sm:$0xff]  ;;  %v2914_v13 = vld [vmem:[#allocation4 + $0x109] sm:$0xff] }
 0x2ae   : > { %v2834_v55 = vpop.permute.xlu1 %2833  ;;  %v2937_v18 = vpack.c.bf16 %v2915_v10, %v2914_v13 }
 0x2af   : > { %2881 = vst.msk [vmem:[#allocation5 + $0x8] sm:$0xff] %vm2879_vm8, %v2834_v55  ;;  %2980 = vrot.lane.b32.xlu0 %v2938_v56, %s3770_s10  ;;  %2594 = vrot.lane.b32.xlu1 %v2938_v56, %s3762_s9 }
 0x2b1   : > { %v2448_v61 = vpop.permute.xlu0 %2447 }
 0x2b2   : > { %v2963_v62 = vpop.permute.xlu1 %2962  ;;  %2494 = vst.msk [vmem:[#allocation5 + $0x10] sm:$0xff] %vm2491_vm5, %v2448_v61 }
 0x2b3   : > { %3010 = vst.msk [vmem:[#allocation5 + $0x8] sm:$0xff] %vm3008_vm9, %v2963_v62  ;;  %3109 = vrot.lane.b32.xlu0 %v3067_v63, %s3764_s15  ;;  %2723 = vrot.lane.b32.xlu1 %v3067_v63, %s3771_s11 }
 0x2b4   : > { %3139 = vst.msk [vmem:[#allocation5 + $0x8] sm:$0xff] %vm3137_vm10, %v3092_v25 }
 0x2b5   : > { %v2577_v1 = vpop.permute.xlu0 %2576 }
 0x2b6   : > { %v2193_v2 = vpop.permute.xlu1 %2192  ;;  %2623 = vst.msk [vmem:[#allocation5 + $0x10] sm:$0xff] %vm2620_vm6, %v2577_v1 }
 0x2b7   : > { %2237 = vst.msk [vmem:[#allocation5 + $0x18] sm:$0xff] %vm545_vm4, %v2193_v2  ;;  %2338 = vrot.lane.b32.xlu0 %v3067_v63, %s3761_s8  ;;  %2210 = vrot.lane.b32.xlu1 %v2938_v56, %s3760_s28 }
 0x2b9   : > { %v2706_v6 = vpop.permute.xlu0 %2705 }
 0x2ba   : > { %v2321_v7 = vpop.permute.xlu1 %2320  ;;  %2752 = vst.msk [vmem:[#allocation5 + $0x10] sm:$0xff] %vm2749_vm7, %v2706_v6  ;;  %v3676_v8 = vpop.f32.mrb[24].mxu0 }
 0x2bb   : > { %2366 = vst.msk [vmem:[#allocation5 + $0x18] sm:$0xff] %vm2362_vm2, %v2321_v7  ;;  %v3155_v9 = vld [vmem:[#allocation5 + $0x8] sm:$0xff]  ;;  %v1926_v57 = vadd.f32 %v3676_v8, %v4535_v44  ;;  %v1917_v30 = vpop.f32.mrb[25].mxu0  ;;  %3107 = vrot.lane.b32.xlu0 %v3066_v51, %s3764_s15  ;;  %2849 = vrot.lane.b32.xlu1 %v2808_v54, %s3763_s12 }
 0x2bc   : > { %2882 = vst.msk [vmem:[#allocation5 + $0x10] sm:$0xff] %vm2879_vm8, %v4699_v33  ;;  %v1918_v11 = vadd.f32 %v4535_v44, %v1917_v30  ;;  %3689 = vmatmul.mubr.msk.bf16.vlgmr.msra.gmra.mrb[0].mxu1 %vm3197_vm11, %v3155_v9  ;;  %v3677_v12 = vpop.f32.mrb[26].mxu0 }
 0x2bd   : > { %2495 = vst.msk [vmem:[#allocation5 + $0x18] sm:$0xff] %vm2491_vm5, %v4701_v34  ;;  %v1974_v60 = vmax.f32 %v1926_v57, 0.0  ;;  %v1929_v14 = vadd.f32 %v3677_v12, %v4535_v44  ;;  %v1920_v16 = vpop.f32.mrb[27].mxu0  ;;  %v4755_v17 = vpop.permute.xlu0 %2839 }
 0x2be   : > { %3011 = vst.msk [vmem:[#allocation5 + $0x10] sm:$0xff] %vm3008_vm9, %v2965_v20  ;;  %v1972_v5 = vmax.f32 %v1918_v11, 0.0  ;;  %v1921_v19 = vadd.f32 %v4535_v44, %v1920_v16  ;;  %v4758_v21 = vpop.permute.xlu1 %2453 }
 0x2bf   : > { %2624 = vst.msk [vmem:[#allocation5 + $0x18] sm:$0xff] %vm2620_vm6, %v2579_v40  ;;  %v1975_v0 = vmax.f32 %v1929_v14, 0.0  ;;  %2463 = vrot.lane.b32.xlu0 %v2808_v54, %s3769_s7  ;;  %2978 = vrot.lane.b32.xlu1 %v2937_v18, %s3770_s10 }
 0x2c0   : > { %3140 = vst.msk [vmem:[#allocation5 + $0x10] sm:$0xff] %vm3137_vm10, %v4713_v41  ;;  %v1973_v22 = vmax.f32 %v1921_v19, 0.0 }
 0x2c1   : > { %2753 = vst.msk [vmem:[#allocation5 + $0x18] sm:$0xff] %vm2749_vm7, %v4715_v43  ;;  %v4765_v35 = vpop.permute.xlu0 %2968 }
 0x2c2   : > { %2052 = vst.msk [vmem:[#allocation4 + $0x151] sm:$0xff] %vm352_vm0, %v1974_v60  ;;  %2050 = vst.msk [vmem:[#allocation4 + $0x139] sm:$0xff] %vm352_vm0, %v1972_v5  ;;  %v4768_v23 = vpop.permute.xlu1 %2582 }
 0x2c3   : > { %2053 = vst.msk [vmem:[#allocation4 + $0x159] sm:$0xff] %vm352_vm0, %v1975_v0  ;;  %2051 = vst.msk [vmem:[#allocation4 + $0x141] sm:$0xff] %vm352_vm0, %v1973_v22  ;;  %2592 = vrot.lane.b32.xlu0 %v2937_v18, %s3762_s9  ;;  %2208 = vrot.lane.b32.xlu1 %v2937_v18, %s3760_s28 }
 0x2c5   : > { %v3098_v26 = vpop.permute.xlu0 %3097 }
 0x2c6   : > { %v4773_v15 = vpop.permute.xlu1 %2711 }
 0x2c7   : > { %v3156_v24 = vld [vmem:[#allocation5 + $0x10] sm:$0xff]  ;;  %2721 = vrot.lane.b32.xlu0 %v3066_v51, %s3771_s11  ;;  %2336 = vrot.lane.b32.xlu1 %v3066_v51, %s3761_s8 }
 0x2c8   : > { %3692 = vmatprep.mubr.msk.bf16.mxu1 %vm3197_vm11, %v3156_v24 }
 0x2c9   : > { %v2791_v27 = vld [vmem:[#allocation4 + $0x150] sm:$0xff]  ;;  %v2327_v29 = vpop.permute.xlu0 %2326  ;;  %v2403_v34 = vld [vmem:[#allocation4 + $0x138] sm:$0xff] }
 0x2ca   : > { %v2792_v28 = vld [vmem:[#allocation4 + $0x158] sm:$0xff]  ;;  %v2199_v32 = vpop.permute.xlu1 %2198  ;;  %v2404_v36 = vld [vmem:[#allocation4 + $0x140] sm:$0xff] }
 0x2cb   : > { %v2811_v31 = vpack.c.bf16 %v2792_v28, %v2791_v27  ;;  %v2921_v33 = vld [vmem:[#allocation4 + $0x159] sm:$0xff]  ;;  %2240 = vst.msk [vmem:[#allocation5 + $0x30] sm:$0xff] %vm545_vm4, %v2199_v32  ;;  %v2423_v37 = vpack.c.bf16 %v2404_v36, %v2403_v34  ;;  %v2920_v38 = vld [vmem:[#allocation4 + $0x151] sm:$0xff]  ;;  %v3048_v45 = vld [vmem:[#allocation4 + $0x142] sm:$0xff] }
 0x2cc   : > { %2369 = vst.msk [vmem:[#allocation5 + $0x30] sm:$0xff] %vm2362_vm2, %v2327_v29  ;;  %v4782_v20 = vpack.c.bf16 %v2921_v33, %v2920_v38  ;;  %v2663_v40 = vld [vmem:[#allocation4 + $0x152] sm:$0xff]  ;;  %v3047_v43 = vld [vmem:[#allocation4 + $0x13a] sm:$0xff] }
 0x2cd   : > { %2855 = vrot.lane.b32.xlu0 %v2811_v31, %s3763_s12  ;;  %2469 = vrot.lane.b32.xlu1 %v2811_v31, %s3769_s7  ;;  %2120 = vst.msk [vmem:[#allocation5 + $0x70] sm:$0xff] %vm352_vm0, %v2811_v31  ;;  %v3096_v39 = vpop.permute.xlu0 %3095  ;;  %2119 = vst.msk [vmem:[#allocation5 + $0x68] sm:$0xff] %vm352_vm0, %v2423_v37  ;;  %v2664_v46 = vld [vmem:[#allocation4 + $0x15a] sm:$0xff]  ;;  %v3068_v48 = vpack.c.bf16 %v3048_v45, %v3047_v43 }
 0x2ce   : > { %v2838_v41 = vpop.permute.xlu1 %2837  ;;  %v4790_v49 = vpack.c.bf16 %v2664_v46, %v2663_v40  ;;  %v2533_v54 = vld [vmem:[#allocation4 + $0x141] sm:$0xff]  ;;  %v2532_v53 = vld [vmem:[#allocation4 + $0x139] sm:$0xff] }
 0x2cf   : > { %2883 = vst.msk [vmem:[#allocation5 + $0x18] sm:$0xff] %vm2879_vm8, %v2838_v41  ;;  %v2552_v55 = vpack.c.bf16 %v2533_v54, %v2532_v53  ;;  %v2797_v46 = vld [vmem:[#allocation4 + $0x198] sm:$0xff]  ;;  %v2927_v53 = vld [vmem:[#allocation4 + $0x1a1] sm:$0xff] }
 0x2d0   : > { %v2926_v54 = vld [vmem:[#allocation4 + $0x199] sm:$0xff] }
 0x2d1   : > { %2984 = vrot.lane.b32.xlu0 %v4782_v20, %s3770_s10  ;;  %2598 = vrot.lane.b32.xlu1 %v4782_v20, %s3762_s9  ;;  %v2452_v47 = vpop.permute.xlu0 %2451 }
 0x2d2   : > { %2496 = vst.msk [vmem:[#allocation5 + $0x20] sm:$0xff] %vm2491_vm5, %v2452_v47  ;;  %v2967_v50 = vpop.permute.xlu1 %2966  ;;  %v2798_v47 = vld [vmem:[#allocation4 + $0x1a0] sm:$0xff] }
 0x2d3   : > { %3012 = vst.msk [vmem:[#allocation5 + $0x18] sm:$0xff] %vm3008_vm9, %v2967_v50 }
 0x2d4   : > { %3141 = vst.msk [vmem:[#allocation5 + $0x18] sm:$0xff] %vm3137_vm10, %v3096_v39 }
 0x2d5   : > { %3111 = vrot.lane.b32.xlu0 %v3068_v48, %s3764_s15  ;;  %2727 = vrot.lane.b32.xlu1 %v4790_v49, %s3771_s11  ;;  %v2581_v52 = vpop.permute.xlu0 %2580 }
 0x2d6   : > { %2625 = vst.msk [vmem:[#allocation5 + $0x20] sm:$0xff] %vm2620_vm6, %v2581_v52  ;;  %v2197_v42 = vpop.permute.xlu1 %2196 }
 0x2d7   : > { %2239 = vst.msk [vmem:[#allocation5 + $0x28] sm:$0xff] %vm545_vm4, %v2197_v42  ;;  %v2814_v42 = vpack.c.bf16 %v2798_v47, %v2797_v46 }
 0x2d9   : > { %2467 = vrot.lane.b32.xlu0 %v2423_v37, %s3769_s7  ;;  %2853 = vrot.lane.b32.xlu1 %v2423_v37, %s3763_s12  ;;  %v2710_v25 = vpop.permute.xlu0 %2709 }
 0x2da   : > { %2754 = vst.msk [vmem:[#allocation5 + $0x20] sm:$0xff] %vm2749_vm7, %v2710_v25  ;;  %v2325_v56 = vpop.permute.xlu1 %2324 }
 0x2db   : > { %2884 = vst.msk [vmem:[#allocation5 + $0x20] sm:$0xff] %vm2879_vm8, %v4755_v17  ;;  %v3157_v58 = vld [vmem:[#allocation5 + $0x18] sm:$0xff] }
 0x2dc   : > { %2368 = vst.msk [vmem:[#allocation5 + $0x28] sm:$0xff] %vm2362_vm2, %v2325_v56  ;;  %3693 = vmatmul.mubr.msk.bf16.gmra.mrb[4].mxu1 %vm3197_vm11, %v3157_v58  ;;  %v2943_v56 = vpack.c.bf16 %v2927_v53, %v2926_v54  ;;  %v3055_v58 = vld [vmem:[#allocation4 + $0x19a] sm:$0xff] }
 0x2dd   : > { %2596 = vrot.lane.b32.xlu0 %v2552_v55, %s3762_s9  ;;  %2982 = vrot.lane.b32.xlu1 %v2552_v55, %s3770_s10  ;;  %3013 = vst.msk [vmem:[#allocation5 + $0x20] sm:$0xff] %vm3008_vm9, %v4765_v35  ;;  %v3680_v59 = vpop.f32.mrb[28].mxu0  ;;  %v4817_v62 = vpop.permute.xlu0 %2843 }
 0x2de   : > { %2497 = vst.msk [vmem:[#allocation5 + $0x28] sm:$0xff] %vm2491_vm5, %v4758_v21  ;;  %v1942_v61 = vadd.f32 %v3680_v59, %v4535_v44  ;;  %v1933_v63 = vpop.f32.mrb[29].mxu0  ;;  %v4821_v1 = vpop.permute.xlu1 %2457  ;;  %v3056_v59 = vld [vmem:[#allocation4 + $0x1a2] sm:$0xff] }
 0x2df   : > { %3142 = vst.msk [vmem:[#allocation5 + $0x20] sm:$0xff] %vm3137_vm10, %v3098_v26  ;;  %v1934_v2 = vadd.f32 %v4535_v44, %v1933_v63  ;;  %v3681_v3 = vpop.f32.mrb[30].mxu0  ;;  %v3072_v63 = vpack.c.bf16 %v3056_v59, %v3055_v58 }
 0x2e0   : > { %2626 = vst.msk [vmem:[#allocation5 + $0x28] sm:$0xff] %vm2620_vm6, %v4768_v23  ;;  %v1978_v4 = vmax.f32 %v1942_v61, 0.0  ;;  %v1945_v6 = vadd.f32 %v3681_v3, %v4535_v44  ;;  %v1936_v7 = vpop.f32.mrb[31].mxu0 }
 0x2e1   : > { %2755 = vst.msk [vmem:[#allocation5 + $0x28] sm:$0xff] %vm2749_vm7, %v4773_v15  ;;  %2725 = vrot.lane.b32.xlu0 %v3068_v48, %s3771_s11  ;;  %2212 = vrot.lane.b32.xlu1 %v2552_v55, %s3760_s28  ;;  %v1976_v51 = vmax.f32 %v1934_v2, 0.0  ;;  %v1937_v8 = vadd.f32 %v4535_v44, %v1936_v7  ;;  %v2973_v10 = vpop.permute.xlu0 %2972 }
 0x2e2   : > { %2056 = vst.msk [vmem:[#allocation4 + $0x181] sm:$0xff] %vm352_vm0, %v1978_v4  ;;  %v1979_v9 = vmax.f32 %v1945_v6, 0.0  ;;  %v2587_v30 = vpop.permute.xlu1 %2586 }
 0x2e3   : > { %2054 = vst.msk [vmem:[#allocation4 + $0x169] sm:$0xff] %vm352_vm0, %v1976_v51  ;;  %v1977_v57 = vmax.f32 %v1937_v8, 0.0 }
 0x2e4   : > { %2057 = vst.msk [vmem:[#allocation4 + $0x189] sm:$0xff] %vm352_vm0, %v1979_v9 }
 0x2e5   : > { %3113 = vrot.lane.b32.xlu0 %v4790_v49, %s3764_s15  ;;  %2340 = vrot.lane.b32.xlu1 %v3068_v48, %s3761_s8  ;;  %2055 = vst.msk [vmem:[#allocation4 + $0x171] sm:$0xff] %vm352_vm0, %v1977_v57  ;;  %v3102_v12 = vpop.permute.xlu0 %3101 }
 0x2e6   : > { %v3158_v11 = vld [vmem:[#allocation5 + $0x20] sm:$0xff]  ;;  %v2716_v44 = vpop.permute.xlu1 %2715 }
 0x2e7   : > { %3696 = vmatprep.mubr.msk.bf16.mxu1 %vm3197_vm11, %v3158_v11 }
 0x2e9   : > { %2214 = vrot.lane.b32.xlu1 %v4782_v20, %s3760_s28  ;;  %v2331_v13 = vpop.permute.xlu0 %2330  ;;  %v2409_v33 = vld [vmem:[#allocation4 + $0x180] sm:$0xff] }
 0x2ea   : > { %v2203_v60 = vpop.permute.xlu1 %2202  ;;  %v2793_v14 = vld [vmem:[#allocation4 + $0x168] sm:$0xff] }
 0x2eb   : > { %2242 = vst.msk [vmem:[#allocation5 + $0x40] sm:$0xff] %vm545_vm4, %v2203_v60  ;;  %v2922_v35 = vld [vmem:[#allocation4 + $0x169] sm:$0xff]  ;;  %v2538_v39 = vld [vmem:[#allocation4 + $0x181] sm:$0xff] }
 0x2ec   : > { %v3051_v16 = vld [vmem:[#allocation4 + $0x16a] sm:$0xff]  ;;  %v3052_v17 = vld [vmem:[#allocation4 + $0x172] sm:$0xff]  ;;  %2371 = vst.msk [vmem:[#allocation5 + $0x40] sm:$0xff] %vm2362_vm2, %v2331_v13  ;;  %v2667_v41 = vld [vmem:[#allocation4 + $0x182] sm:$0xff] }
 0x2ed   : > { %v2794_v18 = vld [vmem:[#allocation4 + $0x170] sm:$0xff]  ;;  %v3070_v5 = vpack.c.bf16 %v3052_v17, %v3051_v16  ;;  %v3100_v21 = vpop.permute.xlu0 %3099  ;;  %v2410_v29 = vld [vmem:[#allocation4 + $0x188] sm:$0xff] }
 0x2ee   : > { %v2812_v19 = vpack.c.bf16 %v2794_v18, %v2793_v14  ;;  %v2923_v0 = vld [vmem:[#allocation4 + $0x171] sm:$0xff]  ;;  %v2842_v22 = vpop.permute.xlu1 %2841  ;;  %v2426_v34 = vpack.c.bf16 %v2410_v29, %v2409_v33  ;;  %v2539_v37 = vld [vmem:[#allocation4 + $0x189] sm:$0xff] }
 0x2ef   : > { %3115 = vrot.lane.b32.xlu0 %v3070_v5, %s3764_s15  ;;  %2885 = vst.msk [vmem:[#allocation5 + $0x28] sm:$0xff] %vm2879_vm8, %v2842_v22  ;;  %v2941_v23 = vpack.c.bf16 %v2923_v0, %v2922_v35  ;;  %v2555_v20 = vpack.c.bf16 %v2539_v37, %v2538_v39  ;;  %v2668_v43 = vld [vmem:[#allocation4 + $0x18a] sm:$0xff] }
 0x2f0   : > { %2857 = vrot.lane.b32.xlu1 %v2812_v19, %s3763_s12  ;;  %2121 = vst.msk [vmem:[#allocation5 + $0x78] sm:$0xff] %vm352_vm0, %v2812_v19 }
 0x2f1   : > { %v2456_v24 = vpop.permute.xlu0 %2455 }
 0x2f2   : > { %2498 = vst.msk [vmem:[#allocation5 + $0x30] sm:$0xff] %vm2491_vm5, %v2456_v24  ;;  %v2971_v26 = vpop.permute.xlu1 %2970 }
 0x2f3   : > { %2342 = vrot.lane.b32.xlu0 %v4790_v49, %s3761_s8  ;;  %3014 = vst.msk [vmem:[#allocation5 + $0x28] sm:$0xff] %vm3008_vm9, %v2971_v26  ;;  %v2684_v49 = vpack.c.bf16 %v2668_v43, %v2667_v41 }
 0x2f4   : > { %2986 = vrot.lane.b32.xlu1 %v2941_v23, %s3770_s10  ;;  %3143 = vst.msk [vmem:[#allocation5 + $0x28] sm:$0xff] %vm3137_vm10, %v3100_v21 }
 0x2f5   : > { %v2585_v15 = vpop.permute.xlu0 %2584 }
 0x2f6   : > { %2627 = vst.msk [vmem:[#allocation5 + $0x30] sm:$0xff] %vm2620_vm6, %v2585_v15  ;;  %v2201_v27 = vpop.permute.xlu1 %2200 }
 0x2f7   : > { %2471 = vrot.lane.b32.xlu0 %v2812_v19, %s3769_s7  ;;  %2241 = vst.msk [vmem:[#allocation5 + $0x38] sm:$0xff] %vm545_vm4, %v2201_v27 }
 0x2f8   : > { %2216 = vrot.lane.b32.xlu1 %v2941_v23, %s3760_s28 }
 0x2f9   : > { %v2714_v28 = vpop.permute.xlu0 %2713 }
 0x2fa   : > { %2756 = vst.msk [vmem:[#allocation5 + $0x30] sm:$0xff] %vm2749_vm7, %v2714_v28  ;;  %v2329_v31 = vpop.permute.xlu1 %2328 }
 0x2fb   : > { %2600 = vrot.lane.b32.xlu0 %v2941_v23, %s3762_s9  ;;  %2886 = vst.msk [vmem:[#allocation5 + $0x30] sm:$0xff] %vm2879_vm8, %v4817_v62  ;;  %v3159_v32 = vld [vmem:[#allocation5 + $0x28] sm:$0xff] }
 0x2fc   : > { %2344 = vrot.lane.b32.xlu1 %v3070_v5, %s3761_s8  ;;  %2370 = vst.msk [vmem:[#allocation5 + $0x38] sm:$0xff] %vm2362_vm2, %v2329_v31  ;;  %3697 = vmatmul.mubr.msk.bf16.gmra.mrb[8].mxu1 %vm3197_vm11, %v3159_v32 }
 0x2fd   : > { %3015 = vst.msk [vmem:[#allocation5 + $0x30] sm:$0xff] %vm3008_vm9, %v2973_v10  ;;  %v2848_v36 = vpop.permute.xlu0 %2847 }
 0x2fe   : > { %2499 = vst.msk [vmem:[#allocation5 + $0x38] sm:$0xff] %vm2491_vm5, %v4821_v1  ;;  %v2462_v38 = vpop.permute.xlu1 %2461 }
 0x2ff   : > { %3144 = vst.msk [vmem:[#allocation5 + $0x30] sm:$0xff] %vm3137_vm10, %v3102_v12  ;;  %2729 = vrot.lane.b32.xlu0 %v3070_v5, %s3771_s11 }
 0x300   : > { %2628 = vst.msk [vmem:[#allocation5 + $0x38] sm:$0xff] %vm2620_vm6, %v2587_v30  ;;  %2473 = vrot.lane.b32.xlu1 %v2426_v34, %s3769_s7 }
 0x301   : > { %2757 = vst.msk [vmem:[#allocation5 + $0x38] sm:$0xff] %vm2749_vm7, %v2716_v44  ;;  %v2977_v40 = vpop.permute.xlu0 %2976 }
 0x302   : > { %v2591_v45 = vpop.permute.xlu1 %2590 }
 0x303   : > { %2859 = vrot.lane.b32.xlu0 %v2426_v34, %s3763_s12 }
 0x304   : > { %2602 = vrot.lane.b32.xlu1 %v2555_v20, %s3762_s9 }
 0x305   : > { %v3106_v50 = vpop.permute.xlu0 %3105 }
 0x306   : > { %v3160_v48 = vld [vmem:[#allocation5 + $0x30] sm:$0xff]  ;;  %v2720_v52 = vpop.permute.xlu1 %2719 }
 0x307   : > { %3700 = vmatprep.mubr.msk.bf16.mxu1 %vm3197_vm11, %v3160_v48  ;;  %2988 = vrot.lane.b32.xlu0 %v2555_v20, %s3770_s10 }
 0x308   : > { %2731 = vrot.lane.b32.xlu1 %v2684_v49, %s3771_s11 }
 0x309   : > { %v2335_v25 = vpop.permute.xlu0 %2334 }
 0x30a   : > { %v2207_v55 = vpop.permute.xlu1 %2206 }
 0x30b   : > { %3117 = vrot.lane.b32.xlu0 %v2684_v49, %s3764_s15  ;;  %2244 = vst.msk [vmem:[#allocation5 + $0x50] sm:$0xff] %vm545_vm4, %v2207_v55 }
 0x30c   : > { %2861 = vrot.lane.b32.xlu1 %v2814_v42, %s3763_s12  ;;  %2373 = vst.msk [vmem:[#allocation5 + $0x50] sm:$0xff] %vm2362_vm2, %v2335_v25 }
 0x30d   : > { %v3104_v61 = vpop.permute.xlu0 %3103 }
 0x30e   : > { %v2846_v62 = vpop.permute.xlu1 %2845 }
 0x30f   : > { %2887 = vst.msk [vmem:[#allocation5 + $0x38] sm:$0xff] %vm2879_vm8, %v2846_v62 }
 0x310   : > { %2990 = vrot.lane.b32.xlu1 %v2943_v56, %s3770_s10 }
 0x311   : > { %v2460_v1 = vpop.permute.xlu0 %2459 }
 0x312   : > { %2500 = vst.msk [vmem:[#allocation5 + $0x40] sm:$0xff] %vm2491_vm5, %v2460_v1  ;;  %v2975_v2 = vpop.permute.xlu1 %2974  ;;  %v4954_v1 = vld [vmem:[%s5067_s5] ss:$0 sm:$0xff] }
 0x313   : > { %3016 = vst.msk [vmem:[#allocation5 + $0x38] sm:$0xff] %vm3008_vm9, %v2975_v2 }
 0x314   : > { %3119 = vrot.lane.b32.xlu1 %v3072_v63, %s3764_s15  ;;  %3145 = vst.msk [vmem:[#allocation5 + $0x38] sm:$0xff] %vm3137_vm10, %v3104_v61  ;;  %s4962_s15 = scalar_lea.vmem %s5068_s6, %s3914_s24 }
 0x315   : > { %v2589_v3 = vpop.permute.xlu0 %2588 }
 0x316   : > { %2629 = vst.msk [vmem:[#allocation5 + $0x40] sm:$0xff] %vm2620_vm6, %v2589_v3  ;;  %v2205_v4 = vpop.permute.xlu1 %2204 }
 0x317   : > { %2243 = vst.msk [vmem:[#allocation5 + $0x48] sm:$0xff] %vm545_vm4, %v2205_v4 }
 0x319   : > { %v2718_v6 = vpop.permute.xlu0 %2717 }
 0x31a   : > { %2758 = vst.msk [vmem:[#allocation5 + $0x40] sm:$0xff] %vm2749_vm7, %v2718_v6  ;;  %v2333_v7 = vpop.permute.xlu1 %2332 }
 0x31b   : > { %2888 = vst.msk [vmem:[#allocation5 + $0x40] sm:$0xff] %vm2879_vm8, %v2848_v36  ;;  %v3161_v51 = vld [vmem:[#allocation5 + $0x38] sm:$0xff] }
 0x31c   : > { %2372 = vst.msk [vmem:[#allocation5 + $0x48] sm:$0xff] %vm2362_vm2, %v2333_v7  ;;  %3701 = vmatmul.mubr.msk.bf16.gmra.mrb[12].mxu1 %vm3197_vm11, %v3161_v51 }
 0x31d   : > { %3017 = vst.msk [vmem:[#allocation5 + $0x40] sm:$0xff] %vm3008_vm9, %v2977_v40  ;;  %v2852_v8 = vpop.permute.xlu0 %2851 }
 0x31e   : > { %2501 = vst.msk [vmem:[#allocation5 + $0x48] sm:$0xff] %vm2491_vm5, %v2462_v38  ;;  %v2466_v9 = vpop.permute.xlu1 %2465 }
 0x31f   : > { %3146 = vst.msk [vmem:[#allocation5 + $0x40] sm:$0xff] %vm3137_vm10, %v3106_v50 }
 0x320   : > { %2630 = vst.msk [vmem:[#allocation5 + $0x48] sm:$0xff] %vm2620_vm6, %v2591_v45 }
 0x321   : > { %2759 = vst.msk [vmem:[#allocation5 + $0x48] sm:$0xff] %vm2749_vm7, %v2720_v52  ;;  %v2981_v10 = vpop.permute.xlu0 %2980 }
 0x322   : > { %v2595_v57 = vpop.permute.xlu1 %2594 }
 0x325   : > { %v3110_v11 = vpop.permute.xlu0 %3109 }
 0x326   : > { %v3162_v30 = vld [vmem:[#allocation5 + $0x40] sm:$0xff]  ;;  %v2724_v12 = vpop.permute.xlu1 %2723 }
 0x327   : > { %3704 = vmatprep.mubr.msk.bf16.mxu1 %vm3197_vm11, %v3162_v30 }
 0x329   : > { %v2339_v44 = vpop.permute.xlu0 %2338 }
 0x32a   : > { %v2211_v13 = vpop.permute.xlu1 %2210 }
 0x32b   : > { %2246 = vst.msk [vmem:[#allocation5 + $0x60] sm:$0xff] %vm545_vm4, %v2211_v13 }
 0x32c   : > { %2375 = vst.msk [vmem:[#allocation5 + $0x60] sm:$0xff] %vm2362_vm2, %v2339_v44 }
 0x32d   : > { %v3108_v60 = vpop.permute.xlu0 %3107 }
 0x32e   : > { %v2850_v14 = vpop.permute.xlu1 %2849 }
 0x32f   : > { %2889 = vst.msk [vmem:[#allocation5 + $0x48] sm:$0xff] %vm2879_vm8, %v2850_v14 }
 0x331   : > { %v2464_v16 = vpop.permute.xlu0 %2463 }
 0x332   : > { %2502 = vst.msk [vmem:[#allocation5 + $0x50] sm:$0xff] %vm2491_vm5, %v2464_v16  ;;  %v2979_v17 = vpop.permute.xlu1 %2978 }
 0x333   : > { %3018 = vst.msk [vmem:[#allocation5 + $0x48] sm:$0xff] %vm3008_vm9, %v2979_v17 }
 0x334   : > { %3147 = vst.msk [vmem:[#allocation5 + $0x48] sm:$0xff] %vm3137_vm10, %v3108_v60 }
 0x335   : > { %v2593_v18 = vpop.permute.xlu0 %2592 }
 0x336   : > { %2631 = vst.msk [vmem:[#allocation5 + $0x50] sm:$0xff] %vm2620_vm6, %v2593_v18  ;;  %v2209_v5 = vpop.permute.xlu1 %2208 }
 0x337   : > { %2245 = vst.msk [vmem:[#allocation5 + $0x58] sm:$0xff] %vm545_vm4, %v2209_v5 }
 0x339   : > { %v2722_v19 = vpop.permute.xlu0 %2721 }
 0x33a   : > { %2760 = vst.msk [vmem:[#allocation5 + $0x50] sm:$0xff] %vm2749_vm7, %v2722_v19  ;;  %v2337_v21 = vpop.permute.xlu1 %2336 }
 0x33b   : > { %2890 = vst.msk [vmem:[#allocation5 + $0x50] sm:$0xff] %vm2879_vm8, %v2852_v8  ;;  %v3163_v0 = vld [vmem:[#allocation5 + $0x48] sm:$0xff] }
 0x33c   : > { %2374 = vst.msk [vmem:[#allocation5 + $0x58] sm:$0xff] %vm2362_vm2, %v2337_v21  ;;  %3705 = vmatmul.mubr.msk.bf16.gmra.mrb[16].mxu1 %vm3197_vm11, %v3163_v0 }
 0x33d   : > { %3019 = vst.msk [vmem:[#allocation5 + $0x50] sm:$0xff] %vm3008_vm9, %v2981_v10 }
 0x33e   : > { %2503 = vst.msk [vmem:[#allocation5 + $0x58] sm:$0xff] %vm2491_vm5, %v2466_v9 }
 0x33f   : > { %3148 = vst.msk [vmem:[#allocation5 + $0x50] sm:$0xff] %vm3137_vm10, %v3110_v11  ;;  %v2856_v22 = vpop.permute.xlu0 %2855  ;;  %v2470_v35 = vpop.permute.xlu1 %2469 }
 0x340   : > { %2632 = vst.msk [vmem:[#allocation5 + $0x58] sm:$0xff] %vm2620_vm6, %v2595_v57 }
 0x341   : > { %2761 = vst.msk [vmem:[#allocation5 + $0x58] sm:$0xff] %vm2749_vm7, %v2724_v12 }
 0x343   : > { %v2985_v23 = vpop.permute.xlu0 %2984  ;;  %v2599_v24 = vpop.permute.xlu1 %2598 }
 0x346   : > { %v3164_v26 = vld [vmem:[#allocation5 + $0x50] sm:$0xff] }
 0x347   : > { %v3112_v15 = vpop.permute.xlu0 %3111  ;;  %3708 = vmatprep.mubr.msk.bf16.mxu1 %vm3197_vm11, %v3164_v26  ;;  %v2728_v27 = vpop.permute.xlu1 %2727 }
 0x34b   : > { %v2468_v28 = vpop.permute.xlu0 %2467  ;;  %v2854_v29 = vpop.permute.xlu1 %2853 }
 0x34c   : > { %2504 = vst.msk [vmem:[#allocation5 + $0x60] sm:$0xff] %vm2491_vm5, %v2468_v28 }
 0x34d   : > { %2891 = vst.msk [vmem:[#allocation5 + $0x58] sm:$0xff] %vm2879_vm8, %v2854_v29 }
 0x34f   : > { %v2597_v31 = vpop.permute.xlu0 %2596  ;;  %v2983_v32 = vpop.permute.xlu1 %2982 }
 0x350   : > { %2633 = vst.msk [vmem:[#allocation5 + $0x60] sm:$0xff] %vm2620_vm6, %v2597_v31 }
 0x351   : > { %3020 = vst.msk [vmem:[#allocation5 + $0x58] sm:$0xff] %vm3008_vm9, %v2983_v32 }
 0x352   : > { %3149 = vst.msk [vmem:[#allocation5 + $0x58] sm:$0xff] %vm3137_vm10, %v3112_v15 }
 0x353   : > { %v2726_v33 = vpop.permute.xlu0 %2725  ;;  %v2213_v34 = vpop.permute.xlu1 %2212 }
 0x354   : > { %2762 = vst.msk [vmem:[#allocation5 + $0x60] sm:$0xff] %vm2749_vm7, %v2726_v33 }
 0x355   : > { %2892 = vst.msk [vmem:[#allocation5 + $0x60] sm:$0xff] %vm2879_vm8, %v2856_v22 }
 0x356   : > { %2247 = vst.msk [vmem:[#allocation5 + $0x68] sm:$0xff] %vm545_vm4, %v2213_v34 }
 0x357   : > { %3021 = vst.msk [vmem:[#allocation5 + $0x60] sm:$0xff] %vm3008_vm9, %v2985_v23  ;;  %v3114_v36 = vpop.permute.xlu0 %3113  ;;  %v2341_v37 = vpop.permute.xlu1 %2340 }
 0x358   : > { %3150 = vst.msk [vmem:[#allocation5 + $0x60] sm:$0xff] %vm3137_vm10, %v3114_v36 }
 0x359   : > { %2376 = vst.msk [vmem:[#allocation5 + $0x68] sm:$0xff] %vm2362_vm2, %v2341_v37  ;;  %v3165_v38 = vld [vmem:[#allocation5 + $0x58] sm:$0xff] }
 0x35a   : > { %2505 = vst.msk [vmem:[#allocation5 + $0x68] sm:$0xff] %vm2491_vm5, %v2470_v35  ;;  %3709 = vmatmul.mubr.msk.bf16.gmra.mrb[20].mxu1 %vm3197_vm11, %v3165_v38 }
 0x35b   : > { %2634 = vst.msk [vmem:[#allocation5 + $0x68] sm:$0xff] %vm2620_vm6, %v2599_v24  ;;  %v2215_v39 = vpop.permute.xlu1 %2214 }
 0x35c   : > { %2763 = vst.msk [vmem:[#allocation5 + $0x68] sm:$0xff] %vm2749_vm7, %v2728_v27 }
 0x35d   : > { %2248 = vst.msk [vmem:[#allocation5 + $0x70] sm:$0xff] %vm545_vm4, %v2215_v39 }
 0x35f   : > { %v3166_v20 = vld [vmem:[#allocation5 + $0x60] sm:$0xff] }
 0x360   : > { %3712 = vmatprep.mubr.msk.bf16.mxu1 %vm3197_vm11, %v3166_v20 }
 0x361   : > { %v3116_v40 = vpop.permute.xlu0 %3115 }
 0x362   : > { %v2858_v41 = vpop.permute.xlu1 %2857 }
 0x363   : > { %2893 = vst.msk [vmem:[#allocation5 + $0x68] sm:$0xff] %vm2879_vm8, %v2858_v41 }
 0x365   : > { %v2343_v43 = vpop.permute.xlu0 %2342 }
 0x366   : > { %v2987_v45 = vpop.permute.xlu1 %2986  ;;  %2377 = vst.msk [vmem:[#allocation5 + $0x70] sm:$0xff] %vm2362_vm2, %v2343_v43 }
 0x367   : > { %3022 = vst.msk [vmem:[#allocation5 + $0x68] sm:$0xff] %vm3008_vm9, %v2987_v45 }
 0x368   : > { %3151 = vst.msk [vmem:[#allocation5 + $0x68] sm:$0xff] %vm3137_vm10, %v3116_v40 }
 0x369   : > { %v2472_v46 = vpop.permute.xlu0 %2471 }
 0x36a   : > { %v2217_v47 = vpop.permute.xlu1 %2216  ;;  %2506 = vst.msk [vmem:[#allocation5 + $0x70] sm:$0xff] %vm2491_vm5, %v2472_v46 }
 0x36b   : > { %2249 = vst.msk [vmem:[#allocation5 + $0x78] sm:$0xff] %vm545_vm4, %v2217_v47 }
 0x36d   : > { %v2601_v48 = vpop.permute.xlu0 %2600 }
 0x36e   : > { %v2345_v49 = vpop.permute.xlu1 %2344  ;;  %2635 = vst.msk [vmem:[#allocation5 + $0x70] sm:$0xff] %vm2620_vm6, %v2601_v48 }
 0x36f   : > { %2378 = vst.msk [vmem:[#allocation5 + $0x78] sm:$0xff] %vm2362_vm2, %v2345_v49  ;;  %v3167_v50 = vld [vmem:[#allocation5 + $0x68] sm:$0xff] }
 0x370   : > { %3713 = vmatmul.mubr.msk.bf16.gmra.mrb[24].mxu1 %vm3197_vm11, %v3167_v50 }
 0x371   : > { %v2730_v52 = vpop.permute.xlu0 %2729 }
 0x372   : > { %v2474_v42 = vpop.permute.xlu1 %2473  ;;  %2764 = vst.msk [vmem:[#allocation5 + $0x70] sm:$0xff] %vm2749_vm7, %v2730_v52 }
 0x373   : > { %2507 = vst.msk [vmem:[#allocation5 + $0x78] sm:$0xff] %vm2491_vm5, %v2474_v42 }
 0x375   : > { %v2860_v54 = vpop.permute.xlu0 %2859 }
 0x376   : > { %v2603_v53 = vpop.permute.xlu1 %2602  ;;  %2894 = vst.msk [vmem:[#allocation5 + $0x70] sm:$0xff] %vm2879_vm8, %v2860_v54 }
 0x377   : > { %2636 = vst.msk [vmem:[#allocation5 + $0x78] sm:$0xff] %vm2620_vm6, %v2603_v53 }
 0x379   : > { %v2989_v25 = vpop.permute.xlu0 %2988 }
 0x37a   : > { %v2732_v55 = vpop.permute.xlu1 %2731  ;;  %3023 = vst.msk [vmem:[#allocation5 + $0x70] sm:$0xff] %vm3008_vm9, %v2989_v25 }
 0x37b   : > { %2765 = vst.msk [vmem:[#allocation5 + $0x78] sm:$0xff] %vm2749_vm7, %v2732_v55 }
 0x37d   : > { %v3118_v56 = vpop.permute.xlu0 %3117 }
 0x37e   : > { %v2862_v58 = vpop.permute.xlu1 %2861  ;;  %3152 = vst.msk [vmem:[#allocation5 + $0x70] sm:$0xff] %vm3137_vm10, %v3118_v56 }
 0x37f   : > { %2895 = vst.msk [vmem:[#allocation5 + $0x78] sm:$0xff] %vm2879_vm8, %v2862_v58 }
 0x382   : > { %v2991_v59 = vpop.permute.xlu1 %2990 }
 0x383   : > { %3024 = vst.msk [vmem:[#allocation5 + $0x78] sm:$0xff] %vm3008_vm9, %v2991_v59 }
 0x385   : > { %v3168_v62 = vld [vmem:[#allocation5 + $0x70] sm:$0xff] }
 0x386   : > { %v3120_v61 = vpop.permute.xlu1 %3119  ;;  %3716 = vmatprep.mubr.msk.bf16.mxu1 %vm3197_vm11, %v3168_v62 }
 0x387   : > { %3153 = vst.msk [vmem:[#allocation5 + $0x78] sm:$0xff] %vm3137_vm10, %v3120_v61 }
 0x38e   : > { %v3169_v63 = vld [vmem:[#allocation5 + $0x78] sm:$0xff] }
 0x38f   : > { %3717 = vmatmul.mubr.msk.bf16.gmra.mrb[28].mxu1 %vm3197_vm11, %v3169_v63  ;;  %v3690_v2 = vpop.f32.mrb[0].mxu1 }
 0x390   : > { %v3293_v3 = vadd.f32 %v3690_v2, %v4954_v1  ;;  %v3284_v4 = vpop.f32.mrb[1].mxu1 }
 0x391   : > { %v3285_v6 = vadd.f32 %v4954_v1, %v3284_v4  ;;  %v3691_v7 = vpop.f32.mrb[2].mxu1 }
 0x392   : > { %v3413_v51 = vmax.f32 %v3293_v3, 0.0  ;;  %v3296_v8 = vadd.f32 %v3691_v7, %v4954_v1  ;;  %v3287_v9 = vpop.f32.mrb[3].mxu1 }
 0x393   : > { %v3411_v10 = vmax.f32 %v3285_v6, 0.0  ;;  %v3288_v57 = vadd.f32 %v4954_v1, %v3287_v9 }
 0x394   : > { %3445 = vst.msk [vmem:[%s4962_s15 + $0x10] sm:$0xff] %vm352_vm0, %v3413_v51  ;;  %v3414_v30 = vmax.f32 %v3296_v8, 0.0 }
 0x395   : > { %3443 = vst.msk [vmem:[%s4962_s15] sm:$0xff] %vm352_vm0, %v3411_v10  ;;  %v3412_v11 = vmax.f32 %v3288_v57, 0.0 }
 0x396   : > { %3446 = vst.msk [vmem:[%s4962_s15 + $0x18] sm:$0xff] %vm352_vm0, %v3414_v30 }
 0x397   : > { %3444 = vst.msk [vmem:[%s4962_s15 + $0x8] sm:$0xff] %vm352_vm0, %v3412_v11 }
 0x3af   : > { %v3694_v12 = vpop.f32.mrb[4].mxu1 }
 0x3b0   : > { %v3309_v44 = vadd.f32 %v3694_v12, %v4954_v1  ;;  %v3300_v13 = vpop.f32.mrb[5].mxu1 }
 0x3b1   : > { %v3301_v60 = vadd.f32 %v4954_v1, %v3300_v13  ;;  %v3695_v14 = vpop.f32.mrb[6].mxu1 }
 0x3b2   : > { %v3417_v16 = vmax.f32 %v3309_v44, 0.0  ;;  %v3312_v17 = vadd.f32 %v3695_v14, %v4954_v1  ;;  %v3303_v18 = vpop.f32.mrb[7].mxu1 }
 0x3b3   : > { %v3415_v5 = vmax.f32 %v3301_v60, 0.0  ;;  %v3304_v19 = vadd.f32 %v4954_v1, %v3303_v18 }
 0x3b4   : > { %3449 = vst.msk [vmem:[%s4962_s15 + $0x30] sm:$0xff] %vm352_vm0, %v3417_v16  ;;  %v3418_v21 = vmax.f32 %v3312_v17, 0.0 }
 0x3b5   : > { %3447 = vst.msk [vmem:[%s4962_s15 + $0x20] sm:$0xff] %vm352_vm0, %v3415_v5  ;;  %v3416_v0 = vmax.f32 %v3304_v19, 0.0 }
 0x3b6   : > { %3450 = vst.msk [vmem:[%s4962_s15 + $0x38] sm:$0xff] %vm352_vm0, %v3418_v21 }
 0x3b7   : > { %3448 = vst.msk [vmem:[%s4962_s15 + $0x28] sm:$0xff] %vm352_vm0, %v3416_v0 }
 0x3cf   : > { %v3698_v22 = vpop.f32.mrb[8].mxu1 }
 0x3d0   : > { %v3325_v35 = vadd.f32 %v3698_v22, %v4954_v1  ;;  %v3316_v23 = vpop.f32.mrb[9].mxu1 }
 0x3d1   : > { %v3317_v24 = vadd.f32 %v4954_v1, %v3316_v23  ;;  %v3699_v26 = vpop.f32.mrb[10].mxu1 }
 0x3d2   : > { %v3421_v15 = vmax.f32 %v3325_v35, 0.0  ;;  %v3328_v27 = vadd.f32 %v3699_v26, %v4954_v1  ;;  %v3319_v28 = vpop.f32.mrb[11].mxu1 }
 0x3d3   : > { %v3419_v29 = vmax.f32 %v3317_v24, 0.0  ;;  %v3320_v31 = vadd.f32 %v4954_v1, %v3319_v28 }
 0x3d4   : > { %3453 = vst.msk [vmem:[%s4962_s15 + $0x50] sm:$0xff] %vm352_vm0, %v3421_v15  ;;  %v3422_v32 = vmax.f32 %v3328_v27, 0.0 }
 0x3d5   : > { %3451 = vst.msk [vmem:[%s4962_s15 + $0x40] sm:$0xff] %vm352_vm0, %v3419_v29  ;;  %v3420_v33 = vmax.f32 %v3320_v31, 0.0 }
 0x3d6   : > { %3454 = vst.msk [vmem:[%s4962_s15 + $0x58] sm:$0xff] %vm352_vm0, %v3422_v32 }
 0x3d7   : > { %3452 = vst.msk [vmem:[%s4962_s15 + $0x48] sm:$0xff] %vm352_vm0, %v3420_v33 }
 0x3ef   : > { %v3702_v34 = vpop.f32.mrb[12].mxu1 }
 0x3f0   : > { %v3341_v36 = vadd.f32 %v3702_v34, %v4954_v1  ;;  %v3332_v37 = vpop.f32.mrb[13].mxu1 }
 0x3f1   : > { %v3333_v38 = vadd.f32 %v4954_v1, %v3332_v37  ;;  %v3703_v39 = vpop.f32.mrb[14].mxu1 }
 0x3f2   : > { %v3425_v20 = vmax.f32 %v3341_v36, 0.0  ;;  %v3344_v40 = vadd.f32 %v3703_v39, %v4954_v1  ;;  %v3335_v41 = vpop.f32.mrb[15].mxu1 }
 0x3f3   : > { %v3423_v43 = vmax.f32 %v3333_v38, 0.0  ;;  %v3336_v45 = vadd.f32 %v4954_v1, %v3335_v41 }
 0x3f4   : > { %3457 = vst.msk [vmem:[%s4962_s15 + $0x70] sm:$0xff] %vm352_vm0, %v3425_v20  ;;  %v3426_v46 = vmax.f32 %v3344_v40, 0.0 }
 0x3f5   : > { %3455 = vst.msk [vmem:[%s4962_s15 + $0x60] sm:$0xff] %vm352_vm0, %v3423_v43  ;;  %v3424_v47 = vmax.f32 %v3336_v45, 0.0 }
 0x3f6   : > { %3458 = vst.msk [vmem:[%s4962_s15 + $0x78] sm:$0xff] %vm352_vm0, %v3426_v46 }
 0x3f7   : > { %3456 = vst.msk [vmem:[%s4962_s15 + $0x68] sm:$0xff] %vm352_vm0, %v3424_v47 }
 0x40f   : > { %v3706_v48 = vpop.f32.mrb[16].mxu1 }
 0x410   : > { %v3357_v49 = vadd.f32 %v3706_v48, %v4954_v1  ;;  %v3348_v50 = vpop.f32.mrb[17].mxu1 }
 0x411   : > { %v3349_v52 = vadd.f32 %v4954_v1, %v3348_v50  ;;  %v3707_v42 = vpop.f32.mrb[18].mxu1 }
 0x412   : > { %v3429_v54 = vmax.f32 %v3357_v49, 0.0  ;;  %v3360_v53 = vadd.f32 %v3707_v42, %v4954_v1  ;;  %v3351_v25 = vpop.f32.mrb[19].mxu1 }
 0x413   : > { %v3427_v55 = vmax.f32 %v3349_v52, 0.0  ;;  %v3352_v56 = vadd.f32 %v4954_v1, %v3351_v25 }
 0x414   : > { %3461 = vst.msk [vmem:[%s4962_s15 + $0x90] sm:$0xff] %vm352_vm0, %v3429_v54  ;;  %v3430_v58 = vmax.f32 %v3360_v53, 0.0 }
 0x415   : > { %3459 = vst.msk [vmem:[%s4962_s15 + $0x80] sm:$0xff] %vm352_vm0, %v3427_v55  ;;  %v3428_v59 = vmax.f32 %v3352_v56, 0.0 }
 0x416   : > { %3462 = vst.msk [vmem:[%s4962_s15 + $0x98] sm:$0xff] %vm352_vm0, %v3430_v58 }
 0x417   : > { %3460 = vst.msk [vmem:[%s4962_s15 + $0x88] sm:$0xff] %vm352_vm0, %v3428_v59 }
 0x42d   : > { %v3710_v61 = vpop.f32.mrb[20].mxu1 }
 0x42e   : > { %v3373_v62 = vadd.f32 %v3710_v61, %v4954_v1  ;;  %v3364_v63 = vpop.f32.mrb[21].mxu1 }
 0x42f   : > { %v3365_v2 = vadd.f32 %v4954_v1, %v3364_v63  ;;  %v3711_v3 = vpop.f32.mrb[22].mxu1 }
 0x430   : > { %v3433_v4 = vmax.f32 %v3373_v62, 0.0  ;;  %v3376_v6 = vadd.f32 %v3711_v3, %v4954_v1  ;;  %v3367_v7 = vpop.f32.mrb[23].mxu1 }
 0x431   : > { %v3431_v51 = vmax.f32 %v3365_v2, 0.0  ;;  %v3368_v8 = vadd.f32 %v4954_v1, %v3367_v7 }
 0x432   : > { %3465 = vst.msk [vmem:[%s4962_s15 + $0xb0] sm:$0xff] %vm352_vm0, %v3433_v4  ;;  %v3434_v9 = vmax.f32 %v3376_v6, 0.0 }
 0x433   : > { %3463 = vst.msk [vmem:[%s4962_s15 + $0xa0] sm:$0xff] %vm352_vm0, %v3431_v51  ;;  %v3432_v10 = vmax.f32 %v3368_v8, 0.0 }
 0x434   : > { %3466 = vst.msk [vmem:[%s4962_s15 + $0xb8] sm:$0xff] %vm352_vm0, %v3434_v9 }
 0x435   : > { %3464 = vst.msk [vmem:[%s4962_s15 + $0xa8] sm:$0xff] %vm352_vm0, %v3432_v10 }
 0x443   : > { %v3714_v57 = vpop.f32.mrb[24].mxu1 }
 0x444   : > { %v3389_v30 = vadd.f32 %v3714_v57, %v4954_v1  ;;  %v3380_v11 = vpop.f32.mrb[25].mxu1 }
 0x445   : > { %v3381_v12 = vadd.f32 %v4954_v1, %v3380_v11  ;;  %v3715_v44 = vpop.f32.mrb[26].mxu1 }
 0x446   : > { %v3437_v13 = vmax.f32 %v3389_v30, 0.0  ;;  %v3392_v60 = vadd.f32 %v3715_v44, %v4954_v1  ;;  %v3383_v14 = vpop.f32.mrb[27].mxu1 }
 0x447   : > { %v3435_v16 = vmax.f32 %v3381_v12, 0.0  ;;  %v3384_v17 = vadd.f32 %v4954_v1, %v3383_v14 }
 0x448   : > { %3469 = vst.msk [vmem:[%s4962_s15 + $0xd0] sm:$0xff] %vm352_vm0, %v3437_v13  ;;  %v3438_v18 = vmax.f32 %v3392_v60, 0.0 }
 0x449   : > { %3467 = vst.msk [vmem:[%s4962_s15 + $0xc0] sm:$0xff] %vm352_vm0, %v3435_v16  ;;  %v3436_v5 = vmax.f32 %v3384_v17, 0.0 }
 0x44a   : > { %3470 = vst.msk [vmem:[%s4962_s15 + $0xd8] sm:$0xff] %vm352_vm0, %v3438_v18 }
 0x44b   : > { %3468 = vst.msk [vmem:[%s4962_s15 + $0xc8] sm:$0xff] %vm352_vm0, %v3436_v5 }
 0x462   : > { %v3718_v19 = vpop.f32.mrb[28].mxu1 }
 0x463   : > { %v3405_v21 = vadd.f32 %v3718_v19, %v4954_v1  ;;  %v3396_v0 = vpop.f32.mrb[29].mxu1 }
 0x464   : > { %v3397_v22 = vadd.f32 %v4954_v1, %v3396_v0  ;;  %v3719_v35 = vpop.f32.mrb[30].mxu1 }
 0x465   : > { %v3441_v23 = vmax.f32 %v3405_v21, 0.0  ;;  %v3408_v24 = vadd.f32 %v3719_v35, %v4954_v1  ;;  %v3399_v26 = vpop.f32.mrb[31].mxu1 }
 0x466   : > { %v3439_v15 = vmax.f32 %v3397_v22, 0.0  ;;  %v3400_v27 = vadd.f32 %v4954_v1, %v3399_v26 }
 0x467   : > { %3473 = vst.msk [vmem:[%s4962_s15 + $0xf0] sm:$0xff] %vm352_vm0, %v3441_v23  ;;  %v3442_v28 = vmax.f32 %v3408_v24, 0.0 }
 0x468   : > { %3471 = vst.msk [vmem:[%s4962_s15 + $0xe0] sm:$0xff] %vm352_vm0, %v3439_v15  ;;  %v3440_v29 = vmax.f32 %v3400_v27, 0.0 }
 0x469   : > { %3474 = vst.msk [vmem:[%s4962_s15 + $0xf8] sm:$0xff] %vm352_vm0, %v3442_v28 }
 0x46a   : > { %3472 = vst.msk [vmem:[%s4962_s15 + $0xe8] sm:$0xff] %vm352_vm0, %v3440_v29 }
 0x46b PF: > { %s16_s21 = sadd.s32 1, %s3757_s21  }
 0x46c   : > { %p13_p4 = scmp.ge.s32.totalorder %s16_s21, 4  }
 0x46e   :  { %15 = sbr.rel (!%p13_p4) target bundleno = 1 (0x1), region = 83 }

</bundles_post_ra>
